<compile_context>
chip_gen: v5e
topology: v5e:2x2
jax: 0.10.0
libtpu: 0.0.40
codegen_flags: <defaults>
</compile_context>

<pallas_src>
import functools

import numpy as np
import jax
import jax.numpy as jnp
from jax import lax
from jax.experimental import pallas as pl
from jax.experimental.pallas import tpu as pltpu

K = 7      # SpatialAttention kernel_size
PAD = 3    # padding for kernel_size=7
NMOD = 4   # number of SpatialAttention modules in PRIM


def _prim_kernel(wmat_ref, x_ref, out_ref, pad_ref, *, C, H, W, block_b):
    """block_b batch elements: 4x SpatialAttention (fused on MXU) + PRIM combine."""
    Wp = W + 2 * PAD
    CW = C * W

    # Zero the packed padded buffer once per grid step.  The interior is fully
    # overwritten for every batch element below; the halo is never written, so
    # it stays zero for all 4 modules x 2 (mean, max) channels.
    pad_ref[...] = jnp.zeros(pad_ref.shape, pad_ref.dtype)

    for b in range(block_b):
        x_all = x_ref[b]                                     # (H, 4*C*W)

        # ---- channel mean / max per module -> packed padded planes ----------
        for m in range(NMOD):
            base = m * CW
            chans = [x_all[:, base + c * W:base + (c + 1) * W] for c in range(C)]
            mean_c = chans[0]
            max_c = chans[0]
            for c in range(1, C):
                mean_c = mean_c + chans[c]
                max_c = jnp.maximum(max_c, chans[c])
            mean_c = mean_c * (1.0 / C)
            b0 = (2 * m) * Wp + PAD
            b1 = (2 * m + 1) * Wp + PAD
            pad_ref[PAD:PAD + H, b0:b0 + W] = mean_c
            pad_ref[PAD:PAD + H, b1:b1 + W] = max_c

        # ---- fused 7x7 conv for all 4 modules on the MXU ---------------------
        # att[h, m*W + j] = sum_{c,kh,kw} w[m,c,kh,kw] * padded_plane[m,c,h+kh,j+kw]
        acc = jnp.zeros((H, NMOD * W), jnp.float32)
        for kh in range(K):
            acc = acc + jnp.dot(pad_ref[kh:kh + H, :], wmat_ref[kh],
                                preferred_element_type=jnp.float32,
                                precision=lax.Precision.HIGHEST)
        att = jax.nn.sigmoid(acc)                            # (H, 4*W)

        # ---- gating + PRIM elementwise combine (lane-dense rows) -------------
        s = []
        for m in range(NMOD):
            att_m = att[:, m * W:(m + 1) * W]                # (H, W)
            gate = jnp.concatenate([att_m] * C, axis=-1)     # (H, C*W)
            s.append(x_all[:, m * CW:(m + 1) * CW] * gate)

        p1 = s[0] + s[1]
        p2 = s[1] + s[2]
        p3 = s[2] + s[3]
        a1 = p1 * p2 + p1 + p2
        a2 = p2 * p3 + p2 + p3
        out_ref[b] = a1 * a2 + a1 + a2


def _banded_weight_matrix(weights, W):
    """(4, 2, 7, 7) conv weights -> (7, 8*Wp, 4*W) block-diagonal banded matrix.

    wmat[kh, (2m+c)*Wp + wp, m*W + j] = weights[m, c, kh, wp - j]  (0 <= wp-j < 7)
    """
    Wp = W + 2 * PAD
    # Static Toeplitz band structure: E[kw, j+kw, j] = 1
    E = np.zeros((K, Wp, W), np.float32)
    j = np.arange(W)
    for kw in range(K):
        E[kw, j + kw, j] = 1.0
    E = jnp.asarray(E)
    # T[kh, m, c, wp, j] = sum_kw weights[m, c, kh, kw] * E[kw, wp, j]
    T = jnp.einsum('mckq,qpj->kmcpj', weights.astype(jnp.float32), E)
    wmat = jnp.zeros((K, 2 * NMOD * Wp, NMOD * W), jnp.float32)
    for m in range(NMOD):
        for c in range(2):
            r0 = (2 * m + c) * Wp
            wmat = wmat.at[:, r0:r0 + Wp, m * W:(m + 1) * W].set(T[:, m, c])
    return wmat


def _pick_block_b(B, per_elem_bytes):
    """Largest divisor of B keeping >=2 grid steps (megacore) and a modest tile."""
    budget = 2 << 20   # ~2 MiB of activations per grid step
    best = 1
    for d in range(1, B + 1):
        if B % d:
            continue
        if B >= 2 and B // d < 2:
            continue
        if d * per_elem_bytes > budget:
            continue
        best = d
    return best


def prim_pallas(m1, m2, m3, m4, weights):
    """weights: (4, 2, 7, 7) float32 — conv1 of S1..S4 (no bias)."""
    B, C, H, W = m1.shape
    Wp = W + 2 * PAD

    wmat = _banded_weight_matrix(weights, W)                 # (7, 8*Wp, 4*W)

    def to_lane_dense(x):
        # (B, C, H, W) -> (B, H, C*W) : channels folded into the lane axis.
        return jnp.transpose(x.astype(jnp.float32), (0, 2, 1, 3)).reshape(B, H, C * W)

    # Pack the 4 module inputs along the lane axis: (B, H, 4*C*W).
    x_all = jnp.concatenate([to_lane_dense(m) for m in (m1, m2, m3, m4)], axis=-1)

    per_elem_bytes = 5 * H * C * W * 4          # 4 inputs + 1 output per element
    block_b = _pick_block_b(B, per_elem_bytes)

    kern = functools.partial(_prim_kernel, C=C, H=H, W=W, block_b=block_b)
    in_spec = pl.BlockSpec((block_b, H, NMOD * C * W), lambda i: (i, 0, 0))
    out_spec = pl.BlockSpec((block_b, H, C * W), lambda i: (i, 0, 0))
    wmat_spec = pl.BlockSpec(wmat.shape, lambda i: (0, 0, 0))

    out = pl.pallas_call(
        kern,
        out_shape=jax.ShapeDtypeStruct((B, H, C * W), jnp.float32),
        grid=(B // block_b,),
        in_specs=[wmat_spec, in_spec],
        out_specs=out_spec,
        scratch_shapes=[pltpu.VMEM((H + 2 * PAD, 2 * NMOD * Wp), jnp.float32)],
        compiler_params=pltpu.CompilerParams(dimension_semantics=("parallel",)),
    )(wmat, x_all)

    # (B, H, C*W) -> (B, C, H, W)
    return jnp.transpose(out.reshape(B, H, C, W), (0, 2, 1, 3))


# ----- pure-JAX reference (for correctness check only) -----
def _spatial_attention_ref(x, w):
    mean_c = jnp.mean(x, axis=1, keepdims=True)
    max_c = jnp.max(x, axis=1, keepdims=True)
    feat = jnp.concatenate([mean_c, max_c], axis=1)          # (B, 2, H, W)
    att = lax.conv_general_dilated(
        feat, w, window_strides=(1, 1), padding=((PAD, PAD), (PAD, PAD)),
        dimension_numbers=("NCHW", "OIHW", "NCHW"),
        precision=lax.Precision.HIGHEST)
    return x * jax.nn.sigmoid(att)


def prim_ref(m1, m2, m3, m4, weights):
    s1 = _spatial_attention_ref(m1, weights[0][None])
    s2 = _spatial_attention_ref(m2, weights[1][None])
    s3 = _spatial_attention_ref(m3, weights[2][None])
    s4 = _spatial_attention_ref(m4, weights[3][None])
    p1 = s1 + s2
    p2 = s2 + s3
    p3 = s3 + s4
    a1 = p1 * p2 + p1 + p2
    a2 = p2 * p3 + p2 + p3
    return a1 * a2 + a1 + a2


if __name__ == "__main__":
    B, C, H, W = 2, 4, 16, 16
    key = jax.random.PRNGKey(0)
    k_m1, k_m2, k_m3, k_m4, k_w1, k_w2, k_w3, k_w4 = jax.random.split(key, 8)

    m1 = jax.random.normal(k_m1, (B, C, H, W), jnp.float32)
    m2 = jax.random.normal(k_m2, (B, C, H, W), jnp.float32)
    m3 = jax.random.normal(k_m3, (B, C, H, W), jnp.float32)
    m4 = jax.random.normal(k_m4, (B, C, H, W), jnp.float32)

    # Deterministic synthetic conv weights: 4 modules, each (2, 7, 7) -> (4,2,7,7)
    weights = jnp.stack([
        0.1 * jax.random.normal(k, (2, K, K), jnp.float32)
        for k in (k_w1, k_w2, k_w3, k_w4)
    ])

    out = jax.block_until_ready(prim_pallas(m1, m2, m3, m4, weights))
    ref = prim_ref(m1, m2, m3, m4, weights)

    assert out.shape == (B, C, H, W) and out.dtype == jnp.float32
    assert jnp.allclose(out, ref, rtol=1e-3, atol=1e-2), (
        float(jnp.max(jnp.abs(out - ref))))
    print("KERNEL_OK")
</pallas_src>

<mosaic_0001>
module attributes {stable_mosaic.version = 11 : i64} {
  func.func @_prim_kernel(%arg0: i32, %arg1: memref<7x176x64xf32, #tpu.memory_space<vmem>>, %arg2: memref<1x16x256xf32, #tpu.memory_space<vmem>>, %arg3: memref<1x16x64xf32, #tpu.memory_space<vmem>>, %arg4: memref<22x176xf32, #tpu.memory_space<vmem>>) attributes {dimension_semantics = [#tpu.dimension_semantics<parallel>], iteration_bounds = array<i64: 2>, scalar_prefetch = 0 : i64, scratch_operands = 1 : i64, tpu.core_type = #tpu.core_type<tc>, window_params = [{pipeline_mode = #tpu.pipeline_mode<synchronous>, transform_indices = @transform_0, window_bounds = array<i64: 7, 176, 64>}, {transform_indices = @transform_1, window_bounds = array<i64: 1, 16, 256>}, {transform_indices = @transform_2, window_bounds = array<i64: 1, 16, 64>}]} {
    %cst = arith.constant 0.000000e+00 : f32
    %0 = vector.broadcast %cst : f32 to vector<22x176xf32>
    %c0 = arith.constant 0 : index
    %c0_0 = arith.constant 0 : index
    %1 = vector.load %arg4[%c0, %c0_0] : memref<22x176xf32, #tpu.memory_space<vmem>>, vector<22x176xf32>
    tpu.vector_store %arg4[%c0, %c0_0], %0 {strides = array<i32>} : memref<22x176xf32, #tpu.memory_space<vmem>>, vector<22x176xf32>,
    %c0_1 = arith.constant 0 : index
    %c0_2 = arith.constant 0 : index
    %c0_3 = arith.constant 0 : index
    %2 = vector.load %arg2[%c0_1, %c0_2, %c0_3] : memref<1x16x256xf32, #tpu.memory_space<vmem>>, vector<1x16x256xf32>
    %3 = vector.shape_cast %2 : vector<1x16x256xf32> to vector<16x256xf32>
    %4 = vector.extract_strided_slice %3 {offsets = [0, 0], sizes = [16, 16], strides = [1, 1]} : vector<16x256xf32> to vector<16x16xf32>
    %5 = vector.extract_strided_slice %3 {offsets = [0, 16], sizes = [16, 16], strides = [1, 1]} : vector<16x256xf32> to vector<16x16xf32>
    %6 = vector.extract_strided_slice %3 {offsets = [0, 32], sizes = [16, 16], strides = [1, 1]} : vector<16x256xf32> to vector<16x16xf32>
    %7 = vector.extract_strided_slice %3 {offsets = [0, 48], sizes = [16, 16], strides = [1, 1]} : vector<16x256xf32> to vector<16x16xf32>
    %8 = arith.addf %4, %5 : vector<16x16xf32>
    %9 = arith.maximumf %4, %5 : vector<16x16xf32>
    %10 = arith.addf %8, %6 : vector<16x16xf32>
    %11 = arith.maximumf %9, %6 : vector<16x16xf32>
    %12 = arith.addf %10, %7 : vector<16x16xf32>
    %13 = arith.maximumf %11, %7 : vector<16x16xf32>
    %cst_4 = arith.constant 2.500000e-01 : f32
    %14 = vector.broadcast %cst_4 : f32 to vector<16x16xf32>
    %15 = arith.mulf %12, %14 : vector<16x16xf32>
    %c3 = arith.constant 3 : index
    %c3_5 = arith.constant 3 : index
    %16 = vector.load %arg4[%c3, %c3_5] : memref<22x176xf32, #tpu.memory_space<vmem>>, vector<16x16xf32>
    tpu.vector_store %arg4[%c3, %c3_5], %15 {strides = array<i32>} : memref<22x176xf32, #tpu.memory_space<vmem>>, vector<16x16xf32>,
    %c3_6 = arith.constant 3 : index
    %c25 = arith.constant 25 : index
    %17 = vector.load %arg4[%c3_6, %c25] : memref<22x176xf32, #tpu.memory_space<vmem>>, vector<16x16xf32>
    tpu.vector_store %arg4[%c3_6, %c25], %13 {strides = array<i32>} : memref<22x176xf32, #tpu.memory_space<vmem>>, vector<16x16xf32>,
    %18 = vector.extract_strided_slice %3 {offsets = [0, 64], sizes = [16, 16], strides = [1, 1]} : vector<16x256xf32> to vector<16x16xf32>
    %19 = vector.extract_strided_slice %3 {offsets = [0, 80], sizes = [16, 16], strides = [1, 1]} : vector<16x256xf32> to vector<16x16xf32>
    %20 = vector.extract_strided_slice %3 {offsets = [0, 96], sizes = [16, 16], strides = [1, 1]} : vector<16x256xf32> to vector<16x16xf32>
    %21 = vector.extract_strided_slice %3 {offsets = [0, 112], sizes = [16, 16], strides = [1, 1]} : vector<16x256xf32> to vector<16x16xf32>
    %22 = arith.addf %18, %19 : vector<16x16xf32>
    %23 = arith.maximumf %18, %19 : vector<16x16xf32>
    %24 = arith.addf %22, %20 : vector<16x16xf32>
    %25 = arith.maximumf %23, %20 : vector<16x16xf32>
    %26 = arith.addf %24, %21 : vector<16x16xf32>
    %27 = arith.maximumf %25, %21 : vector<16x16xf32>
    %cst_7 = arith.constant 2.500000e-01 : f32
    %28 = vector.broadcast %cst_7 : f32 to vector<16x16xf32>
    %29 = arith.mulf %26, %28 : vector<16x16xf32>
    %c3_8 = arith.constant 3 : index
    %c47 = arith.constant 47 : index
    %30 = vector.load %arg4[%c3_8, %c47] : memref<22x176xf32, #tpu.memory_space<vmem>>, vector<16x16xf32>
    tpu.vector_store %arg4[%c3_8, %c47], %29 {strides = array<i32>} : memref<22x176xf32, #tpu.memory_space<vmem>>, vector<16x16xf32>,
    %c3_9 = arith.constant 3 : index
    %c69 = arith.constant 69 : index
    %31 = vector.load %arg4[%c3_9, %c69] : memref<22x176xf32, #tpu.memory_space<vmem>>, vector<16x16xf32>
    tpu.vector_store %arg4[%c3_9, %c69], %27 {strides = array<i32>} : memref<22x176xf32, #tpu.memory_space<vmem>>, vector<16x16xf32>,
    %32 = vector.extract_strided_slice %3 {offsets = [0, 128], sizes = [16, 16], strides = [1, 1]} : vector<16x256xf32> to vector<16x16xf32>
    %33 = vector.extract_strided_slice %3 {offsets = [0, 144], sizes = [16, 16], strides = [1, 1]} : vector<16x256xf32> to vector<16x16xf32>
    %34 = vector.extract_strided_slice %3 {offsets = [0, 160], sizes = [16, 16], strides = [1, 1]} : vector<16x256xf32> to vector<16x16xf32>
    %35 = vector.extract_strided_slice %3 {offsets = [0, 176], sizes = [16, 16], strides = [1, 1]} : vector<16x256xf32> to vector<16x16xf32>
    %36 = arith.addf %32, %33 : vector<16x16xf32>
    %37 = arith.maximumf %32, %33 : vector<16x16xf32>
    %38 = arith.addf %36, %34 : vector<16x16xf32>
    %39 = arith.maximumf %37, %34 : vector<16x16xf32>
    %40 = arith.addf %38, %35 : vector<16x16xf32>
    %41 = arith.maximumf %39, %35 : vector<16x16xf32>
    %cst_10 = arith.constant 2.500000e-01 : f32
    %42 = vector.broadcast %cst_10 : f32 to vector<16x16xf32>
    %43 = arith.mulf %40, %42 : vector<16x16xf32>
    %c3_11 = arith.constant 3 : index
    %c91 = arith.constant 91 : index
    %44 = vector.load %arg4[%c3_11, %c91] : memref<22x176xf32, #tpu.memory_space<vmem>>, vector<16x16xf32>
    tpu.vector_store %arg4[%c3_11, %c91], %43 {strides = array<i32>} : memref<22x176xf32, #tpu.memory_space<vmem>>, vector<16x16xf32>,
    %c3_12 = arith.constant 3 : index
    %c113 = arith.constant 113 : index
    %45 = vector.load %arg4[%c3_12, %c113] : memref<22x176xf32, #tpu.memory_space<vmem>>, vector<16x16xf32>
    tpu.vector_store %arg4[%c3_12, %c113], %41 {strides = array<i32>} : memref<22x176xf32, #tpu.memory_space<vmem>>, vector<16x16xf32>,
    %46 = vector.extract_strided_slice %3 {offsets = [0, 192], sizes = [16, 16], strides = [1, 1]} : vector<16x256xf32> to vector<16x16xf32>
    %47 = vector.extract_strided_slice %3 {offsets = [0, 208], sizes = [16, 16], strides = [1, 1]} : vector<16x256xf32> to vector<16x16xf32>
    %48 = vector.extract_strided_slice %3 {offsets = [0, 224], sizes = [16, 16], strides = [1, 1]} : vector<16x256xf32> to vector<16x16xf32>
    %49 = vector.extract_strided_slice %3 {offsets = [0, 240], sizes = [16, 16], strides = [1, 1]} : vector<16x256xf32> to vector<16x16xf32>
    %50 = arith.addf %46, %47 : vector<16x16xf32>
    %51 = arith.maximumf %46, %47 : vector<16x16xf32>
    %52 = arith.addf %50, %48 : vector<16x16xf32>
    %53 = arith.maximumf %51, %48 : vector<16x16xf32>
    %54 = arith.addf %52, %49 : vector<16x16xf32>
    %55 = arith.maximumf %53, %49 : vector<16x16xf32>
    %cst_13 = arith.constant 2.500000e-01 : f32
    %56 = vector.broadcast %cst_13 : f32 to vector<16x16xf32>
    %57 = arith.mulf %54, %56 : vector<16x16xf32>
    %c3_14 = arith.constant 3 : index
    %c135 = arith.constant 135 : index
    %58 = vector.load %arg4[%c3_14, %c135] : memref<22x176xf32, #tpu.memory_space<vmem>>, vector<16x16xf32>
    tpu.vector_store %arg4[%c3_14, %c135], %57 {strides = array<i32>} : memref<22x176xf32, #tpu.memory_space<vmem>>, vector<16x16xf32>,
    %c3_15 = arith.constant 3 : index
    %c157 = arith.constant 157 : index
    %59 = vector.load %arg4[%c3_15, %c157] : memref<22x176xf32, #tpu.memory_space<vmem>>, vector<16x16xf32>
    tpu.vector_store %arg4[%c3_15, %c157], %55 {strides = array<i32>} : memref<22x176xf32, #tpu.memory_space<vmem>>, vector<16x16xf32>,
    %cst_16 = arith.constant 0.000000e+00 : f32
    %60 = vector.broadcast %cst_16 : f32 to vector<16x64xf32>
    %c0_17 = arith.constant 0 : index
    %c0_18 = arith.constant 0 : index
    %61 = vector.load %arg4[%c0_17, %c0_18] : memref<22x176xf32, #tpu.memory_space<vmem>>, vector<16x176xf32>
    %c0_19 = arith.constant 0 : index
    %c0_20 = arith.constant 0 : index
    %c0_21 = arith.constant 0 : index
    %62 = vector.load %arg1[%c0_19, %c0_20, %c0_21] : memref<7x176x64xf32, #tpu.memory_space<vmem>>, vector<1x176x64xf32>
    %63 = vector.shape_cast %62 : vector<1x176x64xf32> to vector<176x64xf32>
    %cst_22 = arith.constant dense<0.000000e+00> : vector<16x64xf32>
    %64 = tpu.matmul %61, %63, %cst_22 {dimension_numbers = #tpu.dot_dimension_numbers<[1], [0], [0], [1], [0, 0, 1, 1], [], []>, precision = #tpu.contract_precision<fp32>} : vector<16x176xf32>, vector<176x64xf32>, vector<16x64xf32> -> vector<16x64xf32>
    %65 = arith.addf %60, %64 : vector<16x64xf32>
    %c1 = arith.constant 1 : index
    %c0_23 = arith.constant 0 : index
    %66 = vector.load %arg4[%c1, %c0_23] : memref<22x176xf32, #tpu.memory_space<vmem>>, vector<16x176xf32>
    %c1_24 = arith.constant 1 : index
    %c0_25 = arith.constant 0 : index
    %c0_26 = arith.constant 0 : index
    %67 = vector.load %arg1[%c1_24, %c0_25, %c0_26] : memref<7x176x64xf32, #tpu.memory_space<vmem>>, vector<1x176x64xf32>
    %68 = vector.shape_cast %67 : vector<1x176x64xf32> to vector<176x64xf32>
    %cst_27 = arith.constant dense<0.000000e+00> : vector<16x64xf32>
    %69 = tpu.matmul %66, %68, %cst_27 {dimension_numbers = #tpu.dot_dimension_numbers<[1], [0], [0], [1], [0, 0, 1, 1], [], []>, precision = #tpu.contract_precision<fp32>} : vector<16x176xf32>, vector<176x64xf32>, vector<16x64xf32> -> vector<16x64xf32>
    %70 = arith.addf %65, %69 : vector<16x64xf32>
    %c2 = arith.constant 2 : index
    %c0_28 = arith.constant 0 : index
    %71 = vector.load %arg4[%c2, %c0_28] : memref<22x176xf32, #tpu.memory_space<vmem>>, vector<16x176xf32>
    %c2_29 = arith.constant 2 : index
    %c0_30 = arith.constant 0 : index
    %c0_31 = arith.constant 0 : index
    %72 = vector.load %arg1[%c2_29, %c0_30, %c0_31] : memref<7x176x64xf32, #tpu.memory_space<vmem>>, vector<1x176x64xf32>
    %73 = vector.shape_cast %72 : vector<1x176x64xf32> to vector<176x64xf32>
    %cst_32 = arith.constant dense<0.000000e+00> : vector<16x64xf32>
    %74 = tpu.matmul %71, %73, %cst_32 {dimension_numbers = #tpu.dot_dimension_numbers<[1], [0], [0], [1], [0, 0, 1, 1], [], []>, precision = #tpu.contract_precision<fp32>} : vector<16x176xf32>, vector<176x64xf32>, vector<16x64xf32> -> vector<16x64xf32>
    %75 = arith.addf %70, %74 : vector<16x64xf32>
    %c3_33 = arith.constant 3 : index
    %c0_34 = arith.constant 0 : index
    %76 = vector.load %arg4[%c3_33, %c0_34] : memref<22x176xf32, #tpu.memory_space<vmem>>, vector<16x176xf32>
    %c3_35 = arith.constant 3 : index
    %c0_36 = arith.constant 0 : index
    %c0_37 = arith.constant 0 : index
    %77 = vector.load %arg1[%c3_35, %c0_36, %c0_37] : memref<7x176x64xf32, #tpu.memory_space<vmem>>, vector<1x176x64xf32>
    %78 = vector.shape_cast %77 : vector<1x176x64xf32> to vector<176x64xf32>
    %cst_38 = arith.constant dense<0.000000e+00> : vector<16x64xf32>
    %79 = tpu.matmul %76, %78, %cst_38 {dimension_numbers = #tpu.dot_dimension_numbers<[1], [0], [0], [1], [0, 0, 1, 1], [], []>, precision = #tpu.contract_precision<fp32>} : vector<16x176xf32>, vector<176x64xf32>, vector<16x64xf32> -> vector<16x64xf32>
    %80 = arith.addf %75, %79 : vector<16x64xf32>
    %c4 = arith.constant 4 : index
    %c0_39 = arith.constant 0 : index
    %81 = vector.load %arg4[%c4, %c0_39] : memref<22x176xf32, #tpu.memory_space<vmem>>, vector<16x176xf32>
    %c4_40 = arith.constant 4 : index
    %c0_41 = arith.constant 0 : index
    %c0_42 = arith.constant 0 : index
    %82 = vector.load %arg1[%c4_40, %c0_41, %c0_42] : memref<7x176x64xf32, #tpu.memory_space<vmem>>, vector<1x176x64xf32>
    %83 = vector.shape_cast %82 : vector<1x176x64xf32> to vector<176x64xf32>
    %cst_43 = arith.constant dense<0.000000e+00> : vector<16x64xf32>
    %84 = tpu.matmul %81, %83, %cst_43 {dimension_numbers = #tpu.dot_dimension_numbers<[1], [0], [0], [1], [0, 0, 1, 1], [], []>, precision = #tpu.contract_precision<fp32>} : vector<16x176xf32>, vector<176x64xf32>, vector<16x64xf32> -> vector<16x64xf32>
    %85 = arith.addf %80, %84 : vector<16x64xf32>
    %c5 = arith.constant 5 : index
    %c0_44 = arith.constant 0 : index
    %86 = vector.load %arg4[%c5, %c0_44] : memref<22x176xf32, #tpu.memory_space<vmem>>, vector<16x176xf32>
    %c5_45 = arith.constant 5 : index
    %c0_46 = arith.constant 0 : index
    %c0_47 = arith.constant 0 : index
    %87 = vector.load %arg1[%c5_45, %c0_46, %c0_47] : memref<7x176x64xf32, #tpu.memory_space<vmem>>, vector<1x176x64xf32>
    %88 = vector.shape_cast %87 : vector<1x176x64xf32> to vector<176x64xf32>
    %cst_48 = arith.constant dense<0.000000e+00> : vector<16x64xf32>
    %89 = tpu.matmul %86, %88, %cst_48 {dimension_numbers = #tpu.dot_dimension_numbers<[1], [0], [0], [1], [0, 0, 1, 1], [], []>, precision = #tpu.contract_precision<fp32>} : vector<16x176xf32>, vector<176x64xf32>, vector<16x64xf32> -> vector<16x64xf32>
    %90 = arith.addf %85, %89 : vector<16x64xf32>
    %c6 = arith.constant 6 : index
    %c0_49 = arith.constant 0 : index
    %91 = vector.load %arg4[%c6, %c0_49] : memref<22x176xf32, #tpu.memory_space<vmem>>, vector<16x176xf32>
    %c6_50 = arith.constant 6 : index
    %c0_51 = arith.constant 0 : index
    %c0_52 = arith.constant 0 : index
    %92 = vector.load %arg1[%c6_50, %c0_51, %c0_52] : memref<7x176x64xf32, #tpu.memory_space<vmem>>, vector<1x176x64xf32>
    %93 = vector.shape_cast %92 : vector<1x176x64xf32> to vector<176x64xf32>
    %cst_53 = arith.constant dense<0.000000e+00> : vector<16x64xf32>
    %94 = tpu.matmul %91, %93, %cst_53 {dimension_numbers = #tpu.dot_dimension_numbers<[1], [0], [0], [1], [0, 0, 1, 1], [], []>, precision = #tpu.contract_precision<fp32>} : vector<16x176xf32>, vector<176x64xf32>, vector<16x64xf32> -> vector<16x64xf32>
    %95 = arith.addf %90, %94 : vector<16x64xf32>
    %96 = arith.negf %95 : vector<16x64xf32>
    %97 = math.exp %96 : vector<16x64xf32>
    %cst_54 = arith.constant 1.000000e+00 : f32
    %98 = vector.broadcast %cst_54 : f32 to vector<16x64xf32>
    %99 = arith.addf %98, %97 : vector<16x64xf32>
    %100 = arith.divf %98, %99 : vector<16x64xf32>
    %101 = vector.extract_strided_slice %100 {offsets = [0, 0], sizes = [16, 16], strides = [1, 1]} : vector<16x64xf32> to vector<16x16xf32>
    %102 = tpu.concatenate %101, %101, %101, %101 in 1 : vector<16x16xf32>, vector<16x16xf32>, vector<16x16xf32>, vector<16x16xf32> -> vector<16x64xf32>
    %103 = vector.extract_strided_slice %3 {offsets = [0, 0], sizes = [16, 64], strides = [1, 1]} : vector<16x256xf32> to vector<16x64xf32>
    %104 = arith.mulf %103, %102 : vector<16x64xf32>
    %105 = vector.extract_strided_slice %100 {offsets = [0, 16], sizes = [16, 16], strides = [1, 1]} : vector<16x64xf32> to vector<16x16xf32>
    %106 = tpu.concatenate %105, %105, %105, %105 in 1 : vector<16x16xf32>, vector<16x16xf32>, vector<16x16xf32>, vector<16x16xf32> -> vector<16x64xf32>
    %107 = vector.extract_strided_slice %3 {offsets = [0, 64], sizes = [16, 64], strides = [1, 1]} : vector<16x256xf32> to vector<16x64xf32>
    %108 = arith.mulf %107, %106 : vector<16x64xf32>
    %109 = vector.extract_strided_slice %100 {offsets = [0, 32], sizes = [16, 16], strides = [1, 1]} : vector<16x64xf32> to vector<16x16xf32>
    %110 = tpu.concatenate %109, %109, %109, %109 in 1 : vector<16x16xf32>, vector<16x16xf32>, vector<16x16xf32>, vector<16x16xf32> -> vector<16x64xf32>
    %111 = vector.extract_strided_slice %3 {offsets = [0, 128], sizes = [16, 64], strides = [1, 1]} : vector<16x256xf32> to vector<16x64xf32>
    %112 = arith.mulf %111, %110 : vector<16x64xf32>
    %113 = vector.extract_strided_slice %100 {offsets = [0, 48], sizes = [16, 16], strides = [1, 1]} : vector<16x64xf32> to vector<16x16xf32>
    %114 = tpu.concatenate %113, %113, %113, %113 in 1 : vector<16x16xf32>, vector<16x16xf32>, vector<16x16xf32>, vector<16x16xf32> -> vector<16x64xf32>
    %115 = vector.extract_strided_slice %3 {offsets = [0, 192], sizes = [16, 64], strides = [1, 1]} : vector<16x256xf32> to vector<16x64xf32>
    %116 = arith.mulf %115, %114 : vector<16x64xf32>
    %117 = arith.addf %104, %108 : vector<16x64xf32>
    %118 = arith.addf %108, %112 : vector<16x64xf32>
    %119 = arith.addf %112, %116 : vector<16x64xf32>
    %120 = arith.mulf %117, %118 : vector<16x64xf32>
    %121 = arith.addf %120, %117 : vector<16x64xf32>
    %122 = arith.addf %121, %118 : vector<16x64xf32>
    %123 = arith.mulf %118, %119 : vector<16x64xf32>
    %124 = arith.addf %123, %118 : vector<16x64xf32>
    %125 = arith.addf %124, %119 : vector<16x64xf32>
    %126 = arith.mulf %122, %125 : vector<16x64xf32>
    %127 = arith.addf %126, %122 : vector<16x64xf32>
    %128 = arith.addf %127, %125 : vector<16x64xf32>
    %c0_55 = arith.constant 0 : index
    %c0_56 = arith.constant 0 : index
    %c0_57 = arith.constant 0 : index
    %129 = vector.load %arg3[%c0_55, %c0_56, %c0_57] : memref<1x16x64xf32, #tpu.memory_space<vmem>>, vector<1x16x64xf32>
    %130 = vector.shape_cast %129 : vector<1x16x64xf32> to vector<16x64xf32>
    %131 = vector.shape_cast %128 : vector<16x64xf32> to vector<1x16x64xf32>
    tpu.vector_store %arg3[%c0_55, %c0_56, %c0_57], %131 {strides = array<i32>} : memref<1x16x64xf32, #tpu.memory_space<vmem>>, vector<1x16x64xf32>,
    return
  }
  func.func @transform_0(%arg0: i32) -> (i32, i32, i32) {
    %c0_i32 = arith.constant 0 : i32
    %c0_i32_0 = arith.constant 0 : i32
    %c0_i32_1 = arith.constant 0 : i32
    %c0_i32_2 = arith.constant 0 : i32
    return %c0_i32, %c0_i32_0, %c0_i32_1 : i32, i32, i32
  }
  func.func @transform_1(%arg0: i32) -> (i32, i32, i32) {
    %c0_i32 = arith.constant 0 : i32
    %c0_i32_0 = arith.constant 0 : i32
    %c0_i32_1 = arith.constant 0 : i32
    return %arg0, %c0_i32, %c0_i32_0 : i32, i32, i32
  }
  func.func @transform_2(%arg0: i32) -> (i32, i32, i32) {
    %c0_i32 = arith.constant 0 : i32
    %c0_i32_0 = arith.constant 0 : i32
    %c0_i32_1 = arith.constant 0 : i32
    return %arg0, %c0_i32, %c0_i32_0 : i32, i32, i32
  }
}

</mosaic_0001>

<bundles_post_ra>
// kernel: tpu_custom_call.1
= control target key start
LH: loop header
LB: loop body
LE: loop exit
PB: predicated region body
PF: predicated region fallthrough
CT: control target
= control target key end

     0   :  { %7 = vsyncpa [#allocation4], 0  ;;  %s9321_s0 = inlined_call_operand.vmem [shape: f32[7,176,64], index: 0, kind: input, shape index: {}]   ;;  %s9322_s1 = inlined_call_operand.vmem [shape: f32[2,16,256], index: 1, kind: input, shape index: {}]   ;;  %s9323_s2 = inlined_call_operand.hbm [shape: f32[2,16,64], index: 2, kind: output, shape index: {}]  }
   0x1   :  { %9 = vsyncpa [#allocation4 + $0x1], 0  ;;  %s5607_s9 = smov 0   ;;  %s5609_s10 = smov 0  }
   0x2   :  { %s5611_s11 = smov 0   ;;  %s5613_s12 = smov 0  }
   0x3 LB: > { %s5628_s13 = sadd.s32 4294967295, %s5572_s12   ;;  %s5276_s14 = sadd.s32 4294967294, %s5572_s12   ;;  %s5572_s12 = sphi %s5613_s12, %s9738_s12   ;;  %s5568_s11 = sphi %s5611_s11, %s9737_s11   ;;  %s5564_s10 = sphi %s5609_s10, %s9736_s10   ;;  %s5560_s9 = sphi %s5607_s9, %s9735_s9  }
   0x4   : > { %s5632_s15 = sadd.s32 1, %s5572_s12   ;;  %s69_s16 = sadd.s32 1, %s5568_s11 }
   0x5   : > { %s66_s17 = ssub.s32 %s5572_s12, %s5632_s15  ;;  %p79_p0 = scmp.ne.s32.totalorder %s5568_s11, %s5564_s10 }
   0x6   : > { %p67_p1 = scmp.eq.s32.totalorder %s66_s17, 0  ;;  %p80_p2 = scmp.eq.s32.totalorder %s5628_s13, 1 }
   0x7   : > { %p85_p3 = scmp.ne.s32.totalorder %s5564_s10, %s5560_s9  ;;  %p86_p4 = scmp.eq.s32.totalorder %s5276_s14, 1 }
   0x8   : > { %s5643_s18 = scalar_select %p67_p1, %s5568_s11, %s69_s16  }
   0x9   : > { %p5645_p5 = por %p80_p2, %p79_p0  ;;  %p5649_p6 = por %p86_p4, %p85_p3 }
   0xa   : > { %p5279_p7 = scmp.ge.s32.totalorder %s5572_s12, 1  ;;  %p115_p8 = scmp.lt.s32.totalorder %s5572_s12, 3 }
   0xc   : > { %p116_p9 = pnand %p5279_p7, %p115_p8 }
   0xe   : > { %119 = sbr.rel (%p116_p9) target bundleno = 1611 (0x64b), region = 28 }
  0x13   : > { %p137_p10 = scmp.lt.s32.totalorder %s5628_s13, 1  ;;  %s5574_s26 = smov 96   ;;  %vm190_vm0 = vcmask 1042432   ;;  %vm143_vm1 = vcmask 392192   ;;  %v5585_v56 = vmov 0.0   ;;  %v5298_v57 = vld [vmem:[%s9321_s0 + $0x128] sm:$0xff] }
  0x14   : > { %s5575_s27 = smov 112   ;;  %s5576_s28 = smov 80   ;;  %146 = vst.msk [vmem:[#allocation2 + $0x18] sm:$0xff] %vm143_vm1, %v5585_v56  ;;  %v5701_v58 = vand.u32 4294901760, %v5298_v57  ;;  %v5297_v59 = vld [vmem:[%s9321_s0 + $0x120] sm:$0xff]  ;;  %v5296_v62 = vld [vmem:[%s9321_s0 + $0x118] sm:$0xff] }
  0x15   : > { %s138_s21 = scalar_select %p137_p10, %s5628_s13, 1  ;;  %142 = vst [vmem:[#allocation2] sm:$0xff] %v5585_v56  ;;  %v5709_v61 = vand.u32 4294901760, %v5297_v59  ;;  %vm148_vm2 = vcmask 390144   ;;  %vm333_vm3 = vcmask 7168   ;;  %vm329_vm4 = vcmask 7171  }
  0x16   : > { %s5577_s29 = smov 5   ;;  %s5578_s30 = smov 25   ;;  %144 = vst.msk [vmem:[#allocation2 + $0x8] sm:$0xff] %vm143_vm1, %v5585_v56  ;;  %v5707_v60 = vsub.f32 %v5298_v57, %v5701_v58  ;;  %446 = vmatpush.msra.mxu0 %v5701_v58  ;;  %659 = vmatpush.msra.mxu3 %v5701_v58  ;;  %v5286_v57 = vld [vmem:[%s9321_s0 + $0xc8] sm:$0xff]  ;;  %vm203_vm5 = vcmask 154651   ;;  %vm223_vm6 = vcmask 335051  }
  0x17   : > { %s5422_s22 = sshll.u32 %s138_s21, 5  ;;  %s5579_s3 = smov 113   ;;  %145 = vst [vmem:[#allocation2 + $0x10] sm:$0xff] %v5585_v56  ;;  %vm337_vm7 = vcmask 2048   ;;  %vm207_vm8 = vcmask 149528   ;;  %vm227_vm9 = vcmask 329928  }
  0x18   : > { %s5660_s25 = scalar_lea.vmem %s9322_s1, %s5422_s22  ;;  %s5580_s4 = smov 3   ;;  %147 = vst [vmem:[#allocation2 + $0x20] sm:$0x3f] %v5585_v56  ;;  %v496_v63 = vand.u32 4294901760, %v5707_v60  ;;  %448 = vmatpush.msra.mxu0 %v5709_v61  ;;  %601 = vmatpush.msra.mxu2 %v5707_v60  ;;  %vm242_vm10 = vcmask 510328   ;;  %vm257_vm11 = vcmask 690728  }
  0x19   : > { %v150_v0 = vld [vmem:[%s5660_s25] sm:$0xff]  ;;  %v152_v1 = vld [vmem:[%s5660_s25 + $0x10] sm:$0xff]  ;;  %v153_v2 = vld [vmem:[%s5660_s25 + $0x18] sm:$0xff]  ;;  %s5581_s5 = smov 91   ;;  %s5582_s6 = smov 111   ;;  %661 = vmatpush.msra.mxu3 %v5709_v61  ;;  %vm238_vm12 = vcmask 515451  }
  0x1a   : > { %166 = vrot.lane.b32.xlu1 %v150_v0, %s5574_s26  ;;  %156 = vrot.lane.b32.xlu0 %v150_v0, %s5575_s27  ;;  %v151_v3 = vld [vmem:[%s5660_s25 + $0x8] sm:$0xff]  ;;  %s5583_s7 = smov 71   ;;  %s5584_s8 = smov 93   ;;  %149 = vst.msk [vmem:[#allocation2 + $0x28] sm:$0x3f] %vm148_vm2, %v5585_v56  ;;  %v5285_v56 = vld [vmem:[%s9321_s0 + $0xc0] sm:$0xff] }
  0x1b   : > { %176 = vrot.lane.b32.xlu2 %v150_v0, %s5576_s28  ;;  %vm253_vm13 = vcmask 695851   ;;  %vm307_vm14 = vcmask 876251   ;;  %vm327_vm15 = vcmask 1048459   ;;  %vm348_vm2 = vcmask 187451   ;;  %s5530_s24 = scalar_lea.hbm %s9323_s2, 32 }
  0x22   : > { %168 = vrot.lane.b32.xlu1 %v152_v1, %s5574_s26  ;;  %158 = vrot.lane.b32.xlu0 %v152_v1, %s5575_s27 }
  0x23   : > { %178 = vrot.lane.b32.xlu2 %v152_v1, %s5576_s28 }
  0x2a   : > { %263 = vrot.lane.b32.xlu1 %v153_v2, %s5575_s27  ;;  %261 = vrot.lane.b32.xlu0 %v151_v3, %s5575_s27 }
  0x2b   : > { %271 = vrot.lane.b32.xlu2 %v151_v3, %s5574_s26 }
  0x32   : > { %281 = vrot.lane.b32.xlu1 %v151_v3, %s5576_s28  ;;  %273 = vrot.lane.b32.xlu0 %v153_v2, %s5574_s26 }
  0x33   : > { %283 = vrot.lane.b32.xlu2 %v153_v2, %s5576_s28 }
  0x75   : > { %v177_v4 = vpop.permute.xlu2 %176 }
  0x7d   : > { %v179_v9 = vpop.permute.xlu2 %178 }
  0x85   : > { %v272_v17 = vpop.permute.xlu2 %271 }
  0x8c   : > { %v167_v5 = vpop.permute.xlu1 %166  ;;  %v157_v6 = vpop.permute.xlu0 %156 }
  0x8d   : > { %v164_v7 = vmax.f32 %v150_v0, %v157_v6  ;;  %v162_v18 = vadd.f32 %v157_v6, %v150_v0  ;;  %v284_v29 = vpop.permute.xlu2 %283  ;;  %v5718_v0 = vsub.f32 %v5297_v59, %v5709_v61 }
  0x8f   : > { %v174_v8 = vmax.f32 %v164_v7, %v167_v5  ;;  %v172_v23 = vadd.f32 %v167_v5, %v162_v18  ;;  %604 = vmatpush.msra.mxu2 %v5718_v0  ;;  %v5294_v7 = vld [vmem:[%s9321_s0 + $0x108] sm:$0xff] }
  0x91   : > { %v184_v10 = vmax.f32 %v174_v8, %v177_v4  ;;  %v182_v26 = vadd.f32 %v177_v4, %v172_v23  ;;  %v502_v4 = vand.u32 4294901760, %v5718_v0 }
  0x93   : > { %v211_v11 = vrot.slane %v184_v10, 5  ;;  %v186_v36 = vmul.f32 0.25, %v182_v26 }
  0x94   : > { %v169_v12 = vpop.permute.xlu1 %168  ;;  %v159_v13 = vpop.permute.xlu0 %158 }
  0x95   : > { %v165_v14 = vmax.f32 %v152_v1, %v159_v13  ;;  %244 = vrot.lane.b32.xlu0 %v211_v11, %s5577_s29  ;;  %214 = vrot.lane.b32.xlu2 %v211_v11, %s5578_s30  ;;  %v163_v27 = vadd.f32 %v159_v13, %v152_v1  ;;  %v191_v43 = vrot.slane %v186_v36, 5  ;;  %v5720_v1 = vand.u32 4294901760, %v5296_v62  ;;  %v5293_v13 = vld [vmem:[%s9321_s0 + $0x100] sm:$0xff] }
  0x97   : > { %v175_v15 = vmax.f32 %v165_v14, %v169_v12  ;;  %v173_v37 = vadd.f32 %v169_v12, %v163_v27  ;;  %v5733_v5 = vsub.f32 %v5296_v62, %v5720_v1  ;;  %450 = vmatpush.msra.mxu0 %v5720_v1  ;;  %663 = vmatpush.msra.mxu3 %v5720_v1  ;;  %v5752_v12 = vand.u32 4294901760, %v5294_v7 }
  0x99   : > { %v185_v16 = vmax.f32 %v175_v15, %v179_v9  ;;  %v183_v44 = vadd.f32 %v179_v9, %v173_v37  ;;  %v503_v9 = vsub.f32 %v5718_v0, %v502_v4  ;;  %v508_v10 = vand.u32 4294901760, %v5733_v5  ;;  %607 = vmatpush.msra.mxu2 %v5733_v5  ;;  %v5289_v37 = vld [vmem:[%s9321_s0 + $0xe0] sm:$0xff] }
  0x9a   : > { %v5766_v18 = vsub.f32 %v5294_v7, %v5752_v12 }
  0x9b   : > { %v212_v19 = vrot.slane %v185_v16, 5  ;;  %v187_v48 = vmul.f32 0.25, %v183_v44  ;;  %v504_v14 = vand.u32 4294901760, %v503_v9  ;;  %v509_v15 = vsub.f32 %v5733_v5, %v508_v10  ;;  %v5288_v44 = vld [vmem:[%s9321_s0 + $0xd8] sm:$0xff] }
  0x9c   : > { %v264_v20 = vpop.permute.xlu1 %263  ;;  %v262_v21 = vpop.permute.xlu0 %261 }
  0x9d   : > { %248 = vrot.lane.b32.xlu0 %v212_v19, %s5577_s29  ;;  %v269_v22 = vmax.f32 %v151_v3, %v262_v21  ;;  %v267_v25 = vadd.f32 %v262_v21, %v151_v3  ;;  %v270_v28 = vmax.f32 %v153_v2, %v264_v20  ;;  %v213_v32 = vsel %vm190_vm0, %v211_v11, %v212_v19 }
  0x9e   : > { %v268_v41 = vadd.f32 %v264_v20, %v153_v2  ;;  %v192_v51 = vrot.slane %v187_v48, 5  ;;  %v5295_v2 = vld [vmem:[%s9321_s0 + $0x110] sm:$0xff]  ;;  %v497_v3 = vsub.f32 %v5707_v60, %v496_v63  ;;  %v510_v20 = vand.u32 4294901760, %v509_v15 }
  0x9f   : > { %v279_v24 = vmax.f32 %v269_v22, %v272_v17  ;;  %v277_v35 = vadd.f32 %v272_v17, %v267_v25  ;;  %v5735_v6 = vand.u32 4294901760, %v5295_v2  ;;  %v5762_v17 = vand.u32 4294901760, %v5293_v13  ;;  %v5291_v25 = vld [vmem:[%s9321_s0 + $0xf0] sm:$0xff] }
  0xa0   : > { %v193_v55 = vsel %vm190_vm0, %v191_v43, %v192_v51  ;;  %v498_v8 = vand.u32 4294901760, %v497_v3  ;;  %v5888_v15 = vand.u32 4294901760, %v5285_v56 }
  0xa1   : > { %v5748_v11 = vsub.f32 %v5295_v2, %v5735_v6  ;;  %452 = vmatpush.msra.mxu0 %v5735_v6  ;;  %665 = vmatpush.msra.mxu3 %v5735_v6  ;;  %v5777_v22 = vsub.f32 %v5293_v13, %v5762_v17  ;;  %v5868_v2 = vand.u32 4294901760, %v5286_v57 }
  0xa2   : > { %499 = vmatpush.msra.mxu1 %v498_v8 }
  0xa3   : > { %v514_v16 = vand.u32 4294901760, %v5748_v11  ;;  %610 = vmatpush.msra.mxu2 %v5748_v11  ;;  %454 = vmatpush.msra.mxu0 %v5752_v12  ;;  %v526_v27 = vand.u32 4294901760, %v5777_v22 }
  0xa4   : > { %v282_v30 = vpop.permute.xlu1 %281  ;;  %v274_v31 = vpop.permute.xlu0 %273  ;;  %667 = vmatpush.msra.mxu3 %v5752_v12  ;;  %505 = vmatpush.msra.mxu1 %v504_v14  ;;  %v5886_v14 = vsub.f32 %v5286_v57, %v5868_v2 }
  0xa5   : > { %v289_v33 = vmax.f32 %v279_v24, %v282_v30  ;;  %v280_v34 = vmax.f32 %v270_v28, %v274_v31  ;;  %216 = vrot.lane.b32.xlu0 %v213_v32, %s5578_s30  ;;  %v287_v42 = vadd.f32 %v282_v30, %v277_v35  ;;  %v278_v46 = vadd.f32 %v274_v31, %v268_v41  ;;  %v5290_v31 = vld [vmem:[%s9321_s0 + $0xe8] sm:$0xff] }
  0xa6   : > { %v515_v21 = vsub.f32 %v5748_v11, %v514_v16  ;;  %v520_v24 = vand.u32 4294901760, %v5766_v18  ;;  %456 = vmatpush.msra.mxu0 %v5762_v17  ;;  %613 = vmatpush.msra.mxu2 %v5766_v18  ;;  %v5809_v35 = vand.u32 4294901760, %v5290_v31 }
  0xa7   : > { %v315_v38 = vrot.slane %v289_v33, 5  ;;  %v290_v39 = vmax.f32 %v280_v34, %v284_v29  ;;  %v291_v47 = vmul.f32 0.25, %v287_v42  ;;  %v288_v49 = vadd.f32 %v284_v29, %v278_v46  ;;  %511 = vmatpush.msra.mxu1 %v510_v20  ;;  %669 = vmatpush.msra.mxu3 %v5762_v17 }
  0xa8   : > { %v516_v26 = vand.u32 4294901760, %v515_v21  ;;  %v5791_v29 = vand.u32 4294901760, %v5291_v25  ;;  %v521_v30 = vsub.f32 %v5766_v18, %v520_v24  ;;  %616 = vmatpush.msra.mxu2 %v5777_v22  ;;  %v5825_v42 = vsub.f32 %v5290_v31, %v5809_v35  ;;  %v5284_v21 = vld [vmem:[%s9321_s0 + $0xb8] sm:$0xff] }
  0xa9   : > { %v316_v40 = vrot.slane %v290_v39, 5  ;;  %318 = vrot.lane.b32.xlu1 %v315_v38, %s5579_s3  ;;  %v295_v50 = vrot.slane %v291_v47, 5  ;;  %v292_v52 = vmul.f32 0.25, %v288_v49  ;;  %v5836_v47 = vand.u32 4294901760, %v5288_v44 }
  0xaa   : > { %517 = vmatpush.msra.mxu1 %v516_v26  ;;  %v5807_v34 = vsub.f32 %v5291_v25, %v5791_v29  ;;  %v522_v36 = vand.u32 4294901760, %v521_v30  ;;  %v544_v48 = vand.u32 4294901760, %v5825_v42  ;;  %v568_v30 = vand.u32 4294901760, %v5886_v14 }
  0xab   : > { %v317_v45 = vsel %vm190_vm0, %v315_v38, %v316_v40  ;;  %v296_v53 = vrot.slane %v292_v52, 5  ;;  %v5849_v52 = vsub.f32 %v5288_v44, %v5836_v47  ;;  %v5905_v31 = vsub.f32 %v5285_v56, %v5888_v15 }
  0xac   : > { %320 = vrot.lane.b32.xlu2 %v317_v45, %s5579_s3  ;;  %v538_v41 = vand.u32 4294901760, %v5807_v34  ;;  %523 = vmatpush.msra.mxu1 %v522_v36  ;;  %v5283_v36 = vld [vmem:[%s9321_s0 + $0xb0] sm:$0xff] }
  0xad   : > { %194 = vrot.lane.b32.xlu0 %v191_v43, %s5580_s4  ;;  %v297_v54 = vsel %vm190_vm0, %v295_v50, %v296_v53  ;;  %v556_v59 = vand.u32 4294901760, %v5849_v52  ;;  %v5919_v44 = vand.u32 4294901760, %v5283_v36 }
  0xae   : > { %v539_v46 = vsub.f32 %v5807_v34, %v538_v41 }
  0xaf   : > { %v557_v9 = vsub.f32 %v5849_v52, %v556_v59 }
  0xb1   : > { %218 = vrot.lane.b32.xlu1 %v212_v19, %s5578_s30  ;;  %v5292_v19 = vld [vmem:[%s9321_s0 + $0xf8] sm:$0xff]  ;;  %v558_v25 = vand.u32 4294901760, %v557_v9  ;;  %s5586_s30 = smov 16  }
  0xb2   : > { %v5779_v23 = vand.u32 4294901760, %v5292_v19 }
  0xb4   : > { %298 = vrot.lane.b32.xlu2 %v295_v50, %s5581_s5  ;;  %v5789_v28 = vsub.f32 %v5292_v19, %v5779_v23  ;;  %458 = vmatpush.msra.mxu0 %v5779_v23 }
  0xb5   : > { %198 = vrot.lane.b32.xlu0 %v192_v51, %s5580_s4  ;;  %671 = vmatpush.msra.mxu3 %v5779_v23 }
  0xb6   : > { %v532_v33 = vand.u32 4294901760, %v5789_v28  ;;  %460 = vmatpush.msra.mxu0 %v5791_v29  ;;  %619 = vmatpush.msra.mxu2 %v5789_v28 }
  0xb7   : > { %673 = vmatpush.msra.mxu3 %v5791_v29 }
  0xb8   : > { %462 = vmatpush.msra.mxu0 %v5809_v35  ;;  %622 = vmatpush.msra.mxu2 %v5807_v34 }
  0xb9   : > { %246 = vrot.lane.b32.xlu1 %v213_v32, %s5577_s29  ;;  %v527_v32 = vsub.f32 %v5777_v22, %v526_v27  ;;  %675 = vmatpush.msra.mxu3 %v5809_v35 }
  0xba   : > { %625 = vmatpush.msra.mxu2 %v5825_v42 }
  0xbb   : > { %v528_v39 = vand.u32 4294901760, %v527_v32  ;;  %v5909_v32 = vand.u32 4294901760, %v5284_v21 }
  0xbc   : > { %233 = vrot.lane.b32.xlu2 %v192_v51, %s5582_s6  ;;  %v540_v51 = vand.u32 4294901760, %v539_v46 }
  0xbd   : > { %300 = vrot.lane.b32.xlu0 %v297_v54, %s5581_s5  ;;  %529 = vmatpush.msra.mxu1 %v528_v39  ;;  %v569_v39 = vsub.f32 %v5886_v14, %v568_v30 }
  0xbf   : > { %v570_v46 = vand.u32 4294901760, %v569_v39 }
  0xc1   : > { %229 = vrot.lane.b32.xlu1 %v191_v43, %s5582_s6  ;;  %v5827_v43 = vand.u32 4294901760, %v5289_v37 }
  0xc3   : > { %v5842_v49 = vsub.f32 %v5289_v37, %v5827_v43  ;;  %464 = vmatpush.msra.mxu0 %v5827_v43  ;;  %677 = vmatpush.msra.mxu3 %v5827_v43 }
  0xc4   : > { %231 = vrot.lane.b32.xlu2 %v193_v55, %s5582_s6 }
  0xc5   : > { %339 = vrot.lane.b32.xlu0 %v295_v50, %s5583_s7  ;;  %v5287_v50 = vld [vmem:[%s9321_s0 + $0xd0] sm:$0xff]  ;;  %466 = vmatpush.msra.mxu0 %v5836_v47 }
  0xc6   : > { %628 = vmatpush.msra.mxu2 %v5842_v49  ;;  %679 = vmatpush.msra.mxu3 %v5836_v47 }
  0xc8   : > { %631 = vmatpush.msra.mxu2 %v5849_v52 }
  0xc9   : > { %196 = vrot.lane.b32.xlu1 %v193_v55, %s5580_s4  ;;  %v550_v55 = vand.u32 4294901760, %v5842_v49 }
  0xcb   : > { %v551_v7 = vsub.f32 %v5842_v49, %v550_v55  ;;  %v5299_v49 = vld [vmem:[%s9321_s0 + $0x130] sm:$0xff] }
  0xcc   : > { %322 = vrot.lane.b32.xlu2 %v316_v40, %s5579_s3  ;;  %s5587_s3 = smov 32  }
  0xcd   : > { %356 = vrot.lane.b32.xlu0 %v317_v45, %s5584_s8  ;;  %v552_v20 = vand.u32 4294901760, %v551_v7 }
  0xd1   : > { %302 = vrot.lane.b32.xlu1 %v296_v53, %s5581_s5  ;;  %s5423_s5 = sshll.u32 %s5628_s13, 4 }
  0xd4   : > { %354 = vrot.lane.b32.xlu2 %v315_v38, %s5584_s8 }
  0xd9   : > { %341 = vrot.lane.b32.xlu1 %v297_v54, %s5583_s7  ;;  %v545_v54 = vsub.f32 %v5825_v42, %v544_v48 }
  0xdb   : > { %v546_v3 = vand.u32 4294901760, %v545_v54 }
  0xdc   : > { %358 = vrot.lane.b32.xlu2 %v316_v40, %s5584_s8  ;;  %v533_v40 = vsub.f32 %v5789_v28, %v532_v33  ;;  %s5210_s8 = scalar_lea.hbm %s9323_s2, %s5423_s5 }
  0xdd   : > { %s5213_s16 = sshll.u32 %s5210_s8, 4  ;;  %s5214_s16 = int_to_ptr.hbm [resolvable:$true] %s5213_s16 }
  0xde   : > { %v534_v45 = vand.u32 4294901760, %v533_v40  ;;  %v574_v40 = vand.u32 4294901760, %v5905_v31  ;;  %s5524_s21 = sshra.s32 %s5214_s16, 4  ;;  %s5525_s21 = int_to_ptr.hbm [resolvable:$true] %s5524_s21 }
  0xdf   : > { %s5526_s13 = scalar_lea.hbm %s5525_s21, 16  ;;  %p5531_p0 = scmp.lt.s32.totalorder %s5525_s21, %s9323_s2 }
  0xe0   : > { %535 = vmatpush.msra.mxu1 %v534_v45  ;;  %v5924_v45 = vsub.f32 %v5284_v21, %v5909_v32  ;;  %p5527_p11 = scmp.ne.s32.totalorder %s5525_s21, %s5526_s13  ;;  %p5532_p1 = scmp.lt.s32.totalorder %s5530_s24, %s5526_s13 }
  0xe1   : > { %343 = vrot.lane.b32.xlu1 %v296_v53, %s5583_s7  ;;  %v5851_v53 = vand.u32 4294901760, %v5287_v50 }
  0xe2   : > { %541 = vmatpush.msra.mxu1 %v540_v51  ;;  %v5931_v51 = vsub.f32 %v5283_v36, %v5919_v44  ;;  %v580_v54 = vand.u32 4294901760, %v5924_v45  ;;  %p5528_p12 = pnand %p5527_p11, %p5645_p5  ;;  %p5533_p2 = por %p5532_p1, %p5531_p0 }
  0xe3   : > { %v5866_v62 = vsub.f32 %v5287_v50, %v5851_v53  ;;  %468 = vmatpush.msra.mxu0 %v5851_v53  ;;  %681 = vmatpush.msra.mxu3 %v5851_v53  ;;  %v575_v50 = vsub.f32 %v5905_v31, %v574_v40 }
  0xe4   : > { %547 = vmatpush.msra.mxu1 %v546_v3  ;;  %v586_v7 = vand.u32 4294901760, %v5931_v51  ;;  %v581_v9 = vsub.f32 %v5924_v45, %v580_v54  ;;  %p5529_p13 = pneg %p5528_p12 }
  0xe5   : > { %v562_v13 = vand.u32 4294901760, %v5866_v62  ;;  %470 = vmatpush.msra.mxu0 %v5868_v2  ;;  %634 = vmatpush.msra.mxu2 %v5866_v62  ;;  %v576_v3 = vand.u32 4294901760, %v575_v50 }
  0xe6   : > { %683 = vmatpush.msra.mxu3 %v5868_v2  ;;  %553 = vmatpush.msra.mxu1 %v552_v20  ;;  %v587_v20 = vsub.f32 %v5931_v51, %v586_v7  ;;  %v582_v60 = vand.u32 4294901760, %v581_v9  ;;  %v388_v9 = vld [vmem:[%s9321_s0 + $0x78] sm:$0xff]  ;;  %p5534_p3 = pnand %p5533_p2, %p5529_p13 }
  0xe7   : > { %v563_v26 = vsub.f32 %v5866_v62, %v562_v13  ;;  %472 = vmatpush.msra.mxu0 %v5888_v15  ;;  %637 = vmatpush.msra.mxu2 %v5886_v14 }
  0xe8   : > { %685 = vmatpush.msra.mxu3 %v5888_v15  ;;  %559 = vmatpush.msra.mxu1 %v558_v25 }
  0xe9   : > { %v564_v37 = vand.u32 4294901760, %v563_v26  ;;  %474 = vmatpush.msra.mxu0 %v5909_v32  ;;  %640 = vmatpush.msra.mxu2 %v5905_v31 }
  0xea   : > { %687 = vmatpush.msra.mxu3 %v5909_v32 }
  0xeb   : > { %565 = vmatpush.msra.mxu1 %v564_v37  ;;  %476 = vmatpush.msra.mxu0 %v5919_v44 }
  0xec   : > { %643 = vmatpush.msra.mxu2 %v5924_v45  ;;  %689 = vmatpush.msra.mxu3 %v5919_v44 }
  0xed   : > { %706 = vmatpush.msrb.mxu0 %v496_v63  ;;  %571 = vmatpush.msra.mxu1 %v570_v46  ;;  %v588_v63 = vand.u32 4294901760, %v587_v20 }
  0xee   : > { %646 = vmatpush.msra.mxu2 %v5931_v51 }
  0xef   : > { %v5817_v38 = vpop.permute.xlu2 %214  ;;  %710 = vmatpush.msrb.mxu0 %v502_v4  ;;  %577 = vmatpush.msra.mxu1 %v576_v3 }
  0xf1   : > { %714 = vmatpush.msrb.mxu0 %v508_v10  ;;  %583 = vmatpush.msra.mxu1 %v582_v60  ;;  %v5303_v10 = vld [vmem:[%s9321_s0 + $0x150] sm:$0xff] }
  0xf3   : > { %718 = vmatpush.msrb.mxu0 %v514_v16  ;;  %589 = vmatpush.msra.mxu1 %v588_v63  ;;  %v387_v63 = vld [vmem:[%s9321_s0 + $0x70] sm:$0xff] }
  0xf5   : > { %777 = vmatpush.msrb.mxu1 %v5701_v58  ;;  %722 = vmatpush.msrb.mxu0 %v520_v24 }
  0xf7   : > { %779 = vmatpush.msrb.mxu1 %v5709_v61  ;;  %726 = vmatpush.msrb.mxu0 %v526_v27  ;;  %v5301_v27 = vld [vmem:[%s9321_s0 + $0x140] sm:$0xff] }
  0xf8   : > { %v6037_v34 = vand.u32 4294901760, %v5301_v27 }
  0xf9   : > { %781 = vmatpush.msrb.mxu1 %v5720_v1  ;;  %730 = vmatpush.msrb.mxu0 %v532_v33  ;;  %v5304_v1 = vld [vmem:[%s9321_s0 + $0x158] sm:$0xff] }
  0xfb   : > { %783 = vmatpush.msrb.mxu1 %v5735_v6  ;;  %734 = vmatpush.msrb.mxu0 %v538_v41  ;;  %v5991_v6 = vand.u32 4294901760, %v5304_v1 }
  0xfd   : > { %785 = vmatpush.msrb.mxu1 %v5752_v12  ;;  %738 = vmatpush.msrb.mxu0 %v544_v48  ;;  %v6000_v11 = vsub.f32 %v5304_v1, %v5991_v6  ;;  %v6003_v12 = vand.u32 4294901760, %v5303_v10  ;;  %v386_v1 = vld [vmem:[%s9321_s0 + $0x68] sm:$0xff] }
  0xfe   : > { %828 = vmatpush.msrb.mxu2 %v5991_v6 }
  0xff   : > { %787 = vmatpush.msrb.mxu1 %v5762_v17  ;;  %742 = vmatpush.msrb.mxu0 %v550_v55  ;;  %v5302_v17 = vld [vmem:[%s9321_s0 + $0x148] sm:$0xff]  ;;  %v868_v22 = vand.u32 4294901760, %v6000_v11 }
 0x100   : > { %830 = vmatpush.msrb.mxu2 %v6003_v12  ;;  %v6019_v24 = vand.u32 4294901760, %v5302_v17 }
 0x101   : > { %789 = vmatpush.msrb.mxu1 %v5779_v23  ;;  %746 = vmatpush.msrb.mxu0 %v556_v59  ;;  %v6016_v23 = vsub.f32 %v5303_v10, %v6003_v12  ;;  %v869_v28 = vsub.f32 %v6000_v11, %v868_v22  ;;  %v6068_v59 = vand.u32 4294901760, %v5299_v49 }
 0x102   : > { %v6034_v33 = vsub.f32 %v5302_v17, %v6019_v24  ;;  %832 = vmatpush.msrb.mxu2 %v6019_v24 }
 0x103   : > { %791 = vmatpush.msrb.mxu1 %v5791_v29  ;;  %750 = vmatpush.msrb.mxu0 %v562_v13  ;;  %v874_v29 = vand.u32 4294901760, %v6016_v23  ;;  %v870_v41 = vand.u32 4294901760, %v869_v28  ;;  %v6077_v25 = vsub.f32 %v5299_v49, %v6068_v59 }
 0x104   : > { %834 = vmatpush.msrb.mxu2 %v6037_v34 }
 0x105   : > { %793 = vmatpush.msrb.mxu1 %v5809_v35  ;;  %754 = vmatpush.msrb.mxu0 %v568_v30  ;;  %v5300_v35 = vld [vmem:[%s9321_s0 + $0x138] sm:$0xff]  ;;  %v875_v42 = vsub.f32 %v6016_v23, %v874_v29  ;;  %v898_v30 = vand.u32 4294901760, %v6077_v25 }
 0x106   : > { %v5879_v8 = vpop.permute.xlu2 %320  ;;  %v6058_v48 = vand.u32 4294901760, %v5300_v35  ;;  %871 = vmatpush.msrb.mxu3 %v870_v41 }
 0x107   : > { %334 = vst.msk [vmem:[#allocation2 + $0x18] sm:$0xff] %vm333_vm3, %v5879_v8  ;;  %v5894_v19 = vpop.permute.xlu0 %244  ;;  %795 = vmatpush.msrb.mxu1 %v5827_v43  ;;  %758 = vmatpush.msrb.mxu0 %v574_v40  ;;  %v880_v43 = vand.u32 4294901760, %v6034_v33  ;;  %v876_v52 = vand.u32 4294901760, %v875_v42  ;;  %v899_v37 = vsub.f32 %v6077_v25, %v898_v30  ;;  %vm363_vm3 = vcmask 367851  }
 0x108   : > { %v6073_v62 = vsub.f32 %v5300_v35, %v6058_v48  ;;  %836 = vmatpush.msrb.mxu2 %v6058_v48  ;;  %v6142_v42 = vand.u32 4294901760, %v386_v1 }
 0x109   : > { %797 = vmatpush.msrb.mxu1 %v5836_v47  ;;  %762 = vmatpush.msrb.mxu0 %v580_v54  ;;  %v6056_v47 = vsub.f32 %v5301_v27, %v6037_v34  ;;  %v881_v55 = vsub.f32 %v6034_v33, %v880_v43  ;;  %v385_v27 = vld [vmem:[%s9321_s0 + $0x60] sm:$0xff] }
 0x10a   : > { %877 = vmatpush.msrb.mxu3 %v876_v52  ;;  %838 = vmatpush.msrb.mxu2 %v6068_v59 }
 0x10b   : > { %799 = vmatpush.msrb.mxu1 %v5851_v53  ;;  %766 = vmatpush.msrb.mxu0 %v586_v7  ;;  %v886_v53 = vand.u32 4294901760, %v6056_v47  ;;  %v882_v14 = vand.u32 4294901760, %v881_v55  ;;  %v6152_v55 = vand.u32 4294901760, %v385_v27 }
 0x10d   : > { %801 = vmatpush.msrb.mxu1 %v5868_v2  ;;  %v887_v26 = vsub.f32 %v6056_v47, %v886_v53  ;;  %v892_v2 = vand.u32 4294901760, %v6073_v62  ;;  %883 = vmatpush.msrb.mxu3 %v882_v14 }
 0x10e   : > { %v5937_v57 = vpop.permute.xlu2 %298 }
 0x10f   : > { %v5943_v56 = vpop.permute.xlu0 %248  ;;  %803 = vmatpush.msrb.mxu1 %v5888_v15  ;;  %v888_v31 = vand.u32 4294901760, %v887_v26  ;;  %v893_v15 = vsub.f32 %v6073_v62, %v892_v2 }
 0x111   : > { %805 = vmatpush.msrb.mxu1 %v5909_v32  ;;  %889 = vmatpush.msrb.mxu3 %v888_v31  ;;  %v894_v39 = vand.u32 4294901760, %v893_v15  ;;  %v900_v32 = vand.u32 4294901760, %v899_v37  ;;  %v6165_v15 = vsub.f32 %v386_v1, %v6142_v42  ;;  %v6180_v37 = vsub.f32 %v385_v27, %v6152_v55  ;;  %v379_v1 = vld [vmem:[%s9321_s0 + $0x30] sm:$0xff] }
 0x113   : > { %807 = vmatpush.msrb.mxu1 %v5919_v44  ;;  %895 = vmatpush.msrb.mxu3 %v894_v39 }
 0x115   : > { %901 = vmatpush.msrb.mxu3 %v900_v32 }
 0x116   : > { %v234_v21 = vpop.permute.xlu2 %233 }
 0x117   : > { %v5962_v0 = vpop.permute.xlu0 %216 }
 0x11b   : > { %v5970_v4 = vpop.permute.xlu1 %318 }
 0x11c   : > { %330 = vst.msk [vmem:[#allocation2 + $0x8] sm:$0xf8] %vm329_vm4, %v5970_v4  ;;  %vm205_vm4 = vcmask 154648  }
 0x11e   : > { %v5976_v58 = vpop.permute.xlu2 %231 }
 0x11f   : > { %v195_v61 = vpop.permute.xlu0 %194 }
 0x120   : > { %204 = vst.msk [vmem:[#allocation2] sm:$0xf8] %vm203_vm5, %v195_v61  ;;  %vm225_vm5 = vcmask 335048   ;;  %v6124_v61 = vand.u32 4294901760, %v387_v63 }
 0x121   : > { %224 = vst.msk [vmem:[#allocation2] sm:$0xf8] %vm223_vm6, %v5817_v38  ;;  %vm240_vm6 = vcmask 515448  }
 0x122   : > { %v6149_v52 = vsub.f32 %v387_v63, %v6124_v61 }
 0x123   : > { %v219_v5 = vpop.permute.xlu1 %218 }
 0x126   : > { %v6005_v16 = vpop.permute.xlu2 %322 }
 0x127   : > { %338 = vst.msk [vmem:[#allocation2 + $0x28] sm:$0x7] %vm337_vm7, %v6005_v16  ;;  %v199_v18 = vpop.permute.xlu0 %198  ;;  %vm255_vm7 = vcmask 695848  }
 0x128   : > { %208 = vst.msk [vmem:[#allocation2 + $0x20] sm:$0x7] %vm207_vm8, %v199_v18  ;;  %vm309_vm8 = vcmask 876248  }
 0x129   : > { %228 = vst.msk [vmem:[#allocation2 + $0x20] sm:$0x7] %vm227_vm9, %v219_v5  ;;  %vm331_vm9 = vcmask 1048456  }
 0x12a   : > { %243 = vst.msk [vmem:[#allocation2 + $0x20] sm:$0x7] %vm242_vm10, %v234_v21  ;;  %vm311_vm10 = vcmask 871128  }
 0x12b   : > { %v6046_v38 = vpop.permute.xlu1 %246  ;;  %258 = vst.msk [vmem:[#allocation2 + $0x20] sm:$0x7] %vm257_vm11, %v5943_v56  ;;  %vm335_vm11 = vcmask 1043336  }
 0x12e   : > { %v355_v45 = vpop.permute.xlu2 %354 }
 0x12f   : > { %v301_v13 = vpop.permute.xlu0 %300 }
 0x133   : > { %v230_v36 = vpop.permute.xlu1 %229 }
 0x134   : > { %239 = vst.msk [vmem:[#allocation2] sm:$0xf8] %vm238_vm12, %v230_v36  ;;  %vm428_vm12 = vcmask 1046528  }
 0x135   : > { %254 = vst.msk [vmem:[#allocation2] sm:$0xf8] %vm253_vm13, %v5894_v19  ;;  %vm350_vm13 = vcmask 187448  }
 0x136   : > { %308 = vst.msk [vmem:[#allocation2] sm:$0xf8] %vm307_vm14, %v5937_v57  ;;  %vm365_vm14 = vcmask 367848   ;;  %v359_v28 = vpop.permute.xlu2 %358 }
 0x137   : > { %328 = vst.msk [vmem:[#allocation2] sm:$0xf8] %vm327_vm15, %v5970_v4  ;;  %v340_v40 = vpop.permute.xlu0 %339  ;;  %vm352_vm15 = vcmask 182328  }
 0x138   : > { %349 = vst.msk [vmem:[#allocation2 + $0x8] sm:$0xf8] %vm348_vm2, %v340_v40  ;;  %vm367_vm2 = vcmask 362728   ;;  %v9335_v40 = vand.u32 4294901760, %v6165_v15 }
 0x139   : > { %364 = vst.msk [vmem:[#allocation2 + $0x8] sm:$0xf8] %vm363_vm3, %v355_v45  ;;  %vm1709_vm3 = vcmask 1045504  }
 0x13b   : > { %v197_v44 = vpop.permute.xlu1 %196 }
 0x13c   : > { %206 = vst.msk [vmem:[#allocation2 + $0x10] sm:$0xff] %vm205_vm4, %v197_v44  ;;  %vm2373_vm4 = vcmask 1044480  }
 0x13d   : > { %226 = vst.msk [vmem:[#allocation2 + $0x10] sm:$0xff] %vm225_vm5, %v5962_v0  ;;  %v6118_v0 = vand.u32 4294901760, %v388_v9  ;;  %vm3037_vm5 = vcmask 1043456  }
 0x13e   : > { %241 = vst.msk [vmem:[#allocation2 + $0x10] sm:$0xff] %vm240_vm6, %v5976_v58  ;;  %v395_v46 = vld [vmem:[#allocation2] sm:$0xfe] }
 0x13f   : > { %256 = vst.msk [vmem:[#allocation2 + $0x10] sm:$0xff] %vm255_vm7, %v6046_v38  ;;  %v429_v51 = vrot.slane %v395_v46, 1  ;;  %v357_v7 = vpop.permute.xlu0 %356  ;;  %v6133_v18 = vsub.f32 %v388_v9, %v6118_v0 }
 0x140   : > { %310 = vst.msk [vmem:[#allocation2 + $0x10] sm:$0xff] %vm309_vm8, %v301_v13  ;;  %v384_v13 = vld [vmem:[%s9321_s0 + $0x58] sm:$0xff] }
 0x141   : > { %332 = vst.msk [vmem:[#allocation2 + $0x10] sm:$0xff] %vm331_vm9, %v5879_v8  ;;  %v1115_v14 = vand.u32 4294901760, %v6133_v18  ;;  %v6175_v36 = vand.u32 4294901760, %v384_v13 }
 0x143   : > { %v303_v19 = vpop.permute.xlu1 %302 }
 0x144   : > { %312 = vst.msk [vmem:[#allocation2 + $0x20] sm:$0x7] %vm311_vm10, %v303_v19 }
 0x145   : > { %336 = vst.msk [vmem:[#allocation2 + $0x20] sm:$0x7] %vm335_vm11, %v6005_v16  ;;  %v396_v16 = vld [vmem:[#allocation2 + $0x8] sm:$0xfe] }
 0x148   : > { %v6102_v50 = vld [vmem:[#allocation2 + $0x10] sm:$0xff] }
 0x149   : > { %v430_v54 = vrot.slane %v6102_v50, 1 }
 0x14b   : > { %v342_v57 = vpop.permute.xlu1 %341  ;;  %v431_v3 = vsel %vm428_vm12, %v429_v51, %v430_v54  ;;  %v6205_v51 = vsub.f32 %v384_v13, %v6175_v36 }
 0x14c   : > { %351 = vst.msk [vmem:[#allocation2 + $0x18] sm:$0xff] %vm350_vm13, %v342_v57  ;;  %v6106_v8 = vand.u32 4294901760, %v431_v3  ;;  %v397_v56 = vld [vmem:[#allocation2 + $0x20] sm:$0x1] }
 0x14d   : > { %366 = vst.msk [vmem:[#allocation2 + $0x18] sm:$0xff] %vm365_vm14, %v357_v7  ;;  %v435_v20 = vrot.slane %v397_v56, 1  ;;  %v1128_v56 = vsub.f32 %v6165_v15, %v9335_v40  ;;  %vm5055_vm14 = vcmask 130048  }
 0x14e   : > { %591 = vmatmul.f32.vlgmr.msra.gmra.mxu1 %v6106_v8  ;;  %v478_v60 = vsub.f32 %v431_v3, %v6106_v8 }
 0x14f   : > { %1039 = vmatpush.msra.mxu1 %v5991_v6  ;;  %v436_v21 = vsel %vm428_vm12, %v430_v54, %v435_v20  ;;  %v380_v20 = vld [vmem:[%s9321_s0 + $0x38] sm:$0xff] }
 0x150   : > { %649 = vmatmul.f32.vlgmr.msra.gmra.mxu2 %v478_v60  ;;  %v479_v4 = vand.u32 4294901760, %v478_v60  ;;  %v6120_v58 = vand.u32 4294901760, %v436_v21 }
 0x151   : > { %1041 = vmatpush.msra.mxu1 %v6003_v12  ;;  %923 = vmatpush.msra.mxu2 %v6000_v11 }
 0x152   : > { %693 = vmatmul.f32.vlgmr.msra.gmra.mxu3 %v479_v4  ;;  %v480_v5 = vsub.f32 %v478_v60, %v479_v4  ;;  %v486_v10 = vsub.f32 %v436_v21, %v6120_v58 }
 0x153   : > { %v344_v17 = vpop.permute.xlu1 %343  ;;  %961 = vmatpush.msra.mxu3 %v5991_v6  ;;  %1043 = vmatpush.msra.mxu1 %v6019_v24  ;;  %v432_v6 = vrot.slane %v396_v16, 1 }
 0x154   : > { %353 = vst.msk [vmem:[#allocation2 + $0x28] sm:$0x7] %vm352_vm15, %v344_v17  ;;  %v481_v35 = vand.u32 4294901760, %v480_v5  ;;  %v487_v38 = vand.u32 4294901760, %v486_v10  ;;  %926 = vmatpush.msra.mxu2 %v6016_v23  ;;  %v6140_v41 = vld [vmem:[#allocation2 + $0x18] sm:$0xff]  ;;  %v382_v23 = vld [vmem:[%s9321_s0 + $0x48] sm:$0xff] }
 0x155   : > { %368 = vst.msk [vmem:[#allocation2 + $0x28] sm:$0x7] %vm367_vm2, %v359_v28  ;;  %963 = vmatpush.msra.mxu3 %v6003_v12  ;;  %1045 = vmatpush.msra.mxu1 %v6037_v34  ;;  %v433_v49 = vrot.slane %v6140_v41, 1  ;;  %v6268_v28 = vand.u32 4294901760, %v379_v1  ;;  %vm5058_vm15 = vcmask 261120   ;;  %vm5195_vm2 = vcmask 523264  }
 0x156   : > { %482 = vmatmul.f32.vlgmr.msra.gmra.mxu0 %v481_v35  ;;  %595 = vmatmul.f32.gmra.mxu1 %v6120_v58  ;;  %v488_v26 = vsub.f32 %v486_v10, %v487_v38 }
 0x157   : > { %965 = vmatpush.msra.mxu3 %v6019_v24  ;;  %998 = vmatpush.msra.mxu0 %v868_v22  ;;  %v434_v12 = vsel %vm428_vm12, %v432_v6, %v433_v49  ;;  %v383_v24 = vld [vmem:[%s9321_s0 + $0x50] sm:$0xff]  ;;  %v9336_v22 = vand.u32 4294901760, %v6149_v52 }
 0x158   : > { %654 = vmatmul.f32.gmra.mxu2 %v486_v10  ;;  %1047 = vmatpush.msra.mxu1 %v6058_v48  ;;  %v441_v31 = vsel %vm143_vm1, %v434_v12, 0  ;;  %v6190_v32 = vand.u32 4294901760, %v383_v24  ;;  %v1129_v10 = vand.u32 4294901760, %v1128_v56 }
 0x159   : > { %929 = vmatpush.msra.mxu2 %v6034_v33  ;;  %967 = vmatpush.msra.mxu3 %v6037_v34  ;;  %v6172_v11 = vand.u32 4294901760, %v441_v31  ;;  %v1116_v34 = vsub.f32 %v6133_v18, %v1115_v14  ;;  %v1122_v19 = vsub.f32 %v6149_v52, %v9336_v22  ;;  %v381_v33 = vld [vmem:[%s9321_s0 + $0x40] sm:$0xff] }
 0x15a   : > { %699 = vmatmul.f32.gmra.mxu3 %v487_v38  ;;  %1002 = vmatpush.msra.mxu0 %v874_v29  ;;  %v489_v29 = vand.u32 4294901760, %v488_v26  ;;  %v6221_v7 = vsub.f32 %v383_v24, %v6190_v32  ;;  %v6230_v9 = vand.u32 4294901760, %v381_v33 }
 0x15b   : > { %1049 = vmatpush.msra.mxu1 %v6068_v59  ;;  %932 = vmatpush.msra.mxu2 %v6056_v47  ;;  %v6188_v39 = vsub.f32 %v441_v31, %v6172_v11  ;;  %v1117_v54 = vand.u32 4294901760, %v1116_v34  ;;  %v1123_v63 = vand.u32 4294901760, %v1122_v19  ;;  %v6297_v31 = vsub.f32 %v379_v1, %v6268_v28 }
 0x15c   : > { %969 = vmatpush.msra.mxu3 %v6058_v48  ;;  %1006 = vmatpush.msra.mxu0 %v880_v43  ;;  %v398_v45 = vld [vmem:[#allocation2 + $0x28] sm:$0x1]  ;;  %v9334_v43 = vand.u32 4294901760, %v6180_v37  ;;  %v6212_v48 = vand.u32 4294901760, %v382_v23  ;;  %v6261_v16 = vsub.f32 %v381_v33, %v6230_v9 }
 0x15d   : > { %935 = vmatpush.msra.mxu2 %v6073_v62  ;;  %v841_v44 = vand.u32 4294901760, %v6188_v39  ;;  %v437_v46 = vrot.slane %v398_v45, 1  ;;  %v9331_v62 = vand.u32 4294901760, %v6221_v7 }
 0x15e   : > { %490 = vmatmul.f32.gmra.mxu0 %v489_v29  ;;  %809 = vmatmul.f32.vlgmr.msrb.gmra.mxu1 %v6106_v8  ;;  %v1134_v21 = vsub.f32 %v6180_v37, %v9334_v43  ;;  %v6246_v4 = vsub.f32 %v382_v23, %v6212_v48  ;;  %v9328_v13 = vand.u32 4294901760, %v6261_v16  ;;  %v376_v29 = vld [vmem:[%s9321_s0 + $0x18] sm:$0xff] }
 0x15f   : > { %1278 = vmatpush.msrb.mxu1 %v6118_v0  ;;  %971 = vmatpush.msra.mxu3 %v6068_v59  ;;  %v842_v57 = vsub.f32 %v6188_v39, %v841_v44  ;;  %v438_v3 = vsel %vm428_vm12, %v433_v49, %v437_v46  ;;  %v1146_v6 = vsub.f32 %v6221_v7, %v9331_v62 }
 0x160   : > { %1010 = vmatpush.msra.mxu0 %v886_v53  ;;  %938 = vmatpush.msra.mxu2 %v6077_v25  ;;  %v443_v59 = vsel %vm143_vm1, %v438_v3, 0  ;;  %v9333_v53 = vand.u32 4294901760, %v6205_v51  ;;  %v378_v25 = vld [vmem:[%s9321_s0 + $0x28] sm:$0xff]  ;;  %v9330_v35 = vand.u32 4294901760, %v6246_v4  ;;  %v1158_v46 = vsub.f32 %v6261_v16, %v9328_v13 }
 0x161   : > { %1280 = vmatpush.msrb.mxu1 %v6124_v61  ;;  %v843_v60 = vand.u32 4294901760, %v842_v57  ;;  %v6236_v47 = vand.u32 4294901760, %v443_v59  ;;  %v6292_v12 = vand.u32 4294901760, %v378_v25  ;;  %v1147_v45 = vand.u32 4294901760, %v1146_v6 }
 0x162   : > { %903 = vmatmul.f32.vlgmr.msrb.gmra.mxu3 %v6172_v11  ;;  %1014 = vmatpush.msra.mxu0 %v892_v2  ;;  %v6256_v2 = vand.u32 4294901760, %v380_v20  ;;  %v1140_v17 = vsub.f32 %v6205_v51, %v9333_v53  ;;  %v1152_v34 = vsub.f32 %v6246_v4, %v9330_v35  ;;  %v9325_v57 = vand.u32 4294901760, %v6297_v31 }
 0x163   : > { %1118 = vmatpush.msrb.mxu3 %v1117_v54  ;;  %1282 = vmatpush.msrb.mxu1 %v6142_v42  ;;  %v6253_v5 = vsub.f32 %v443_v59, %v6236_v47  ;;  %v6317_v33 = vsub.f32 %v378_v25, %v6292_v12  ;;  %v375_v54 = vld [vmem:[%s9321_s0 + $0x10] sm:$0xff]  ;;  %v6324_v3 = vand.u32 4294901760, %v376_v29  ;;  %v1159_v1 = vand.u32 4294901760, %v1158_v46 }
 0x164   : > { %844 = vmatmul.f32.vlgmr.msrb.gmra.mxu2 %v843_v60  ;;  %1018 = vmatpush.msra.mxu0 %v898_v30  ;;  %v1135_v30 = vand.u32 4294901760, %v1134_v21  ;;  %v6285_v49 = vsub.f32 %v380_v20, %v6256_v2  ;;  %v1141_v26 = vand.u32 4294901760, %v1140_v17  ;;  %v1153_v56 = vand.u32 4294901760, %v1152_v34  ;;  %v394_v20 = vld [vmem:[%s9321_s0 + $0xa8] sm:$0xff]  ;;  %v392_v34 = vld [vmem:[%s9321_s0 + $0x98] sm:$0xff] }
 0x165   : > { %1065 = vmatpush.msrb.mxu2 %v6118_v0  ;;  %1124 = vmatpush.msrb.mxu3 %v1123_v63  ;;  %v849_v27 = vand.u32 4294901760, %v6253_v5  ;;  %v6337_v63 = vand.u32 4294901760, %v375_v54  ;;  %v374_v21 = vld [vmem:[%s9321_s0 + $0x8] sm:$0xff]  ;;  %v1170_v17 = vsub.f32 %v6297_v31, %v9325_v57  ;;  %v6351_v25 = vsub.f32 %v376_v29, %v6324_v3 }
 0x166   : > { %1284 = vmatpush.msrb.mxu1 %v6152_v55  ;;  %768 = vmatmul.f32.vlgmr.msrb.gmra.mxu0 %v6106_v8  ;;  %v377_v8 = vld [vmem:[%s9321_s0 + $0x20] sm:$0xff]  ;;  %v9327_v19 = vand.u32 4294901760, %v6285_v49  ;;  %v6396_v57 = vand.u32 4294901760, %v392_v34 }
 0x167   : > { %1067 = vmatpush.msrb.mxu2 %v6124_v61  ;;  %813 = vmatmul.f32.gmra.mxu1 %v6120_v58  ;;  %v850_v38 = vsub.f32 %v6253_v5, %v849_v27  ;;  %v6303_v23 = vand.u32 4294901760, %v377_v8 }
 0x168   : > { %1130 = vmatpush.msrb.mxu3 %v1129_v10  ;;  %1220 = vmatpush.msrb.mxu0 %v6133_v18  ;;  %v1164_v60 = vsub.f32 %v6285_v49, %v9327_v19  ;;  %v9324_v10 = vand.u32 4294901760, %v6317_v33 }
 0x169   : > { %1286 = vmatpush.msrb.mxu1 %v6175_v36  ;;  %1069 = vmatpush.msrb.mxu2 %v6142_v42  ;;  %v851_v24 = vand.u32 4294901760, %v850_v38  ;;  %v6328_v59 = vsub.f32 %v377_v8, %v6303_v23  ;;  %v6356_v38 = vand.u32 4294901760, %v394_v20  ;;  %v6363_v8 = vand.u32 4294901760, %v374_v21 }
 0x16a   : > { %1136 = vmatpush.msrb.mxu3 %v1135_v30  ;;  %1223 = vmatpush.msrb.mxu0 %v6149_v52  ;;  %v373_v30 = vld [vmem:[%s9321_s0] sm:$0xff]  ;;  %v1176_v29 = vsub.f32 %v6317_v33, %v9324_v10 }
 0x16b   : > { %1288 = vmatpush.msrb.mxu1 %v6190_v32  ;;  %1071 = vmatpush.msrb.mxu2 %v6152_v55  ;;  %v9326_v6 = vand.u32 4294901760, %v6328_v59  ;;  %v6394_v10 = vsub.f32 %v374_v21, %v6363_v8 }
 0x16c   : > { %907 = vmatmul.f32.gmra.mxu3 %v6236_v47  ;;  %1226 = vmatpush.msrb.mxu0 %v6165_v15 }
 0x16d   : > { %1142 = vmatpush.msrb.mxu3 %v1141_v26  ;;  %1290 = vmatpush.msrb.mxu1 %v6212_v48  ;;  %v1165_v26 = vand.u32 4294901760, %v1164_v60  ;;  %v6385_v60 = vsub.f32 %v394_v20, %v6356_v38  ;;  %v1177_v20 = vand.u32 4294901760, %v1176_v29  ;;  %v390_v29 = vld [vmem:[%s9321_s0 + $0x88] sm:$0xff] }
 0x16e   : > { %852 = vmatmul.f32.gmra.mxu2 %v851_v24  ;;  %1229 = vmatpush.msrb.mxu0 %v6180_v37  ;;  %v6368_v24 = vsub.f32 %v375_v54, %v6337_v63  ;;  %v1171_v54 = vand.u32 4294901760, %v1170_v17  ;;  %v391_v17 = vld [vmem:[%s9321_s0 + $0x90] sm:$0xff]  ;;  %v6437_v62 = vand.u32 4294901760, %v390_v29 }
 0x16f   : > { %1073 = vmatpush.msrb.mxu2 %v6175_v36  ;;  %1148 = vmatpush.msrb.mxu3 %v1147_v45  ;;  %v6377_v45 = vand.u32 4294901760, %v373_v30  ;;  %v9337_v13 = vand.u32 4294901760, %v6385_v60 }
 0x170   : > { %1292 = vmatpush.msrb.mxu1 %v6230_v9  ;;  %772 = vmatmul.f32.gmra.mxu0 %v6120_v58  ;;  %v393_v58 = vld [vmem:[%s9321_s0 + $0xa0] sm:$0xff] }
 0x171   : > { %1075 = vmatpush.msrb.mxu2 %v6190_v32  ;;  %1051 = vmatmul.f32.vlgmr.msra.gmra.mxu1 %v6172_v11  ;;  %v6379_v46 = vand.u32 4294901760, %v393_v58  ;;  %v6409_v19 = vsub.f32 %v373_v30, %v6377_v45 }
 0x172   : > { %1154 = vmatpush.msrb.mxu3 %v1153_v56  ;;  %1232 = vmatpush.msrb.mxu0 %v6205_v51  ;;  %v9329_v56 = vand.u32 4294901760, %v6351_v25 }
 0x173   : > { %1294 = vmatpush.msrb.mxu1 %v6256_v2  ;;  %1077 = vmatpush.msrb.mxu2 %v6212_v48  ;;  %v6406_v21 = vsub.f32 %v393_v58, %v6379_v46  ;;  %v9338_v58 = vand.u32 4294901760, %v6394_v10 }
 0x174   : > { %1160 = vmatpush.msrb.mxu3 %v1159_v1  ;;  %1235 = vmatpush.msrb.mxu0 %v6221_v7  ;;  %v1182_v1 = vsub.f32 %v6328_v59, %v9326_v6  ;;  %v369_v6 = vld [vmem:[#allocation2] sm:$0xff] }
 0x175   : > { %1296 = vmatpush.msrb.mxu1 %v6268_v28  ;;  %1079 = vmatpush.msrb.mxu2 %v6230_v9  ;;  %v6432_v35 = vand.u32 4294901760, %v369_v6  ;;  %v1200_v43 = vsub.f32 %v6394_v10, %v9338_v58 }
 0x176   : > { %975 = vmatmul.f32.vlgmr.msra.gmra.mxu3 %v841_v44  ;;  %1238 = vmatpush.msrb.mxu0 %v6246_v4  ;;  %v9332_v44 = vand.u32 4294901760, %v6368_v24  ;;  %v1183_v30 = vand.u32 4294901760, %v1182_v1  ;;  %v9347_v1 = vand.u32 4294901760, %v6409_v19 }
 0x177   : > { %1166 = vmatpush.msrb.mxu3 %v1165_v26  ;;  %1298 = vmatpush.msrb.mxu1 %v6292_v12  ;;  %v1188_v26 = vsub.f32 %v6351_v25, %v9329_v56  ;;  %v6458_v22 = vsub.f32 %v369_v6, %v6432_v35 }
 0x178   : > { %941 = vmatmul.f32.vlgmr.msra.gmra.mxu2 %v6188_v39  ;;  %1241 = vmatpush.msrb.mxu0 %v6261_v16  ;;  %v6416_v39 = vand.u32 4294901760, %v391_v17  ;;  %v1194_v56 = vsub.f32 %v6368_v24, %v9332_v44 }
 0x179   : > { %1081 = vmatpush.msrb.mxu2 %v6256_v2  ;;  %1172 = vmatpush.msrb.mxu3 %v1171_v54  ;;  %v6425_v54 = vsub.f32 %v392_v34, %v6396_v57  ;;  %v389_v34 = vld [vmem:[%s9321_s0 + $0x80] sm:$0xff]  ;;  %v1189_v44 = vand.u32 4294901760, %v1188_v26 }
 0x17a   : > { %1300 = vmatpush.msrb.mxu1 %v6303_v23  ;;  %1020 = vmatmul.f32.vlgmr.msra.gmra.mxu0 %v6172_v11  ;;  %v9339_v11 = vand.u32 4294901760, %v6406_v21  ;;  %v6448_v53 = vsub.f32 %v391_v17, %v6416_v39  ;;  %v1195_v26 = vand.u32 4294901760, %v1194_v56  ;;  %v6472_v56 = vsub.f32 %v390_v29, %v6437_v62 }
 0x17b   : > { %1083 = vmatpush.msrb.mxu2 %v6268_v28  ;;  %1055 = vmatmul.f32.gmra.mxu1 %v6236_v47  ;;  %v9340_v40 = vand.u32 4294901760, %v6425_v54  ;;  %v1098_v29 = vand.u32 4294901760, %v6458_v22 }
 0x17c   : > { %1178 = vmatpush.msrb.mxu3 %v1177_v20  ;;  %1244 = vmatpush.msrb.mxu0 %v6285_v49  ;;  %v1488_v20 = vsub.f32 %v6385_v60, %v9337_v13  ;;  %v6460_v13 = vand.u32 4294901760, %v389_v34  ;;  %v1494_v17 = vsub.f32 %v6406_v21, %v9339_v11  ;;  %v9346_v58 = vand.u32 4294901760, %v6448_v53 }
 0x17d   : > { %1302 = vmatpush.msrb.mxu1 %v6324_v3  ;;  %1085 = vmatpush.msrb.mxu2 %v6292_v12  ;;  %v1500_v11 = vsub.f32 %v6425_v54, %v9340_v40  ;;  %v6494_v40 = vand.u32 4294901760, %v6102_v50 }
 0x17e   : > { %1184 = vmatpush.msrb.mxu3 %v1183_v30  ;;  %1247 = vmatpush.msrb.mxu0 %v6297_v31  ;;  %v1206_v30 = vsub.f32 %v6409_v19, %v9347_v1  ;;  %v1489_v6 = vand.u32 4294901760, %v1488_v20  ;;  %v9430_v1 = vand.u32 4294901760, %v6297_v31  ;;  %v5310_v31 = vld [vmem:[%s9321_s0 + $0x188] sm:$0xff] }
 0x17f   : > { %1304 = vmatpush.msrb.mxu1 %v6337_v63  ;;  %1087 = vmatpush.msrb.mxu2 %v6303_v23 }
 0x180   : > { %981 = vmatmul.f32.gmra.mxu3 %v849_v27  ;;  %1250 = vmatpush.msrb.mxu0 %v6317_v33  ;;  %v1201_v27 = vand.u32 4294901760, %v1200_v43  ;;  %v1207_v20 = vand.u32 4294901760, %v1206_v30  ;;  %v9344_v43 = vand.u32 4294901760, %v6472_v56 }
 0x181   : > { %1190 = vmatpush.msrb.mxu3 %v1189_v44  ;;  %1306 = vmatpush.msrb.mxu1 %v6363_v8  ;;  %v6484_v44 = vsub.f32 %v389_v34, %v6460_v13  ;;  %v1501_v34 = vand.u32 4294901760, %v1500_v11  ;;  %v6507_v11 = vsub.f32 %v6102_v50, %v6494_v40 }
 0x182   : > { %946 = vmatmul.f32.gmra.mxu2 %v6253_v5  ;;  %1253 = vmatpush.msrb.mxu0 %v6328_v59  ;;  %v1495_v5 = vand.u32 4294901760, %v1494_v17  ;;  %v1512_v30 = vsub.f32 %v6472_v56, %v9344_v43 }
 0x183   : > { %1089 = vmatpush.msrb.mxu2 %v6324_v3  ;;  %1196 = vmatpush.msrb.mxu3 %v1195_v26  ;;  %v1506_v26 = vsub.f32 %v6448_v53, %v9346_v58  ;;  %v9341_v17 = vand.u32 4294901760, %v6484_v44 }
 0x184   : > { %1308 = vmatpush.msrb.mxu1 %v6377_v45  ;;  %1024 = vmatmul.f32.gmra.mxu0 %v6236_v47  ;;  %v1099_v47 = vsub.f32 %v6458_v22, %v1098_v29 }
 0x185   : > { %1091 = vmatpush.msrb.mxu2 %v6337_v63  ;;  %1202 = vmatpush.msrb.mxu3 %v1201_v27  ;;  %v5320_v27 = vld [vmem:[%s9321_s0 + $0x1d8] sm:$0xff] }
 0x186   : > { %1490 = vmatpush.msra.mxu1 %v1489_v6  ;;  %1256 = vmatpush.msrb.mxu0 %v6351_v25  ;;  %v1507_v6 = vand.u32 4294901760, %v1506_v26  ;;  %v5319_v26 = vld [vmem:[%s9321_s0 + $0x1d0] sm:$0xff] }
 0x187   : > { %1312 = vmatmul.f32.vlgmr.msrb.gmra.mxu1 %v1098_v29  ;;  %1093 = vmatpush.msrb.mxu2 %v6363_v8  ;;  %v1100_v29 = vand.u32 4294901760, %v1099_v47  ;;  %v6525_v47 = vand.u32 4294901760, %v5320_v27 }
 0x188   : > { %1496 = vmatpush.msra.mxu1 %v1495_v5  ;;  %1208 = vmatpush.msrb.mxu3 %v1207_v20  ;;  %v1518_v5 = vsub.f32 %v6484_v44, %v9341_v17  ;;  %v370_v20 = vld [vmem:[#allocation2 + $0x8] sm:$0xff]  ;;  %v9422_v17 = vand.u32 4294901760, %v6149_v52  ;;  %v9423_v52 = vand.u32 4294901760, %v6165_v15  ;;  %v9424_v15 = vand.u32 4294901760, %v6180_v37 }
 0x189   : > { %1259 = vmatpush.msrb.mxu0 %v6368_v24  ;;  %1095 = vmatpush.msrb.mxu2 %v6377_v45  ;;  %v1060_v18 = vsel %vm143_vm1, %v370_v20, 0  ;;  %v9425_v20 = vand.u32 4294901760, %v6205_v51  ;;  %v9426_v51 = vand.u32 4294901760, %v6221_v7  ;;  %v5314_v7 = vld [vmem:[%s9321_s0 + $0x1a8] sm:$0xff] }
 0x18a   : > { %1396 = vmatpush.msra.mxu3 %v6118_v0  ;;  %1502 = vmatpush.msra.mxu1 %v1501_v34  ;;  %v1513_v0 = vand.u32 4294901760, %v1512_v30  ;;  %v1106_v34 = vand.u32 4294901760, %v6507_v11  ;;  %v5318_v30 = vld [vmem:[%s9321_s0 + $0x1c8] sm:$0xff] }
 0x18b   : > { %1210 = vmatmul.f32.vlgmr.msrb.gmra.mxu3 %v6432_v35  ;;  %1262 = vmatpush.msrb.mxu0 %v6394_v10 }
 0x18c   : > { %1325 = vmatpush.msra.mxu2 %v1115_v14  ;;  %1398 = vmatpush.msra.mxu3 %v6124_v61  ;;  %v1519_v61 = vand.u32 4294901760, %v1518_v5  ;;  %v6533_v14 = vand.u32 4294901760, %v5319_v26 }
 0x18d   : > { %1101 = vmatmul.f32.vlgmr.msrb.gmra.mxu2 %v1100_v29  ;;  %1508 = vmatpush.msra.mxu1 %v1507_v6  ;;  %v5317_v6 = vld [vmem:[%s9321_s0 + $0x1c0] sm:$0xff]  ;;  %v6550_v29 = vand.u32 4294901760, %v1060_v18 }
 0x18e   : > { %1265 = vmatpush.msrb.mxu0 %v6409_v19  ;;  %1329 = vmatpush.msra.mxu2 %v9422_v17  ;;  %v6543_v17 = vsub.f32 %v5320_v27, %v6525_v47  ;;  %v6557_v5 = vsub.f32 %v5319_v26, %v6533_v14  ;;  %v6561_v27 = vand.u32 4294901760, %v5317_v6 }
 0x18f   : > { %1400 = vmatpush.msra.mxu3 %v6142_v42  ;;  %1514 = vmatpush.msra.mxu1 %v1513_v0  ;;  %v1107_v42 = vsub.f32 %v6507_v11, %v1106_v34 }
 0x190   : > { %1447 = vmatpush.msra.mxu0 %v6356_v38  ;;  %1318 = vmatmul.f32.gmra.mxu1 %v1106_v34  ;;  %v9343_v37 = vand.u32 4294901760, %v6543_v17  ;;  %v5315_v34 = vld [vmem:[%s9321_s0 + $0x1b0] sm:$0xff] }
 0x191   : > { %1268 = vmatmul.f32.vlgmr.msrb.gmra.mxu0 %v6458_v22  ;;  %1333 = vmatpush.msra.mxu2 %v9423_v52  ;;  %v6552_v22 = vand.u32 4294901760, %v5318_v30  ;;  %v1108_v0 = vand.u32 4294901760, %v1107_v42  ;;  %v6598_v42 = vand.u32 4294901760, %v5315_v34 }
 0x192   : > { %1402 = vmatpush.msra.mxu3 %v6152_v55  ;;  %1449 = vmatpush.msra.mxu0 %v6379_v46  ;;  %v5316_v55 = vld [vmem:[%s9321_s0 + $0x1b8] sm:$0xff] }
 0x193   : > { %1520 = vmatpush.msra.mxu1 %v1519_v61  ;;  %1337 = vmatpush.msra.mxu2 %v9424_v15  ;;  %v6576_v26 = vsub.f32 %v5318_v30, %v6552_v22  ;;  %v9342_v61 = vand.u32 4294901760, %v6557_v5  ;;  %v6583_v52 = vand.u32 4294901760, %v5316_v55  ;;  %v1062_v30 = vsel %vm143_vm1, %v6140_v41, 0 }
 0x194   : > { %1404 = vmatpush.msra.mxu3 %v6175_v36  ;;  %1451 = vmatpush.msra.mxu0 %v6396_v57  ;;  %v6573_v36 = vsub.f32 %v1060_v18, %v6550_v29  ;;  %v6589_v18 = vsub.f32 %v5317_v6, %v6561_v27  ;;  %v9427_v6 = vand.u32 4294901760, %v6246_v4  ;;  %v6618_v4 = vand.u32 4294901760, %v1062_v30 }
 0x195   : > { %1580 = vmatpush.msrb.mxu1 %v6356_v38  ;;  %1214 = vmatmul.f32.gmra.mxu3 %v6494_v40  ;;  %v9345_v15 = vand.u32 4294901760, %v6576_v26  ;;  %v1784_v41 = vsub.f32 %v6557_v5, %v9342_v61  ;;  %v6630_v61 = vsub.f32 %v5315_v34, %v6598_v42  ;;  %v9429_v34 = vand.u32 4294901760, %v6285_v49  ;;  %v5311_v49 = vld [vmem:[%s9321_s0 + $0x190] sm:$0xff] }
 0x196   : > { %1341 = vmatpush.msra.mxu2 %v9425_v20  ;;  %1406 = vmatpush.msra.mxu3 %v6190_v32  ;;  %v1778_v32 = vsub.f32 %v6543_v17, %v9343_v37  ;;  %v9348_v20 = vand.u32 4294901760, %v6589_v18  ;;  %v6655_v58 = vsub.f32 %v1062_v30, %v6618_v4 }
 0x197   : > { %1582 = vmatpush.msrb.mxu1 %v6379_v46  ;;  %1109 = vmatmul.f32.gmra.mxu2 %v1108_v0  ;;  %v6614_v0 = vsub.f32 %v5316_v55, %v6583_v52  ;;  %v1790_v37 = vsub.f32 %v6576_v26, %v9345_v15 }
 0x198   : > { %1453 = vmatpush.msra.mxu0 %v6416_v39  ;;  %1345 = vmatpush.msra.mxu2 %v9426_v51  ;;  %v6621_v51 = vand.u32 4294901760, %v5314_v7  ;;  %v1779_v55 = vand.u32 4294901760, %v1778_v32  ;;  %v1785_v32 = vand.u32 4294901760, %v1784_v41  ;;  %v1796_v15 = vsub.f32 %v6589_v18, %v9348_v20 }
 0x199   : > { %1584 = vmatpush.msrb.mxu1 %v6396_v57  ;;  %1408 = vmatpush.msra.mxu3 %v6212_v48  ;;  %v1460_v48 = vand.u32 4294901760, %v6573_v36  ;;  %v9349_v41 = vand.u32 4294901760, %v6630_v61  ;;  %v1791_v20 = vand.u32 4294901760, %v1790_v37 }
 0x19a   : > { %1455 = vmatpush.msra.mxu0 %v6437_v62  ;;  %1349 = vmatpush.msra.mxu2 %v9427_v6  ;;  %v9428_v6 = vand.u32 4294901760, %v6261_v16  ;;  %v5312_v16 = vld [vmem:[%s9321_s0 + $0x198] sm:$0xff]  ;;  %v1797_v37 = vand.u32 4294901760, %v1796_v15  ;;  %v5309_v15 = vld [vmem:[%s9321_s0 + $0x180] sm:$0xff] }
 0x19b   : > { %1273 = vmatmul.f32.gmra.mxu0 %v6507_v11  ;;  %1522 = vmatmul.f32.vlgmr.msra.gmra.mxu1 %v6550_v29  ;;  %v5313_v11 = vld [vmem:[%s9321_s0 + $0x1a0] sm:$0xff] }
 0x19c   : > { %1586 = vmatpush.msrb.mxu1 %v6416_v39  ;;  %1410 = vmatpush.msra.mxu3 %v6230_v9  ;;  %v1461_v9 = vsub.f32 %v6573_v36, %v1460_v48  ;;  %v6647_v43 = vand.u32 4294901760, %v5313_v11 }
 0x19d   : > { %1457 = vmatpush.msra.mxu0 %v6460_v13  ;;  %1353 = vmatpush.msra.mxu2 %v9428_v6  ;;  %v9351_v6 = vand.u32 4294901760, %v6614_v0 }
 0x19e   : > { %1588 = vmatpush.msrb.mxu1 %v6437_v62  ;;  %1412 = vmatpush.msra.mxu3 %v6256_v2  ;;  %v6658_v2 = vsub.f32 %v5314_v7, %v6621_v51  ;;  %v1462_v30 = vand.u32 4294901760, %v1461_v9 }
 0x19f   : > { %1542 = vmatpush.msrb.mxu0 %v6385_v60  ;;  %1357 = vmatpush.msra.mxu2 %v9429_v34  ;;  %v6665_v34 = vand.u32 4294901760, %v5312_v16  ;;  %v1802_v7 = vsub.f32 %v6614_v0, %v9351_v6 }
 0x1a0   : > { %1590 = vmatpush.msrb.mxu1 %v6460_v13  ;;  %1414 = vmatpush.msra.mxu3 %v6268_v28  ;;  %v6675_v28 = vsub.f32 %v5313_v11, %v6647_v43  ;;  %v9350_v9 = vand.u32 4294901760, %v6658_v2  ;;  %v1808_v11 = vsub.f32 %v6630_v61, %v9349_v41 }
 0x1a1   : > { %1545 = vmatpush.msrb.mxu0 %v6406_v21  ;;  %1361 = vmatpush.msra.mxu2 %v9430_v1  ;;  %v9431_v1 = vand.u32 4294901760, %v6317_v33  ;;  %v6695_v33 = vand.u32 4294901760, %v5310_v31 }
 0x1a2   : > { %1780 = vmatpush.msra.mxu1 %v1779_v55  ;;  %1416 = vmatpush.msra.mxu3 %v6292_v12  ;;  %v6677_v55 = vand.u32 4294901760, %v5311_v49  ;;  %v1468_v12 = vand.u32 4294901760, %v6655_v58  ;;  %v9352_v41 = vand.u32 4294901760, %v6675_v28 }
 0x1a3   : > { %1548 = vmatpush.msrb.mxu0 %v6425_v54  ;;  %1365 = vmatpush.msra.mxu2 %v9431_v1  ;;  %v1803_v1 = vand.u32 4294901760, %v1802_v7  ;;  %v9433_v7 = vand.u32 4294901760, %v6351_v25  ;;  %v9434_v25 = vand.u32 4294901760, %v6368_v24 }
 0x1a4   : > { %1786 = vmatpush.msra.mxu1 %v1785_v32  ;;  %1463 = vmatmul.f32.vlgmr.msra.gmra.mxu0 %v1462_v30  ;;  %v6692_v32 = vsub.f32 %v5312_v16, %v6665_v34  ;;  %v9432_v30 = vand.u32 4294901760, %v6328_v59  ;;  %v6705_v16 = vsub.f32 %v5311_v49, %v6677_v55  ;;  %v1814_v59 = vsub.f32 %v6658_v2, %v9350_v9  ;;  %v5307_v9 = vld [vmem:[%s9321_s0 + $0x170] sm:$0xff] }
 0x1a5   : > { %1526 = vmatmul.f32.gmra.mxu1 %v6618_v4  ;;  %1551 = vmatpush.msrb.mxu0 %v6448_v53  ;;  %v1809_v49 = vand.u32 4294901760, %v1808_v11  ;;  %v1820_v11 = vsub.f32 %v6675_v28, %v9352_v41  ;;  %v6749_v41 = vand.u32 4294901760, %v5307_v9 }
 0x1a6   : > { %1418 = vmatpush.msra.mxu3 %v6303_v23  ;;  %1792 = vmatpush.msra.mxu1 %v1791_v20  ;;  %v1469_v23 = vsub.f32 %v6655_v58, %v1468_v12  ;;  %v5308_v20 = vld [vmem:[%s9321_s0 + $0x178] sm:$0xff]  ;;  %v1815_v6 = vand.u32 4294901760, %v1814_v59 }
 0x1a7   : > { %1369 = vmatpush.msra.mxu2 %v9432_v30  ;;  %1554 = vmatpush.msrb.mxu0 %v6472_v56  ;;  %v6726_v30 = vsub.f32 %v5310_v31, %v6695_v33 }
 0x1a8   : > { %1420 = vmatpush.msra.mxu3 %v6324_v3  ;;  %1798 = vmatpush.msra.mxu1 %v1797_v37  ;;  %v1825_v3 = vand.u32 4294901760, %v6692_v32  ;;  %v6721_v37 = vand.u32 4294901760, %v5309_v15  ;;  %v1470_v31 = vand.u32 4294901760, %v1469_v23  ;;  %v1821_v23 = vand.u32 4294901760, %v1820_v11 }
 0x1a9   : > { %1373 = vmatpush.msra.mxu2 %v9433_v7  ;;  %1557 = vmatpush.msrb.mxu0 %v6484_v44  ;;  %v1831_v7 = vand.u32 4294901760, %v6705_v16 }
 0x1aa   : > { %1422 = vmatpush.msra.mxu3 %v6337_v63  ;;  %1804 = vmatpush.msra.mxu1 %v1803_v1  ;;  %v6737_v63 = vand.u32 4294901760, %v5308_v20  ;;  %v9435_v1 = vand.u32 4294901760, %v6394_v10  ;;  %v1826_v24 = vsub.f32 %v6692_v32, %v1825_v3  ;;  %v1837_v10 = vand.u32 4294901760, %v6726_v30 }
 0x1ab   : > { %1727 = vmatpush.msra.mxu0 %v6525_v47  ;;  %1377 = vmatpush.msra.mxu2 %v9434_v25  ;;  %v6747_v25 = vsub.f32 %v5309_v15, %v6721_v37  ;;  %v1832_v15 = vsub.f32 %v6705_v16, %v1831_v7 }
 0x1ac   : > { %1424 = vmatpush.msra.mxu3 %v6363_v8  ;;  %1810 = vmatpush.msra.mxu1 %v1809_v49  ;;  %v5306_v8 = vld [vmem:[%s9321_s0 + $0x168] sm:$0xff]  ;;  %v6763_v59 = vsub.f32 %v5308_v20, %v6737_v63  ;;  %v9436_v49 = vand.u32 4294901760, %v6409_v19  ;;  %v6776_v20 = vsub.f32 %v5307_v9, %v6749_v41  ;;  %v9437_v19 = vand.u32 4294901760, %v6385_v60 }
 0x1ad   : > { %1729 = vmatpush.msra.mxu0 %v6533_v14  ;;  %1381 = vmatpush.msra.mxu2 %v9435_v1  ;;  %v1843_v11 = vand.u32 4294901760, %v6747_v25  ;;  %v1833_v1 = vand.u32 4294901760, %v1832_v15  ;;  %v9438_v9 = vand.u32 4294901760, %v6406_v21  ;;  %v9439_v15 = vand.u32 4294901760, %v6425_v54 }
 0x1ae   : > { %1471 = vmatmul.f32.gmra.mxu0 %v1470_v31  ;;  %1594 = vmatmul.f32.vlgmr.msrb.gmra.mxu1 %v1460_v48  ;;  %v6767_v31 = vand.u32 4294901760, %v5306_v8  ;;  %v1827_v48 = vand.u32 4294901760, %v1826_v24  ;;  %v1711_v54 = vrot.slane %v6102_v50, 2 }
 0x1af   : > { %1426 = vmatpush.msra.mxu3 %v6377_v45  ;;  %1731 = vmatpush.msra.mxu0 %v6552_v22  ;;  %v5305_v45 = vld [vmem:[%s9321_s0 + $0x160] sm:$0xff]  ;;  %v1844_v60 = vsub.f32 %v6747_v25, %v1843_v11 }
 0x1b0   : > { %1816 = vmatpush.msra.mxu1 %v1815_v6  ;;  %1385 = vmatpush.msra.mxu2 %v9436_v49  ;;  %v1838_v6 = vsub.f32 %v6726_v30, %v1837_v10  ;;  %v6786_v24 = vand.u32 4294901760, %v5305_v45  ;;  %v1678_v49 = vld [vmem:[#allocation2] sm:$0xfc] }
 0x1b1   : > { %1428 = vmatmul.f32.vlgmr.msra.gmra.mxu3 %v6432_v35  ;;  %1387 = vmatmul.f32.vlgmr.msra.gmra.mxu2 %v6432_v35  ;;  %v1849_v35 = vand.u32 4294901760, %v6763_v59 }
 0x1b2   : > { %1658 = vmatpush.msrb.mxu3 %v6356_v38  ;;  %1617 = vmatpush.msrb.mxu2 %v9437_v19  ;;  %v6792_v38 = vsub.f32 %v5306_v8, %v6767_v31  ;;  %v6807_v8 = vsub.f32 %v5305_v45, %v6786_v24  ;;  %v1845_v19 = vand.u32 4294901760, %v1844_v60 }
 0x1b3   : > { %1733 = vmatpush.msra.mxu0 %v6561_v27  ;;  %1822 = vmatpush.msra.mxu1 %v1821_v23  ;;  %v1855_v23 = vand.u32 4294901760, %v6776_v20  ;;  %v1850_v21 = vsub.f32 %v6763_v59, %v1849_v35 }
 0x1b4   : > { %1660 = vmatpush.msrb.mxu3 %v6379_v46  ;;  %1621 = vmatpush.msrb.mxu2 %v9438_v9  ;;  %v1839_v46 = vand.u32 4294901760, %v1838_v6  ;;  %v1680_v9 = vld [vmem:[#allocation2 + $0x20] sm:$0x3] }
 0x1b5   : > { %1735 = vmatpush.msra.mxu0 %v6583_v52  ;;  %1828 = vmatpush.msra.mxu1 %v1827_v48  ;;  %v9440_v48 = vand.u32 4294901760, %v6448_v53  ;;  %v1856_v45 = vsub.f32 %v6776_v20, %v1855_v23  ;;  %v1851_v50 = vand.u32 4294901760, %v1850_v21  ;;  %v9441_v53 = vand.u32 4294901760, %v6472_v56 }
 0x1b6   : > { %1662 = vmatpush.msrb.mxu3 %v6396_v57  ;;  %1625 = vmatpush.msrb.mxu2 %v9439_v15  ;;  %v1861_v57 = vand.u32 4294901760, %v6792_v38 }
 0x1b7   : > { %1737 = vmatpush.msra.mxu0 %v6598_v42  ;;  %1834 = vmatpush.msra.mxu1 %v1833_v1  ;;  %v1857_v1 = vand.u32 4294901760, %v1856_v45 }
 0x1b8   : > { %1560 = vmatmul.f32.vlgmr.msrb.gmra.mxu0 %v6573_v36  ;;  %1600 = vmatmul.f32.gmra.mxu1 %v1468_v12  ;;  %v1710_v36 = vrot.slane %v1678_v49, 2  ;;  %v1862_v12 = vsub.f32 %v6792_v38, %v1861_v57 }
 0x1b9   : > { %1664 = vmatpush.msrb.mxu3 %v6416_v39  ;;  %1629 = vmatpush.msrb.mxu2 %v9440_v48  ;;  %v1867_v39 = vand.u32 4294901760, %v6807_v8 }
 0x1ba   : > { %1739 = vmatpush.msra.mxu0 %v6621_v51  ;;  %1840 = vmatpush.msra.mxu1 %v1839_v46  ;;  %v1712_v6 = vsel %vm1709_vm3, %v1710_v36, %v1711_v54  ;;  %v1863_v60 = vand.u32 4294901760, %v1862_v12  ;;  %v5323_v36 = vld [vmem:[%s9321_s0 + $0x1f0] sm:$0xff] }
 0x1bb   : > { %1432 = vmatmul.f32.gmra.mxu3 %v6494_v40  ;;  %1391 = vmatmul.f32.gmra.mxu2 %v6494_v40  ;;  %v9442_v40 = vand.u32 4294901760, %v6484_v44  ;;  %v6839_v56 = vand.u32 4294901760, %v1712_v6 }
 0x1bc   : > { %1666 = vmatpush.msrb.mxu3 %v6437_v62  ;;  %1633 = vmatpush.msrb.mxu2 %v9441_v53  ;;  %v1868_v62 = vsub.f32 %v6807_v8, %v1867_v39  ;;  %v9445_v53 = vand.u32 4294901760, %v6576_v26 }
 0x1bd   : > { %1741 = vmatpush.msra.mxu0 %v6647_v43  ;;  %1846 = vmatpush.msra.mxu1 %v1845_v19  ;;  %v6849_v15 = vsub.f32 %v1712_v6, %v6839_v56 }
 0x1be   : > { %1668 = vmatpush.msrb.mxu3 %v6460_v13  ;;  %1637 = vmatpush.msrb.mxu2 %v9442_v40  ;;  %v1716_v13 = vrot.slane %v1680_v9, 2  ;;  %v1869_v44 = vand.u32 4294901760, %v1868_v62  ;;  %v5321_v9 = vld [vmem:[%s9321_s0 + $0x1e0] sm:$0xff] }
 0x1bf   : > { %1743 = vmatpush.msra.mxu0 %v6665_v34  ;;  %1852 = vmatpush.msra.mxu1 %v1851_v50  ;;  %v9444_v50 = vand.u32 4294901760, %v6557_v5 }
 0x1c0   : > { %1940 = vmatpush.msra.mxu3 %v6525_v47  ;;  %1882 = vmatpush.msra.mxu2 %v6543_v17  ;;  %v1717_v46 = vsel %vm1709_vm3, %v1711_v54, %v1716_v13  ;;  %v5325_v54 = vld [vmem:[%s9321_s0 + $0x200] sm:$0xff] }
 0x1c1   : > { %1745 = vmatpush.msra.mxu0 %v6677_v55  ;;  %1858 = vmatpush.msra.mxu1 %v1857_v1  ;;  %v6861_v21 = vand.u32 4294901760, %v1717_v46  ;;  %v6903_v19 = vand.u32 4294901760, %v5325_v54  ;;  %v9446_v1 = vand.u32 4294901760, %v6589_v18 }
 0x1c2   : > { %1942 = vmatpush.msra.mxu3 %v6533_v14  ;;  %1565 = vmatmul.f32.gmra.mxu0 %v6655_v58  ;;  %v1760_v58 = vand.u32 4294901760, %v6849_v15 }
 0x1c3   : > { %1885 = vmatpush.msra.mxu2 %v6557_v5  ;;  %1747 = vmatpush.msra.mxu0 %v6695_v33  ;;  %v6927_v12 = vsub.f32 %v5325_v54, %v6903_v19  ;;  %v6929_v5 = vand.u32 4294901760, %v5323_v36 }
 0x1c4   : > { %1864 = vmatpush.msra.mxu1 %v1863_v60  ;;  %1944 = vmatpush.msra.mxu3 %v6552_v22  ;;  %v9448_v60 = vand.u32 4294901760, %v6630_v61 }
 0x1c5   : > { %1670 = vmatmul.f32.vlgmr.msrb.gmra.mxu3 %v6550_v29  ;;  %1888 = vmatpush.msra.mxu2 %v6576_v26  ;;  %v6954_v62 = vsub.f32 %v5323_v36, %v6929_v5 }
 0x1c6   : > { %1639 = vmatmul.f32.vlgmr.msrb.gmra.mxu2 %v6550_v29  ;;  %1749 = vmatpush.msra.mxu0 %v6721_v37  ;;  %v1761_v29 = vsub.f32 %v6849_v15, %v1760_v58 }
 0x1c7   : > { %1870 = vmatpush.msra.mxu1 %v1869_v44  ;;  %1946 = vmatpush.msra.mxu3 %v6561_v27  ;;  %v6965_v44 = vand.u32 4294901760, %v5321_v9 }
 0x1c8   : > { %1872 = vmatmul.f32.vlgmr.msra.gmra.mxu1 %v6839_v56  ;;  %1891 = vmatpush.msra.mxu2 %v6589_v18  ;;  %v1762_v49 = vand.u32 4294901760, %v1761_v29  ;;  %v9447_v18 = vand.u32 4294901760, %v6614_v0  ;;  %v6972_v29 = vld [vmem:[#allocation2 + $0x18] sm:$0xff] }
 0x1c9   : > { %2058 = vmatpush.msrb.mxu1 %v6525_v47  ;;  %1751 = vmatpush.msra.mxu0 %v6737_v63  ;;  %v6875_v47 = vsub.f32 %v1717_v46, %v6861_v21  ;;  %v1679_v46 = vld [vmem:[#allocation2 + $0x8] sm:$0xfc] }
 0x1ca   : > { %1948 = vmatpush.msra.mxu3 %v6583_v52  ;;  %1894 = vmatpush.msra.mxu2 %v6614_v0  ;;  %v1713_v54 = vrot.slane %v1679_v46, 2 }
 0x1cb   : > { %2060 = vmatpush.msrb.mxu1 %v6533_v14  ;;  %1753 = vmatpush.msra.mxu0 %v6749_v41  ;;  %v5326_v14 = vld [vmem:[%s9321_s0 + $0x208] sm:$0xff] }
 0x1cc   : > { %1950 = vmatpush.msra.mxu3 %v6598_v42  ;;  %1897 = vmatpush.msra.mxu2 %v6630_v61  ;;  %v6893_v48 = vand.u32 4294901760, %v5326_v14  ;;  %v1714_v61 = vrot.slane %v6972_v29, 2 }
 0x1cd   : > { %2062 = vmatpush.msrb.mxu1 %v6552_v22  ;;  %1755 = vmatpush.msra.mxu0 %v6767_v31  ;;  %v1768_v22 = vand.u32 4294901760, %v6875_v47 }
 0x1ce   : > { %1952 = vmatpush.msra.mxu3 %v6621_v51  ;;  %1900 = vmatpush.msra.mxu2 %v6658_v2  ;;  %v1715_v36 = vsel %vm1709_vm3, %v1713_v54, %v1714_v61 }
 0x1cf   : > { %1674 = vmatmul.f32.gmra.mxu3 %v6618_v4  ;;  %2064 = vmatpush.msrb.mxu1 %v6561_v27  ;;  %v5324_v27 = vld [vmem:[%s9321_s0 + $0x1f8] sm:$0xff]  ;;  %v1769_v45 = vsub.f32 %v6875_v47, %v1768_v22 }
 0x1d0   : > { %1643 = vmatmul.f32.gmra.mxu2 %v6618_v4  ;;  %1757 = vmatpush.msra.mxu0 %v6786_v24  ;;  %v9443_v4 = vand.u32 4294901760, %v6543_v17  ;;  %v6917_v17 = vsub.f32 %v5326_v14, %v6893_v48  ;;  %v9449_v14 = vand.u32 4294901760, %v6658_v2 }
 0x1d1   : > { %1954 = vmatpush.msra.mxu3 %v6647_v43  ;;  %1763 = vmatmul.f32.vlgmr.msra.gmra.mxu0 %v1762_v49  ;;  %v1770_v6 = vand.u32 4294901760, %v1769_v45  ;;  %v6991_v45 = vsub.f32 %v5321_v9, %v6965_v44 }
 0x1d2   : > { %1876 = vmatmul.f32.gmra.mxu1 %v6861_v21  ;;  %1903 = vmatpush.msra.mxu2 %v6675_v28  ;;  %v2149_v26 = vand.u32 4294901760, %v6917_v17 }
 0x1d3   : > { %1987 = vmatpush.msrb.mxu0 %v9443_v4  ;;  %2066 = vmatpush.msrb.mxu1 %v6583_v52  ;;  %v6919_v52 = vand.u32 4294901760, %v5324_v27 }
 0x1d4   : > { %1956 = vmatpush.msra.mxu3 %v6665_v34  ;;  %1906 = vmatpush.msra.mxu2 %v6692_v32  ;;  %v2150_v13 = vsub.f32 %v6917_v17, %v2149_v26 }
 0x1d5   : > { %1991 = vmatpush.msrb.mxu0 %v9444_v50  ;;  %2068 = vmatpush.msrb.mxu1 %v6598_v42  ;;  %v5322_v42 = vld [vmem:[%s9321_s0 + $0x1e8] sm:$0xff] }
 0x1d6   : > { %1958 = vmatpush.msra.mxu3 %v6677_v55  ;;  %1909 = vmatpush.msra.mxu2 %v6705_v16  ;;  %v6944_v40 = vand.u32 4294901760, %v5322_v42  ;;  %v2151_v4 = vand.u32 4294901760, %v2150_v13  ;;  %v7103_v13 = vpop.f32.mrf.mxu3 }
 0x1d7   : > { %1995 = vmatpush.msrb.mxu0 %v9445_v53  ;;  %2070 = vmatpush.msrb.mxu1 %v6621_v51  ;;  %v6941_v51 = vsub.f32 %v5324_v27, %v6919_v52  ;;  %v9450_v27 = vand.u32 4294901760, %v6675_v28  ;;  %9451 = vst [vmem:[#allocation6_spill] sm:$0xff] %v7103_v13 }
 0x1d8   : > { %1960 = vmatpush.msra.mxu3 %v6695_v33  ;;  %1912 = vmatpush.msra.mxu2 %v6726_v30 }
 0x1d9   : > { %1999 = vmatpush.msrb.mxu0 %v9446_v1  ;;  %2072 = vmatpush.msrb.mxu1 %v6647_v43  ;;  %v2155_v43 = vand.u32 4294901760, %v6927_v12  ;;  %v2161_v0 = vand.u32 4294901760, %v6941_v51  ;;  %v5339_v1 = vld [vmem:[%s9321_s0 + $0x270] sm:$0xff] }
 0x1da   : > { %1962 = vmatpush.msra.mxu3 %v6721_v37  ;;  %1771 = vmatmul.f32.gmra.mxu0 %v1770_v6  ;;  %v1722_v6 = vsel %vm143_vm1, %v1715_v36, 0 }
 0x1db   : > { %1915 = vmatpush.msra.mxu2 %v6747_v25  ;;  %2003 = vmatpush.msrb.mxu0 %v9447_v18  ;;  %v2156_v49 = vsub.f32 %v6927_v12, %v2155_v43  ;;  %v2162_v2 = vsub.f32 %v6941_v51, %v2161_v0 }
 0x1dc   : > { %2074 = vmatpush.msrb.mxu1 %v6665_v34  ;;  %1964 = vmatpush.msra.mxu3 %v6737_v63  ;;  %v6970_v34 = vsub.f32 %v5322_v42, %v6944_v40  ;;  %v2179_v42 = vand.u32 4294901760, %v6991_v45 }
 0x1dd   : > { %1918 = vmatpush.msra.mxu2 %v6763_v59  ;;  %2007 = vmatpush.msrb.mxu0 %v9448_v60  ;;  %v2157_v28 = vand.u32 4294901760, %v2156_v49  ;;  %v2163_v53 = vand.u32 4294901760, %v2162_v2 }
 0x1de   : > { %2076 = vmatpush.msrb.mxu1 %v6677_v55  ;;  %1966 = vmatpush.msra.mxu3 %v6749_v41  ;;  %v2167_v55 = vand.u32 4294901760, %v6954_v62  ;;  %v2180_v16 = vsub.f32 %v6991_v45, %v2179_v42 }
 0x1df   : > { %1921 = vmatpush.msra.mxu2 %v6776_v20  ;;  %2011 = vmatpush.msrb.mxu0 %v9449_v14  ;;  %v5336_v14 = vld [vmem:[%s9321_s0 + $0x258] sm:$0xff] }
 0x1e0   : > { %2078 = vmatpush.msrb.mxu1 %v6695_v33  ;;  %1968 = vmatpush.msra.mxu3 %v6767_v31  ;;  %v2173_v33 = vand.u32 4294901760, %v6970_v34  ;;  %v2168_v50 = vsub.f32 %v6954_v62, %v2167_v55  ;;  %v2181_v25 = vand.u32 4294901760, %v2180_v16  ;;  %v7151_v36 = vand.u32 4294901760, %v5336_v14 }
 0x1e1   : > { %1924 = vmatpush.msra.mxu2 %v6792_v38  ;;  %2015 = vmatpush.msrb.mxu0 %v9450_v27  ;;  %v7088_v38 = vand.u32 4294901760, %v5339_v1 }
 0x1e2   : > { %2080 = vmatpush.msrb.mxu1 %v6721_v37  ;;  %1970 = vmatpush.msra.mxu3 %v6786_v24  ;;  %v1681_v37 = vld [vmem:[#allocation2 + $0x28] sm:$0x3]  ;;  %v2174_v32 = vsub.f32 %v6970_v34, %v2173_v33 }
 0x1e3   : > { %1927 = vmatpush.msra.mxu2 %v6807_v8  ;;  %1974 = vmatmul.f32.vlgmr.msra.gmra.mxu3 %v1760_v58  ;;  %v5340_v58 = vld [vmem:[%s9321_s0 + $0x278] sm:$0xff]  ;;  %v5337_v8 = vld [vmem:[%s9321_s0 + $0x260] sm:$0xff] }
 0x1e4   : > { %2019 = vmatpush.msrb.mxu0 %v1825_v3  ;;  %2082 = vmatpush.msrb.mxu1 %v6737_v63  ;;  %v2169_v3 = vand.u32 4294901760, %v2168_v50  ;;  %v1718_v63 = vrot.slane %v1681_v37, 2  ;;  %v2175_v30 = vand.u32 4294901760, %v2174_v32  ;;  %v7071_v20 = vand.u32 4294901760, %v5340_v58 }
 0x1e5   : > { %2152 = vmatpush.msrb.mxu3 %v2151_v4  ;;  %1930 = vmatmul.f32.vlgmr.msra.gmra.mxu2 %v6849_v15  ;;  %v7019_v15 = vand.u32 4294901760, %v1722_v6  ;;  %v7133_v54 = vand.u32 4294901760, %v5337_v8  ;;  %v7138_v4 = vpop.f32.mrf.mxu1 }
 0x1e6   : > { %2109 = vmatpush.msrb.mxu2 %v6893_v48  ;;  %2023 = vmatpush.msrb.mxu0 %v1831_v7  ;;  %v1719_v7 = vsel %vm1709_vm3, %v1714_v61, %v1718_v63  ;;  %9454 = vst [vmem:[#allocation9_spill] sm:$0xff] %v7138_v4 }
 0x1e7   : > { %2084 = vmatpush.msrb.mxu1 %v6749_v41  ;;  %2158 = vmatpush.msrb.mxu3 %v2157_v28  ;;  %v5342_v41 = vld [vmem:[%s9321_s0 + $0x288] sm:$0xff] }
 0x1e8   : > { %2111 = vmatpush.msrb.mxu2 %v6903_v19  ;;  %2027 = vmatpush.msrb.mxu0 %v1837_v10  ;;  %v7036_v10 = vsub.f32 %v1722_v6, %v7019_v15  ;;  %v7181_v6 = vsub.f32 %v5336_v14, %v7151_v36 }
 0x1e9   : > { %2086 = vmatpush.msrb.mxu1 %v6767_v31  ;;  %2164 = vmatpush.msrb.mxu3 %v2163_v53  ;;  %v7038_v31 = vand.u32 4294901760, %v5342_v41 }
 0x1ea   : > { %2113 = vmatpush.msrb.mxu2 %v6919_v52  ;;  %2031 = vmatpush.msrb.mxu0 %v1843_v11  ;;  %v5341_v11 = vld [vmem:[%s9321_s0 + $0x280] sm:$0xff] }
 0x1eb   : > { %2088 = vmatpush.msrb.mxu1 %v6786_v24  ;;  %2170 = vmatpush.msrb.mxu3 %v2169_v3  ;;  %v1724_v24 = vsel %vm143_vm1, %v1719_v7, 0  ;;  %v7059_v59 = vsub.f32 %v5342_v41, %v7038_v31 }
 0x1ec   : > { %2090 = vmatmul.f32.vlgmr.msrb.gmra.mxu1 %v6839_v56  ;;  %2115 = vmatpush.msrb.mxu2 %v6929_v5 }
 0x1ed   : > { %2320 = vmatpush.msra.mxu1 %v6893_v48  ;;  %1980 = vmatmul.f32.gmra.mxu3 %v1768_v22  ;;  %v2122_v22 = vand.u32 4294901760, %v7036_v10 }
 0x1ee   : > { %2035 = vmatpush.msrb.mxu0 %v1849_v35  ;;  %2176 = vmatpush.msrb.mxu3 %v2175_v30  ;;  %v7061_v35 = vand.u32 4294901760, %v5341_v11 }
 0x1ef   : > { %1935 = vmatmul.f32.gmra.mxu2 %v6875_v47  ;;  %2322 = vmatpush.msra.mxu1 %v6903_v19  ;;  %v7064_v47 = vand.u32 4294901760, %v1724_v24  ;;  %v2123_v9 = vsub.f32 %v7036_v10, %v2122_v22 }
 0x1f0   : > { %2117 = vmatpush.msrb.mxu2 %v6944_v40  ;;  %2039 = vmatpush.msrb.mxu0 %v1855_v23  ;;  %v5338_v23 = vld [vmem:[%s9321_s0 + $0x268] sm:$0xff]  ;;  %v7086_v18 = vsub.f32 %v5341_v11, %v7061_v35  ;;  %v9355_v11 = vand.u32 4294901760, %v7181_v6 }
 0x1f1   : > { %2182 = vmatpush.msrb.mxu3 %v2181_v25  ;;  %2324 = vmatpush.msra.mxu1 %v6919_v52  ;;  %v7101_v60 = vand.u32 4294901760, %v5338_v23 }
 0x1f2   : > { %2119 = vmatpush.msrb.mxu2 %v6965_v44  ;;  %2043 = vmatpush.msrb.mxu0 %v1861_v57  ;;  %v7094_v57 = vsub.f32 %v1724_v24, %v7064_v47  ;;  %v2478_v14 = vsub.f32 %v7181_v6, %v9355_v11 }
 0x1f3   : > { %2242 = vmatpush.msra.mxu3 %v6893_v48  ;;  %2326 = vmatpush.msra.mxu1 %v6929_v5  ;;  %v9361_v48 = vand.u32 4294901760, %v7059_v59  ;;  %v7136_v27 = vsub.f32 %v5338_v23, %v7101_v60 }
 0x1f4   : > { %2204 = vmatpush.msra.mxu2 %v6917_v17  ;;  %2047 = vmatpush.msrb.mxu0 %v1867_v39  ;;  %v7111_v39 = vpop.f32.mrf.mxu2  ;;  %v7120_v17 = vsub.f32 %v5339_v1, %v7088_v38  ;;  %v9362_v61 = vand.u32 4294901760, %v7094_v57  ;;  %v7220_v1 = vpop.f32.mrf.mxu1 }
 0x1f5   : > { %2244 = vmatpush.msra.mxu3 %v6903_v19  ;;  %2049 = vmatmul.f32.vlgmr.msrb.gmra.mxu0 %v6839_v56  ;;  %v7099_v19 = vsub.f32 %v5340_v58, %v7071_v20  ;;  %9452 = vst [vmem:[#allocation7_spill] sm:$0xff] %v7111_v39  ;;  %v2124_v56 = vand.u32 4294901760, %v2123_v9  ;;  %v2442_v46 = vsub.f32 %v7059_v59, %v9361_v48  ;;  %v5331_v58 = vld [vmem:[%s9321_s0 + $0x230] sm:$0xff] }
 0x1f6   : > { %2207 = vmatpush.msra.mxu2 %v6927_v12  ;;  %2094 = vmatmul.f32.gmra.mxu1 %v6861_v21  ;;  %v9358_v2 = vand.u32 4294901760, %v7120_v17  ;;  %v2131_v28 = vsub.f32 %v7094_v57, %v9362_v61  ;;  %9458 = vst [vmem:[#allocation13_spill] sm:$0xff] %v7220_v1 }
 0x1f7   : > { %2246 = vmatpush.msra.mxu3 %v6919_v52  ;;  %2279 = vmatpush.msra.mxu0 %v2149_v26  ;;  %v9360_v52 = vand.u32 4294901760, %v7086_v18  ;;  %v7122_v26 = vpop.f32.mrf.mxu0  ;;  %v9359_v49 = vand.u32 4294901760, %v7099_v19  ;;  %v2443_v12 = vand.u32 4294901760, %v2442_v46  ;;  %v5330_v46 = vld [vmem:[%s9321_s0 + $0x228] sm:$0xff] }
 0x1f8   : > { %2328 = vmatpush.msra.mxu1 %v6944_v40  ;;  %2184 = vmatmul.f32.vlgmr.msrb.gmra.mxu3 %v7019_v15  ;;  %9453 = vst [vmem:[#allocation8_spill] sm:$0xff] %v7122_v26  ;;  %v2460_v53 = vsub.f32 %v7120_v17, %v9358_v2  ;;  %v2132_v3 = vand.u32 4294901760, %v2131_v28  ;;  %v7255_v28 = vand.u32 4294901760, %v5330_v46 }
 0x1f9   : > { %2210 = vmatpush.msra.mxu2 %v6941_v51  ;;  %2248 = vmatpush.msra.mxu3 %v6929_v5  ;;  %v5335_v5 = vld [vmem:[%s9321_s0 + $0x250] sm:$0xff]  ;;  %v2454_v50 = vsub.f32 %v7099_v19, %v9359_v49  ;;  %v9357_v51 = vand.u32 4294901760, %v7136_v27 }
 0x1fa   : > { %2125 = vmatmul.f32.vlgmr.msrb.gmra.mxu2 %v2124_v56  ;;  %2283 = vmatpush.msra.mxu0 %v2155_v43  ;;  %v2448_v43 = vsub.f32 %v7086_v18, %v9360_v52  ;;  %v7171_v37 = vand.u32 4294901760, %v5335_v5  ;;  %v5346_v52 = vld [vmem:[%s9321_s0 + $0x2a8] sm:$0xff] }
 0x1fb   : > { %2330 = vmatpush.msra.mxu1 %v6965_v44  ;;  %2213 = vmatpush.msra.mxu2 %v6954_v62  ;;  %v5333_v62 = vld [vmem:[%s9321_s0 + $0x240] sm:$0xff]  ;;  %v2455_v16 = vand.u32 4294901760, %v2454_v50  ;;  %v2466_v41 = vsub.f32 %v7136_v27, %v9357_v51 }
 0x1fc   : > { %2250 = vmatpush.msra.mxu3 %v6944_v40  ;;  %2287 = vmatpush.msra.mxu0 %v2161_v0  ;;  %v5334_v40 = vld [vmem:[%s9321_s0 + $0x248] sm:$0xff]  ;;  %v7169_v0 = vsub.f32 %v5337_v8, %v7133_v54  ;;  %v7192_v63 = vpop.f32.mrf.mxu2  ;;  %v7202_v7 = vsub.f32 %v5335_v5, %v7171_v37  ;;  %v7307_v2 = vpop.f32.mrf.mxu1 }
 0x1fd   : > { %2604 = vmatpush.msrb.mxu1 %v7038_v31  ;;  %2216 = vmatpush.msra.mxu2 %v6970_v34  ;;  %v7183_v32 = vand.u32 4294901760, %v5334_v40  ;;  %9456 = vst [vmem:[#allocation11_spill] sm:$0xff] %v7192_v63  ;;  %v7211_v34 = vand.u32 4294901760, %v5333_v62  ;;  %v2467_v9 = vand.u32 4294901760, %v2466_v41  ;;  %v5328_v41 = vld [vmem:[%s9321_s0 + $0x218] sm:$0xff] }
 0x1fe   : > { %2252 = vmatpush.msra.mxu3 %v6965_v44  ;;  %2291 = vmatpush.msra.mxu0 %v2167_v55  ;;  %v2449_v44 = vand.u32 4294901760, %v2448_v43  ;;  %v7188_v55 = vpop.f32.mrf.mxu3  ;;  %v9356_v30 = vand.u32 4294901760, %v7169_v0  ;;  %v9353_v56 = vand.u32 4294901760, %v7202_v7  ;;  %v7300_v11 = vand.u32 4294901760, %v5328_v41  ;;  %9462 = vst [vmem:[#allocation17_spill] sm:$0xff] %v7307_v2 }
 0x1ff   : > { %2606 = vmatpush.msrb.mxu1 %v7061_v35  ;;  %2219 = vmatpush.msra.mxu2 %v6991_v45  ;;  %9455 = vst [vmem:[#allocation10_spill] sm:$0xff] %v7188_v55  ;;  %v7207_v25 = vpop.f32.mrf.mxu0  ;;  %v7215_v24 = vsub.f32 %v5334_v40, %v7183_v32  ;;  %v7238_v45 = vsub.f32 %v5333_v62, %v7211_v34 }
 0x200   : > { %2444 = vmatpush.msrb.mxu3 %v2443_v12  ;;  %2053 = vmatmul.f32.gmra.mxu0 %v6861_v21  ;;  %v5332_v21 = vld [vmem:[%s9321_s0 + $0x238] sm:$0xff]  ;;  %9457 = vst [vmem:[#allocation12_spill] sm:$0xff] %v7207_v25  ;;  %v2472_v8 = vsub.f32 %v7169_v0, %v9356_v30  ;;  %v5329_v12 = vld [vmem:[%s9321_s0 + $0x220] sm:$0xff]  ;;  %v7302_v30 = vld [vmem:[#allocation2 + $0x10] sm:$0xff] }
 0x201   : > { %2608 = vmatpush.msrb.mxu1 %v7071_v20  ;;  %2295 = vmatpush.msra.mxu0 %v2173_v33  ;;  %v2461_v33 = vand.u32 4294901760, %v2460_v53  ;;  %v7225_v23 = vand.u32 4294901760, %v5332_v21  ;;  %v9354_v5 = vand.u32 4294901760, %v7215_v24  ;;  %v9363_v62 = vand.u32 4294901760, %v7238_v45 }
 0x202   : > { %2332 = vmatmul.f32.vlgmr.msra.gmra.mxu1 %v7019_v15  ;;  %2391 = vmatpush.msrb.mxu2 %v7038_v31  ;;  %v2473_v50 = vand.u32 4294901760, %v2472_v8  ;;  %v7291_v8 = vsub.f32 %v5330_v46, %v7255_v28 }
 0x203   : > { %2188 = vmatmul.f32.gmra.mxu3 %v7064_v47  ;;  %2610 = vmatpush.msrb.mxu1 %v7088_v38  ;;  %v7253_v43 = vsub.f32 %v5332_v21, %v7225_v23  ;;  %v5348_v21 = vld [vmem:[%s9321_s0 + $0x2b8] sm:$0xff] }
 0x204   : > { %2450 = vmatpush.msrb.mxu3 %v2449_v44  ;;  %2133 = vmatmul.f32.gmra.mxu2 %v2132_v3  ;;  %v7257_v40 = vpop.f32.mrf.mxu2  ;;  %v2484_v44 = vsub.f32 %v7202_v7, %v9353_v56  ;;  %v2342_v56 = vld [vmem:[#allocation2] sm:$0xf8]  ;;  %v7305_v51 = vand.u32 4294901760, %v5348_v21 }
 0x205   : > { %2299 = vmatpush.msra.mxu0 %v2179_v42  ;;  %2393 = vmatpush.msrb.mxu2 %v7061_v35  ;;  %v7240_v42 = vand.u32 4294901760, %v5331_v58  ;;  %9459 = vst [vmem:[#allocation14_spill] sm:$0xff] %v7257_v40  ;;  %v2374_v61 = vrot.slane %v2342_v56, 3 }
 0x206   : > { %2456 = vmatpush.msrb.mxu3 %v2455_v16  ;;  %2612 = vmatpush.msrb.mxu1 %v7101_v60  ;;  %v7263_v53 = vpop.f32.mrf.mxu3  ;;  %v7271_v16 = vand.u32 4294901760, %v5329_v12  ;;  %v7337_v56 = vsub.f32 %v5348_v21, %v7305_v51 }
 0x207   : > { %2546 = vmatpush.msrb.mxu0 %v7059_v59  ;;  %2395 = vmatpush.msrb.mxu2 %v7071_v20  ;;  %9460 = vst [vmem:[#allocation15_spill] sm:$0xff] %v7263_v53  ;;  %v7269_v3 = vsub.f32 %v5331_v58, %v7240_v42  ;;  %v7284_v58 = vpop.f32.mrf.mxu0  ;;  %v7342_v53 = vand.u32 4294901760, %v5346_v52 }
 0x208   : > { %2462 = vmatpush.msrb.mxu3 %v2461_v33  ;;  %2614 = vmatpush.msrb.mxu1 %v7133_v54  ;;  %v2490_v33 = vsub.f32 %v7215_v24, %v9354_v5  ;;  %9461 = vst [vmem:[#allocation16_spill] sm:$0xff] %v7284_v58  ;;  %v5347_v5 = vld [vmem:[%s9321_s0 + $0x2b0] sm:$0xff]  ;;  %v7316_v49 = vsub.f32 %v5329_v12, %v7271_v16 }
 0x209   : > { %2549 = vmatpush.msrb.mxu0 %v7086_v18  ;;  %2397 = vmatpush.msrb.mxu2 %v7088_v38  ;;  %v7324_v46 = vand.u32 4294901760, %v5347_v5 }
 0x20a   : > { %2468 = vmatpush.msrb.mxu3 %v2467_v9  ;;  %2616 = vmatpush.msrb.mxu1 %v7151_v36  ;;  %v9364_v9 = vand.u32 4294901760, %v7253_v43  ;;  %v9470_v26 = vand.u32 4294901760, %v7316_v49 }
 0x20b   : > { %2552 = vmatpush.msrb.mxu0 %v7099_v19  ;;  %2336 = vmatmul.f32.gmra.mxu1 %v7064_v47 }
 0x20c   : > { %2301 = vmatmul.f32.vlgmr.msra.gmra.mxu0 %v7019_v15  ;;  %2399 = vmatpush.msrb.mxu2 %v7101_v60  ;;  %v2479_v15 = vand.u32 4294901760, %v2478_v14  ;;  %v5327_v14 = vld [vmem:[%s9321_s0 + $0x210] sm:$0xff]  ;;  %v2502_v12 = vsub.f32 %v7253_v43, %v9364_v9  ;;  %v5345_v9 = vld [vmem:[%s9321_s0 + $0x2a0] sm:$0xff] }
 0x20d   : > { %2256 = vmatmul.f32.vlgmr.msra.gmra.mxu3 %v2122_v22  ;;  %2555 = vmatpush.msrb.mxu0 %v7120_v17  ;;  %v2485_v22 = vand.u32 4294901760, %v2484_v44  ;;  %v7322_v48 = vand.u32 4294901760, %v5327_v14  ;;  %v7340_v44 = vsub.f32 %v5328_v41, %v7300_v11  ;;  %v7357_v41 = vsub.f32 %v5347_v5, %v7324_v46  ;;  %v2344_v5 = vld [vmem:[#allocation2 + $0x20] sm:$0x7] }
 0x20e   : > { %2474 = vmatpush.msrb.mxu3 %v2473_v50  ;;  %2618 = vmatpush.msrb.mxu1 %v7171_v37  ;;  %v2496_v50 = vsub.f32 %v7238_v45, %v9363_v62  ;;  %v9464_v62 = vand.u32 4294901760, %v7269_v3  ;;  %v7362_v2 = vpop.f32.mrf.mxu3  ;;  %v2380_v13 = vrot.slane %v2344_v5, 3  ;;  %v9472_v5 = vand.u32 4294901760, %v7337_v56 }
 0x20f   : > { %2222 = vmatmul.f32.vlgmr.msra.gmra.mxu2 %v7036_v10  ;;  %2558 = vmatpush.msrb.mxu0 %v7136_v27  ;;  %v2491_v10 = vand.u32 4294901760, %v2490_v33  ;;  %v7360_v40 = vsub.f32 %v5327_v14, %v7322_v48  ;;  %9466 = vst [vmem:[#allocation19_spill] sm:$0xff] %v7362_v2  ;;  %v9468_v14 = vand.u32 4294901760, %v7094_v57  ;;  %v7397_v2 = vpop.f32.mrf.mxu1 }
 0x210   : > { %2401 = vmatpush.msrb.mxu2 %v7133_v54  ;;  %2480 = vmatpush.msrb.mxu3 %v2479_v15  ;;  %v9463_v15 = vrot.slane %v7302_v30, 3  ;;  %9471 = vst [vmem:[#allocation21_spill] sm:$0xff] %v7397_v2  ;;  %v2814_v39 = vsub.f32 %v7337_v56, %v9472_v5  ;;  %v9474_v2 = vand.u32 4294901760, %v7357_v41 }
 0x211   : > { %2620 = vmatpush.msrb.mxu1 %v7183_v32  ;;  %2561 = vmatpush.msrb.mxu0 %v7169_v0 }
 0x212   : > { %2403 = vmatpush.msrb.mxu2 %v7151_v36  ;;  %2486 = vmatpush.msrb.mxu3 %v2485_v22  ;;  %v2376_v33 = vsel %vm2373_vm4, %v2374_v61, %v9463_v15  ;;  %v2497_v22 = vand.u32 4294901760, %v2496_v50  ;;  %v2508_v61 = vsub.f32 %v7269_v3, %v9464_v62  ;;  %v7353_v15 = vpop.f32.mrf.mxu2  ;;  %v2503_v62 = vand.u32 4294901760, %v2502_v12  ;;  %v5344_v12 = vld [vmem:[%s9321_s0 + $0x298] sm:$0xff] }
 0x213   : > { %2622 = vmatpush.msrb.mxu1 %v7211_v34  ;;  %2564 = vmatpush.msrb.mxu0 %v7181_v6  ;;  %9465 = vst [vmem:[#allocation18_spill] sm:$0xff] %v7353_v15  ;;  %v9467_v50 = vand.u32 4294901760, %v7291_v8  ;;  %v7369_v58 = vand.u32 4294901760, %v2376_v33  ;;  %v9473_v15 = vand.u32 4294901760, %v7340_v44  ;;  %v2820_v5 = vsub.f32 %v7357_v41, %v9474_v2 }
 0x214   : > { %2405 = vmatpush.msrb.mxu2 %v7171_v37  ;;  %2492 = vmatpush.msrb.mxu3 %v2491_v10  ;;  %v7371_v10 = vand.u32 4294901760, %v5345_v9  ;;  %v2509_v4 = vand.u32 4294901760, %v2508_v61  ;;  %v2815_v2 = vand.u32 4294901760, %v2814_v39 }
 0x215   : > { %2624 = vmatpush.msrb.mxu1 %v7225_v23  ;;  %2305 = vmatmul.f32.gmra.mxu0 %v7064_v47  ;;  %v2514_v21 = vsub.f32 %v7291_v8, %v9467_v50  ;;  %v7379_v47 = vsub.f32 %v5346_v52, %v7342_v53  ;;  %v7384_v50 = vpop.f32.mrf.mxu0  ;;  %v7406_v52 = vand.u32 4294901760, %v5344_v12 }
 0x216   : > { %2407 = vmatpush.msrb.mxu2 %v7183_v32  ;;  %2262 = vmatmul.f32.gmra.mxu3 %v9468_v14  ;;  %9469 = vst [vmem:[#allocation20_spill] sm:$0xff] %v7384_v50  ;;  %v2520_v14 = vsub.f32 %v7316_v49, %v9470_v26  ;;  %v7401_v26 = vsub.f32 %v2376_v33, %v7369_v58  ;;  %v9475_v50 = vand.u32 4294901760, %v7360_v40  ;;  %v9476_v33 = vrot.slane %v7302_v30, 3 }
 0x217   : > { %2498 = vmatpush.msrb.mxu3 %v2497_v22  ;;  %2567 = vmatpush.msrb.mxu0 %v7202_v7  ;;  %v5343_v22 = vld [vmem:[%s9321_s0 + $0x290] sm:$0xff]  ;;  %v2515_v61 = vand.u32 4294901760, %v2514_v21  ;;  %v2526_v21 = vsub.f32 %v7340_v44, %v9473_v15  ;;  %v7435_v63 = vsub.f32 %v5344_v12, %v7406_v52  ;;  %v2821_v12 = vand.u32 4294901760, %v2820_v5  ;;  %v2343_v5 = vld [vmem:[#allocation2 + $0x8] sm:$0xf8] }
 0x218   : > { %2626 = vmatpush.msrb.mxu1 %v7240_v42  ;;  %2227 = vmatmul.f32.gmra.mxu2 %v7094_v57  ;;  %v7404_v57 = vsub.f32 %v5345_v9, %v7371_v10  ;;  %v2521_v9 = vand.u32 4294901760, %v2520_v14  ;;  %v2532_v15 = vsub.f32 %v7360_v40, %v9475_v50  ;;  %v2381_v55 = vsel %vm2373_vm4, %v9476_v33, %v2380_v13  ;;  %v7444_v14 = vpop.f32.mrf.mxu3 }
 0x219   : > { %2409 = vmatpush.msrb.mxu2 %v7211_v34  ;;  %2504 = vmatpush.msrb.mxu3 %v2503_v62  ;;  %v7418_v62 = vand.u32 4294901760, %v5343_v22  ;;  %v2527_v50 = vand.u32 4294901760, %v2526_v21  ;;  %9479 = vst [vmem:[#allocation23_spill] sm:$0xff] %v7444_v14  ;;  %v7452_v39 = vand.u32 4294901760, %v2381_v55  ;;  %v9366_v14 = vand.u32 4294901760, %v7435_v63 }
 0x21a   : > { %2570 = vmatpush.msrb.mxu0 %v7215_v24  ;;  %2628 = vmatpush.msrb.mxu1 %v7255_v28  ;;  %v7437_v1 = vpop.f32.mrf.mxu2  ;;  %v2533_v33 = vand.u32 4294901760, %v2532_v15  ;;  %v7462_v15 = vpop.f32.mrf.mxu1 }
 0x21b   : > { %2411 = vmatpush.msrb.mxu2 %v7225_v23  ;;  %2510 = vmatpush.msrb.mxu3 %v2509_v4  ;;  %v2424_v4 = vand.u32 4294901760, %v7401_v26  ;;  %9477 = vst [vmem:[#allocation22_spill] sm:$0xff] %v7437_v1  ;;  %v7448_v13 = vsub.f32 %v5343_v22, %v7418_v62 }
 0x21c   : > { %2573 = vmatpush.msrb.mxu0 %v7238_v45  ;;  %2630 = vmatpush.msrb.mxu1 %v7271_v16  ;;  %9482 = vst [vmem:[#allocation25_spill] sm:$0xff] %v7462_v15  ;;  %v2377_v15 = vrot.slane %v2343_v5, 3 }
 0x21d   : > { %2413 = vmatpush.msrb.mxu2 %v7240_v42  ;;  %2516 = vmatpush.msrb.mxu3 %v2515_v61  ;;  %v9478_v61 = vand.u32 4294901760, %v7379_v47  ;;  %v7454_v21 = vpop.f32.mrf.mxu0 }
 0x21e   : > { %2576 = vmatpush.msrb.mxu0 %v7253_v43  ;;  %2632 = vmatpush.msrb.mxu1 %v7300_v11  ;;  %9480 = vst [vmem:[#allocation24_spill] sm:$0xff] %v7454_v21  ;;  %v9365_v21 = vand.u32 4294901760, %v7448_v13 }
 0x21f   : > { %v2826_v25 = vsub.f32 %v7379_v47, %v9478_v61  ;;  %2415 = vmatpush.msrb.mxu2 %v7255_v28  ;;  %2522 = vmatpush.msrb.mxu3 %v2521_v9  ;;  %v2425_v61 = vsub.f32 %v7401_v26, %v2424_v4  ;;  %v9481_v9 = vand.u32 4294901760, %v7404_v57 }
 0x220   : > { %2579 = vmatpush.msrb.mxu0 %v7269_v3  ;;  %2634 = vmatpush.msrb.mxu1 %v7322_v48 }
 0x221   : > { %2417 = vmatpush.msrb.mxu2 %v7271_v16  ;;  %2638 = vmatmul.f32.vlgmr.msrb.gmra.mxu1 %v2424_v4  ;;  %v2832_v22 = vsub.f32 %v7404_v57, %v9481_v9  ;;  %v2827_v1 = vand.u32 4294901760, %v2826_v25  ;;  %v2378_v4 = vrot.slane %v6972_v29, 3  ;;  %v7469_v9 = vsub.f32 %v2381_v55, %v7452_v39  ;;  %v5364_v29 = vld [vmem:[%s9321_s0 + $0x338] sm:$0xff] }
 0x222   : > { %2816 = vmatpush.msra.mxu1 %v2815_v2  ;;  %2528 = vmatpush.msrb.mxu3 %v2527_v50  ;;  %v2426_v25 = vand.u32 4294901760, %v2425_v61  ;;  %v2838_v50 = vsub.f32 %v7435_v63, %v9366_v14  ;;  %v2844_v55 = vsub.f32 %v7448_v13, %v9365_v21  ;;  %v9483_v61 = vand.u32 4294901760, %v7059_v59  ;;  %v5363_v59 = vld [vmem:[%s9321_s0 + $0x330] sm:$0xff] }
 0x223   : > { %2582 = vmatpush.msrb.mxu0 %v7291_v8  ;;  %2419 = vmatpush.msrb.mxu2 %v7300_v11  ;;  %v2833_v2 = vand.u32 4294901760, %v2832_v22  ;;  %v7491_v22 = vpop.f32.mrf.mxu3  ;;  %v7494_v5 = vand.u32 4294901760, %v5364_v29 }
 0x224   : > { %2822 = vmatpush.msra.mxu1 %v2821_v12  ;;  %2534 = vmatpush.msrb.mxu3 %v2533_v33  ;;  %v2379_v12 = vsel %vm2373_vm4, %v2377_v15, %v2378_v4  ;;  %v7485_v33 = vpop.f32.mrf.mxu2  ;;  %9484 = vst [vmem:[#allocation26_spill] sm:$0xff] %v7491_v22  ;;  %v9485_v15 = vand.u32 4294901760, %v7086_v18 }
 0x225   : > { %2585 = vmatpush.msrb.mxu0 %v7316_v49  ;;  %2421 = vmatpush.msrb.mxu2 %v7322_v48  ;;  %v2386_v21 = vsel %vm143_vm1, %v2379_v12, 0  ;;  %v7512_v12 = vpop.f32.mrf.mxu1 }
 0x226   : > { %2536 = vmatmul.f32.vlgmr.msrb.gmra.mxu3 %v7369_v58  ;;  %2828 = vmatpush.msra.mxu1 %v2827_v1  ;;  %v2432_v1 = vand.u32 4294901760, %v7469_v9  ;;  %9487 = vst [vmem:[#allocation28_spill] sm:$0xff] %v7512_v12 }
 0x227   : > { %2722 = vmatpush.msra.mxu3 %v7038_v31  ;;  %2427 = vmatmul.f32.vlgmr.msrb.gmra.mxu2 %v2426_v25  ;;  %v2839_v31 = vand.u32 4294901760, %v2838_v50  ;;  %v2345_v25 = vld [vmem:[#allocation2 + $0x28] sm:$0x7] }
 0x228   : > { %2588 = vmatpush.msrb.mxu0 %v7340_v44  ;;  %2651 = vmatpush.msra.mxu2 %v9483_v61  ;;  %v7503_v61 = vpop.f32.mrf.mxu0  ;;  %v2382_v18 = vrot.slane %v2345_v25, 3  ;;  %v5362_v50 = vld [vmem:[%s9321_s0 + $0x328] sm:$0xff] }
 0x229   : > { %2724 = vmatpush.msra.mxu3 %v7061_v35  ;;  %2834 = vmatpush.msra.mxu1 %v2833_v2  ;;  %9486 = vst [vmem:[#allocation27_spill] sm:$0xff] %v7503_v61  ;;  %v2845_v35 = vand.u32 4294901760, %v2844_v55  ;;  %v2433_v2 = vsub.f32 %v7469_v9, %v2432_v1  ;;  %v7519_v55 = vsub.f32 %v5364_v29, %v7494_v5 }
 0x22a   : > { %2591 = vmatpush.msrb.mxu0 %v7360_v40  ;;  %2655 = vmatpush.msra.mxu2 %v9485_v15  ;;  %v9488_v15 = vand.u32 4294901760, %v7099_v19  ;;  %v7530_v19 = vand.u32 4294901760, %v5362_v50  ;;  %v2383_v25 = vsel %vm2373_vm4, %v2378_v4, %v2382_v18 }
 0x22b   : > { %2594 = vmatmul.f32.vlgmr.msrb.gmra.mxu0 %v7401_v26  ;;  %2644 = vmatmul.f32.gmra.mxu1 %v2432_v1  ;;  %v7516_v26 = vand.u32 4294901760, %v2386_v21  ;;  %v5361_v1 = vld [vmem:[%s9321_s0 + $0x320] sm:$0xff]  ;;  %v2434_v29 = vand.u32 4294901760, %v2433_v2  ;;  %v7552_v4 = vpop.f32.mrf.mxu3 }
 0x22c   : > { %2726 = vmatpush.msra.mxu3 %v7071_v20  ;;  %2773 = vmatpush.msra.mxu0 %v7305_v51  ;;  %v7521_v20 = vand.u32 4294901760, %v5363_v59  ;;  %v7549_v2 = vpop.f32.mrf.mxu2  ;;  %9491 = vst [vmem:[#allocation30_spill] sm:$0xff] %v7552_v4  ;;  %v7559_v18 = vsub.f32 %v5362_v50, %v7530_v19  ;;  %v5357_v50 = vld [vmem:[%s9321_s0 + $0x300] sm:$0xff] }
 0x22d   : > { %2840 = vmatpush.msra.mxu1 %v2839_v31  ;;  %2659 = vmatpush.msra.mxu2 %v9488_v15  ;;  %v9489_v31 = vand.u32 4294901760, %v7120_v17  ;;  %v7541_v17 = vsub.f32 %v2386_v21, %v7516_v26  ;;  %9490 = vst [vmem:[#allocation29_spill] sm:$0xff] %v7549_v2  ;;  %v2388_v21 = vsel %vm143_vm1, %v2383_v25, 0 }
 0x22e   : > { %2728 = vmatpush.msra.mxu3 %v7088_v38  ;;  %2775 = vmatpush.msra.mxu0 %v7324_v46  ;;  %v5360_v38 = vld [vmem:[%s9321_s0 + $0x318] sm:$0xff]  ;;  %v7545_v15 = vsub.f32 %v5363_v59, %v7521_v20 }
 0x22f   : > { %2846 = vmatpush.msra.mxu1 %v2845_v35  ;;  %2663 = vmatpush.msra.mxu2 %v9489_v31  ;;  %v9367_v35 = vand.u32 4294901760, %v7519_v55  ;;  %v7547_v31 = vand.u32 4294901760, %v5361_v1  ;;  %v7561_v59 = vand.u32 4294901760, %v5360_v38 }
 0x230   : > { %2540 = vmatmul.f32.gmra.mxu3 %v7452_v39  ;;  %2777 = vmatpush.msra.mxu0 %v7342_v53  ;;  %v7568_v14 = vpop.f32.mrf.mxu0 }
 0x231   : > { %2906 = vmatpush.msrb.mxu1 %v7305_v51  ;;  %2730 = vmatpush.msra.mxu3 %v7101_v60  ;;  %v9492_v60 = vand.u32 4294901760, %v7136_v27  ;;  %9493 = vst [vmem:[#allocation31_spill] sm:$0xff] %v7568_v14  ;;  %v9494_v27 = vand.u32 4294901760, %v7169_v0  ;;  %v5358_v14 = vld [vmem:[%s9321_s0 + $0x308] sm:$0xff]  ;;  %v7586_v0 = vand.u32 4294901760, %v2388_v21  ;;  %v7597_v25 = vsub.f32 %v5360_v38, %v7561_v59 }
 0x232   : > { %2435 = vmatmul.f32.gmra.mxu2 %v2434_v29  ;;  %v5359_v29 = vld [vmem:[%s9321_s0 + $0x310] sm:$0xff]  ;;  %2779 = vmatpush.msra.mxu0 %v7371_v10 }
 0x233   : > { %2908 = vmatpush.msrb.mxu1 %v7324_v46  ;;  %2667 = vmatpush.msra.mxu2 %v9492_v60  ;;  %v7579_v60 = vsub.f32 %v5361_v1, %v7547_v31  ;;  %v9498_v1 = vand.u32 4294901760, %v7541_v17  ;;  %v7619_v2 = vsub.f32 %v2388_v21, %v7586_v0  ;;  %v7634_v21 = vand.u32 4294901760, %v5357_v50 }
 0x234   : > { %2732 = vmatpush.msra.mxu3 %v7133_v54  ;;  %2599 = vmatmul.f32.gmra.mxu0 %v7469_v9  ;;  %v3106_v54 = vsub.f32 %v7519_v55, %v9367_v35  ;;  %v7588_v9 = vand.u32 4294901760, %v5359_v29  ;;  %v9496_v35 = vand.u32 4294901760, %v7181_v6  ;;  %v9497_v6 = vand.u32 4294901760, %v7202_v7  ;;  %v7636_v12 = vpop.f32.mrf.mxu2 }
 0x235   : > { %2910 = vmatpush.msrb.mxu1 %v7342_v53  ;;  %2671 = vmatpush.msra.mxu2 %v9494_v27  ;;  %v7590_v27 = vpop.f32.mrf.mxu1  ;;  %v2787_v38 = vsub.f32 %v7541_v17, %v9498_v1  ;;  %v9501_v1 = vand.u32 4294901760, %v7559_v18  ;;  %9502 = vst [vmem:[#allocation33_spill] sm:$0xff] %v7636_v12  ;;  %v5355_v12 = vld [vmem:[%s9321_s0 + $0x2f0] sm:$0xff]  ;;  %v7666_v22 = vsub.f32 %v5357_v50, %v7634_v21 }
 0x236   : > { %2734 = vmatpush.msra.mxu3 %v7151_v36  ;;  %2781 = vmatpush.msra.mxu0 %v7406_v52  ;;  %9495 = vst [vmem:[#allocation32_spill] sm:$0xff] %v7590_v27  ;;  %v7601_v36 = vand.u32 4294901760, %v5358_v14  ;;  %v9499_v27 = vand.u32 4294901760, %v7545_v15  ;;  %v7622_v7 = vsub.f32 %v5359_v29, %v7588_v9 }
 0x237   : > { %2848 = vmatmul.f32.vlgmr.msra.gmra.mxu1 %v7516_v26  ;;  %2675 = vmatpush.msra.mxu2 %v9496_v35  ;;  %v3107_v35 = vand.u32 4294901760, %v3106_v54  ;;  %v5356_v54 = vld [vmem:[%s9321_s0 + $0x2f8] sm:$0xff] }
 0x238   : > { %2912 = vmatpush.msrb.mxu1 %v7371_v10  ;;  %2736 = vmatpush.msra.mxu3 %v7171_v37  ;;  %v3112_v37 = vsub.f32 %v7545_v15, %v9499_v27  ;;  %v9500_v27 = vand.u32 4294901760, %v7215_v24  ;;  %v7641_v29 = vsub.f32 %v5358_v14, %v7601_v36  ;;  %v2788_v24 = vand.u32 4294901760, %v2787_v38  ;;  %v7659_v38 = vpop.f32.mrf.mxu0 }
 0x239   : > { %2783 = vmatpush.msra.mxu0 %v7418_v62  ;;  %2679 = vmatpush.msra.mxu2 %v9497_v6  ;;  %v3118_v6 = vsub.f32 %v7559_v18, %v9501_v1  ;;  %v9504_v1 = vand.u32 4294901760, %v7579_v60  ;;  %v7649_v61 = vand.u32 4294901760, %v5356_v54  ;;  %v9505_v14 = vand.u32 4294901760, %v7238_v45  ;;  %v5354_v45 = vld [vmem:[%s9321_s0 + $0x2e8] sm:$0xff] }
 0x23a   : > { %2914 = vmatpush.msrb.mxu1 %v7406_v52  ;;  %2738 = vmatpush.msra.mxu3 %v7183_v32  ;;  %v7643_v32 = vpop.f32.mrf.mxu3 }
 0x23b   : > { %2868 = vmatpush.msrb.mxu0 %v7337_v56  ;;  %2683 = vmatpush.msra.mxu2 %v9500_v27  ;;  %9503 = vst [vmem:[#allocation34_spill] sm:$0xff] %v7643_v32  ;;  %v3113_v27 = vand.u32 4294901760, %v3112_v37  ;;  %v3124_v4 = vsub.f32 %v7579_v60, %v9504_v1  ;;  %v3119_v37 = vand.u32 4294901760, %v3118_v6  ;;  %v9506_v1 = vand.u32 4294901760, %v7597_v25 }
 0x23c   : > { %2916 = vmatpush.msrb.mxu1 %v7418_v62  ;;  %2740 = vmatpush.msra.mxu3 %v7211_v34  ;;  %v9368_v34 = vand.u32 4294901760, %v7619_v2 }
 0x23d   : > { %2871 = vmatpush.msrb.mxu0 %v7357_v41  ;;  %2687 = vmatpush.msra.mxu2 %v9505_v14  ;;  %v3130_v32 = vsub.f32 %v7597_v25, %v9506_v1  ;;  %v9507_v14 = vand.u32 4294901760, %v7253_v43  ;;  %v7677_v6 = vpop.f32.mrf.mxu1  ;;  %v3125_v50 = vand.u32 4294901760, %v3124_v4  ;;  %v7681_v1 = vsub.f32 %v5356_v54, %v7649_v61  ;;  %v5353_v4 = vld [vmem:[%s9321_s0 + $0x2e0] sm:$0xff] }
 0x23e   : > { %3108 = vmatpush.msra.mxu1 %v3107_v35  ;;  %2742 = vmatpush.msra.mxu3 %v7225_v23  ;;  %9508 = vst [vmem:[#allocation35_spill] sm:$0xff] %v7677_v6  ;;  %v9509_v35 = vand.u32 4294901760, %v7269_v3  ;;  %v2795_v43 = vsub.f32 %v7619_v2, %v9368_v34  ;;  %v9369_v3 = vand.u32 4294901760, %v7666_v22  ;;  %v9511_v54 = vand.u32 4294901760, %v7291_v8  ;;  %v7708_v6 = vpop.f32.mrf.mxu2 }
 0x23f   : > { %2874 = vmatpush.msrb.mxu0 %v7379_v47  ;;  %2852 = vmatmul.f32.gmra.mxu1 %v7586_v0  ;;  %9513 = vst [vmem:[#allocation36_spill] sm:$0xff] %v7708_v6  ;;  %v9598_v6 = vld [vmem:[#allocation20_spill] sm:$0xff] }
 0x240   : > { %2789 = vmatmul.f32.vlgmr.msra.gmra.mxu0 %v2788_v24  ;;  %2691 = vmatpush.msra.mxu2 %v9507_v14  ;;  %v7675_v24 = vand.u32 4294901760, %v5355_v12  ;;  %v9510_v14 = vand.u32 4294901760, %v7622_v7 }
 0x241   : > { %3114 = vmatpush.msra.mxu1 %v3113_v27  ;;  %2877 = vmatpush.msrb.mxu0 %v7404_v57  ;;  %v7692_v27 = vand.u32 4294901760, %v5354_v45 }
 0x242   : > { %2744 = vmatpush.msra.mxu3 %v7240_v42  ;;  %2695 = vmatpush.msra.mxu2 %v9509_v35  ;;  %v3136_v23 = vsub.f32 %v7622_v7, %v9510_v14  ;;  %v3131_v42 = vand.u32 4294901760, %v3130_v32  ;;  %v9512_v35 = vand.u32 4294901760, %v7641_v29  ;;  %v7706_v34 = vsub.f32 %v5355_v12, %v7675_v24  ;;  %v5352_v32 = vld [vmem:[%s9321_s0 + $0x2d8] sm:$0xff]  ;;  %v7715_v8 = vpop.f32.mrf.mxu3 }
 0x243   : > { %3120 = vmatpush.msra.mxu1 %v3119_v37  ;;  %2880 = vmatpush.msrb.mxu0 %v7435_v63  ;;  %9514 = vst [vmem:[#allocation37_spill] sm:$0xff] %v7715_v8  ;;  %v7717_v37 = vand.u32 4294901760, %v5353_v4  ;;  %v2796_v12 = vand.u32 4294901760, %v2795_v43  ;;  %v3148_v8 = vsub.f32 %v7666_v22, %v9369_v3  ;;  %v5350_v43 = vld [vmem:[%s9321_s0 + $0x2c8] sm:$0xff] }
 0x244   : > { %2746 = vmatpush.msra.mxu3 %v7255_v28  ;;  %2699 = vmatpush.msra.mxu2 %v9511_v54  ;;  %v3142_v14 = vsub.f32 %v7641_v29, %v9512_v35  ;;  %v3137_v54 = vand.u32 4294901760, %v3136_v23  ;;  %v7722_v35 = vsub.f32 %v5354_v45, %v7692_v27  ;;  %v9515_v28 = vand.u32 4294901760, %v7316_v49 }
 0x245   : > { %3126 = vmatpush.msra.mxu1 %v3125_v50  ;;  %2883 = vmatpush.msrb.mxu0 %v7448_v13  ;;  %v5351_v50 = vld [vmem:[%s9321_s0 + $0x2d0] sm:$0xff]  ;;  %v9517_v49 = vand.u32 4294901760, %v7541_v17 }
 0x246   : > { %2748 = vmatpush.msra.mxu3 %v7271_v16  ;;  %2703 = vmatpush.msra.mxu2 %v9515_v28  ;;  %v7732_v16 = vand.u32 4294901760, %v5352_v32  ;;  %v3143_v23 = vand.u32 4294901760, %v3142_v14  ;;  %v9518_v28 = vand.u32 4294901760, %v7681_v1  ;;  %v7750_v14 = vand.u32 4294901760, %v5351_v50 }
 0x247   : > { %3055 = vmatpush.msra.mxu0 %v7494_v5  ;;  %3132 = vmatpush.msra.mxu1 %v3131_v42  ;;  %v7739_v42 = vpop.f32.mrf.mxu0  ;;  %v9370_v45 = vand.u32 4294901760, %v7722_v35 }
 0x248   : > { %2750 = vmatpush.msra.mxu3 %v7300_v11  ;;  %2797 = vmatmul.f32.gmra.mxu0 %v2796_v12  ;;  %9516 = vst [vmem:[#allocation38_spill] sm:$0xff] %v7739_v42  ;;  %v3154_v3 = vsub.f32 %v7681_v1, %v9518_v28  ;;  %v7748_v11 = vsub.f32 %v5353_v4, %v7717_v37  ;;  %v9519_v12 = vand.u32 4294901760, %v7340_v44  ;;  %v7755_v42 = vpop.f32.mrf.mxu1  ;;  %v7762_v4 = vand.u32 4294901760, %v5350_v43 }
 0x249   : > { %2920 = vmatmul.f32.vlgmr.msrb.gmra.mxu1 %v9517_v49  ;;  %3057 = vmatpush.msra.mxu0 %v7521_v20  ;;  %9520 = vst [vmem:[#allocation39_spill] sm:$0xff] %v7755_v42  ;;  %v3149_v49 = vand.u32 4294901760, %v3148_v8  ;;  %v7760_v28 = vsub.f32 %v5352_v32, %v7732_v16  ;;  %v9522_v44 = vand.u32 4294901760, %v7706_v34  ;;  %v3670_v42 = vld [vmem:[#allocation2] sm:$0xe0] }
 0x24a   : > { %3138 = vmatpush.msra.mxu1 %v3137_v54  ;;  %2707 = vmatpush.msra.mxu2 %v9519_v12  ;;  %v9521_v54 = vand.u32 4294901760, %v7360_v40  ;;  %v3155_v32 = vand.u32 4294901760, %v3154_v3  ;;  %v9371_v8 = vand.u32 4294901760, %v7748_v11  ;;  %v9523_v40 = vand.u32 4294901760, %v7337_v56  ;;  %v7788_v3 = vpop.f32.mrf.mxu3 }
 0x24b   : > { %2752 = vmatpush.msra.mxu3 %v7322_v48  ;;  %3059 = vmatpush.msra.mxu0 %v7530_v19  ;;  %v3160_v12 = vsub.f32 %v7706_v34, %v9522_v44  ;;  %v5349_v48 = vld [vmem:[%s9321_s0 + $0x2c0] sm:$0xff]  ;;  %v7784_v44 = vpop.f32.mrf.mxu2  ;;  %9525 = vst [vmem:[#allocation41_spill] sm:$0xff] %v7788_v3  ;;  %v9526_v56 = vand.u32 4294901760, %v7357_v41  ;;  %v9529_v41 = vand.u32 4294901760, %v7379_v47  ;;  %v9532_v47 = vand.u32 4294901760, %v7404_v57 }
 0x24c   : > { %3144 = vmatpush.msra.mxu1 %v3143_v23  ;;  %2711 = vmatpush.msra.mxu2 %v9521_v54  ;;  %v7776_v23 = vsub.f32 %v5351_v50, %v7750_v14  ;;  %v3166_v54 = vsub.f32 %v7722_v35, %v9370_v45  ;;  %9524 = vst [vmem:[#allocation40_spill] sm:$0xff] %v7784_v44 }
 0x24d   : > { %2754 = vmatmul.f32.vlgmr.msra.gmra.mxu3 %v7369_v58  ;;  %2713 = vmatmul.f32.vlgmr.msra.gmra.mxu2 %v7369_v58  ;;  %v7791_v50 = vsub.f32 %v5350_v43, %v7762_v4 }
 0x24e   : > { %2984 = vmatpush.msrb.mxu3 %v7305_v51  ;;  %2943 = vmatpush.msrb.mxu2 %v9523_v40  ;;  %v7793_v51 = vand.u32 4294901760, %v5349_v48  ;;  %v3161_v40 = vand.u32 4294901760, %v3160_v12  ;;  %v9374_v45 = vand.u32 4294901760, %v7776_v23  ;;  %v3167_v43 = vand.u32 4294901760, %v3166_v54 }
 0x24f   : > { %3061 = vmatpush.msra.mxu0 %v7547_v31  ;;  %3150 = vmatpush.msra.mxu1 %v3149_v49  ;;  %v3172_v49 = vsub.f32 %v7748_v11, %v9371_v8  ;;  %v7805_v58 = vpop.f32.mrf.mxu0  ;;  %v9530_v12 = vand.u32 4294901760, %v7760_v28 }
 0x250   : > { %2986 = vmatpush.msrb.mxu3 %v7324_v46  ;;  %2947 = vmatpush.msrb.mxu2 %v9526_v56  ;;  %9527 = vst [vmem:[#allocation42_spill] sm:$0xff] %v7805_v58  ;;  %v9528_v46 = vand.u32 4294901760, %v7619_v2  ;;  %v9373_v56 = vand.u32 4294901760, %v7791_v50  ;;  %v7816_v8 = vsub.f32 %v5349_v48, %v7793_v51  ;;  %v7820_v54 = vpop.f32.mrf.mxu1 }
 0x251   : > { %3063 = vmatpush.msra.mxu0 %v7561_v59  ;;  %3156 = vmatpush.msra.mxu1 %v3155_v32  ;;  %v3178_v32 = vsub.f32 %v7760_v28, %v9530_v12  ;;  %9531 = vst [vmem:[#allocation43_spill] sm:$0xff] %v7820_v54 }
 0x252   : > { %2988 = vmatpush.msrb.mxu3 %v7342_v53  ;;  %2886 = vmatmul.f32.vlgmr.msrb.gmra.mxu0 %v7541_v17  ;;  %v3006_v53 = vld [vmem:[#allocation2] sm:$0xf0]  ;;  %v3039_v17 = vrot.slane %v7302_v30, 4  ;;  %v9372_v57 = vand.u32 4294901760, %v7816_v8  ;;  %v7842_v12 = vpop.f32.mrf.mxu3 }
 0x253   : > { %2926 = vmatmul.f32.gmra.mxu1 %v9528_v46  ;;  %2951 = vmatpush.msrb.mxu2 %v9529_v41  ;;  %v3173_v46 = vand.u32 4294901760, %v3172_v49  ;;  %v3184_v41 = vsub.f32 %v7776_v23, %v9374_v45  ;;  %v3038_v48 = vrot.slane %v3006_v53, 4  ;;  %v3179_v30 = vand.u32 4294901760, %v3178_v32  ;;  %9535 = vst [vmem:[#allocation45_spill] sm:$0xff] %v7842_v12  ;;  %v3008_v53 = vld [vmem:[#allocation2 + $0x20] sm:$0xf] }
 0x254   : > { %3065 = vmatpush.msra.mxu0 %v7588_v9  ;;  %3162 = vmatpush.msra.mxu1 %v3161_v40  ;;  %v9533_v40 = vand.u32 4294901760, %v7435_v63  ;;  %v9536_v32 = vand.u32 4294901760, %v7448_v13 }
 0x255   : > { %2990 = vmatpush.msrb.mxu3 %v7371_v10  ;;  %2955 = vmatpush.msrb.mxu2 %v9532_v47  ;;  %v3190_v10 = vsub.f32 %v7791_v50, %v9373_v56  ;;  %v3040_v49 = vsel %vm3037_vm5, %v3038_v48, %v3039_v17  ;;  %v9549_v56 = vand.u32 4294901760, %v7559_v18 }
 0x256   : > { %3067 = vmatpush.msra.mxu0 %v7601_v36  ;;  %3168 = vmatpush.msra.mxu1 %v3167_v43  ;;  %v7839_v43 = vpop.f32.mrf.mxu2  ;;  %v7851_v47 = vand.u32 4294901760, %v3040_v49 }
 0x257   : > { %2758 = vmatmul.f32.gmra.mxu3 %v7452_v39  ;;  %2717 = vmatmul.f32.gmra.mxu2 %v7452_v39  ;;  %9534 = vst [vmem:[#allocation44_spill] sm:$0xff] %v7839_v43  ;;  %v3185_v39 = vand.u32 4294901760, %v3184_v41  ;;  %v3191_v63 = vand.u32 4294901760, %v3190_v10  ;;  %v9555_v43 = vand.u32 4294901760, %v7666_v22 }
 0x258   : > { %2992 = vmatpush.msrb.mxu3 %v7406_v52  ;;  %2959 = vmatpush.msrb.mxu2 %v9533_v40  ;;  %v3196_v52 = vsub.f32 %v7816_v8, %v9372_v57  ;;  %v7860_v13 = vpop.f32.mrf.mxu1  ;;  %v7864_v48 = vsub.f32 %v3040_v49, %v7851_v47 }
 0x259   : > { %3069 = vmatpush.msra.mxu0 %v7634_v21  ;;  %3174 = vmatpush.msra.mxu1 %v3173_v46  ;;  %v7855_v46 = vpop.f32.mrf.mxu0  ;;  %9538 = vst [vmem:[#allocation47_spill] sm:$0xff] %v7860_v13 }
 0x25a   : > { %2994 = vmatpush.msrb.mxu3 %v7418_v62  ;;  %2963 = vmatpush.msrb.mxu2 %v9536_v32  ;;  %9537 = vst [vmem:[#allocation46_spill] sm:$0xff] %v7855_v46  ;;  %v3044_v62 = vrot.slane %v3008_v53, 4  ;;  %v3197_v41 = vand.u32 4294901760, %v3196_v52  ;;  %v9376_v10 = vand.u32 4294901760, %v7864_v48  ;;  %v7877_v40 = vpop.f32.mrf.mxu3  ;;  %v5369_v52 = vld [vmem:[%s9321_s0 + $0x360] sm:$0xff] }
 0x25b   : > { %3071 = vmatpush.msra.mxu0 %v7649_v61  ;;  %3180 = vmatpush.msra.mxu1 %v3179_v30  ;;  %9540 = vst [vmem:[#allocation49_spill] sm:$0xff] %v7877_v40 }
 0x25c   : > { %3268 = vmatpush.msra.mxu3 %v7494_v5  ;;  %3210 = vmatpush.msra.mxu2 %v7519_v55 }
 0x25d   : > { %2891 = vmatmul.f32.gmra.mxu0 %v7619_v2  ;;  %3186 = vmatpush.msra.mxu1 %v3185_v39  ;;  %v3045_v2 = vsel %vm3037_vm5, %v3039_v17, %v3044_v62  ;;  %v3089_v17 = vsub.f32 %v7864_v48, %v9376_v10 }
 0x25e   : > { %3073 = vmatpush.msra.mxu0 %v7675_v24  ;;  %3270 = vmatpush.msra.mxu3 %v7521_v20  ;;  %v7873_v30 = vpop.f32.mrf.mxu2  ;;  %v7881_v49 = vand.u32 4294901760, %v3045_v2 }
 0x25f   : > { %3213 = vmatpush.msra.mxu2 %v7545_v15  ;;  %3192 = vmatpush.msra.mxu1 %v3191_v63  ;;  %9539 = vst [vmem:[#allocation48_spill] sm:$0xff] %v7873_v30  ;;  %v3090_v53 = vand.u32 4294901760, %v3089_v17 }
 0x260   : > { %3075 = vmatpush.msra.mxu0 %v7692_v27  ;;  %3272 = vmatpush.msra.mxu3 %v7530_v19  ;;  %v7899_v39 = vpop.f32.mrf.mxu1 }
 0x261   : > { %2996 = vmatmul.f32.vlgmr.msrb.gmra.mxu3 %v7516_v26  ;;  %3216 = vmatpush.msra.mxu2 %v7559_v18  ;;  %9542 = vst [vmem:[#allocation51_spill] sm:$0xff] %v7899_v39  ;;  %v9550_v18 = vand.u32 4294901760, %v7579_v60 }
 0x262   : > { %2965 = vmatmul.f32.vlgmr.msrb.gmra.mxu2 %v7516_v26  ;;  %3077 = vmatpush.msra.mxu0 %v7717_v37  ;;  %v7887_v26 = vpop.f32.mrf.mxu0 }
 0x263   : > { %3198 = vmatpush.msra.mxu1 %v3197_v41  ;;  %3274 = vmatpush.msra.mxu3 %v7547_v31  ;;  %9541 = vst [vmem:[#allocation50_spill] sm:$0xff] %v7887_v26  ;;  %v9546_v41 = vand.u32 4294901760, %v7519_v55  ;;  %v9548_v55 = vand.u32 4294901760, %v7545_v15 }
 0x264   : > { %3200 = vmatmul.f32.vlgmr.msra.gmra.mxu1 %v7851_v47  ;;  %3219 = vmatpush.msra.mxu2 %v7579_v60  ;;  %v9551_v60 = vand.u32 4294901760, %v7597_v25 }
 0x265   : > { %3386 = vmatpush.msrb.mxu1 %v7494_v5  ;;  %3079 = vmatpush.msra.mxu0 %v7732_v16  ;;  %v7897_v5 = vsub.f32 %v3045_v2, %v7881_v49  ;;  %v7933_v2 = vand.u32 4294901760, %v5369_v52 }
 0x266   : > { %3276 = vmatpush.msra.mxu3 %v7561_v59  ;;  %3222 = vmatpush.msra.mxu2 %v7597_v25  ;;  %v7912_v63 = vpop.f32.mrf.mxu3 }
 0x267   : > { %3388 = vmatpush.msrb.mxu1 %v7521_v20  ;;  %3081 = vmatpush.msra.mxu0 %v7750_v14  ;;  %v5370_v20 = vld [vmem:[%s9321_s0 + $0x368] sm:$0xff]  ;;  %9544 = vst [vmem:[#allocation53_spill] sm:$0xff] %v7912_v63  ;;  %v7959_v45 = vsub.f32 %v5369_v52, %v7933_v2 }
 0x268   : > { %3278 = vmatpush.msra.mxu3 %v7588_v9  ;;  %3225 = vmatpush.msra.mxu2 %v7622_v7  ;;  %v7908_v32 = vpop.f32.mrf.mxu2  ;;  %v7921_v62 = vand.u32 4294901760, %v5370_v20  ;;  %v7943_v57 = vpop.f32.mrf.mxu1 }
 0x269   : > { %3390 = vmatpush.msrb.mxu1 %v7530_v19  ;;  %3083 = vmatpush.msra.mxu0 %v7762_v4  ;;  %9543 = vst [vmem:[#allocation52_spill] sm:$0xff] %v7908_v32  ;;  %v9375_v19 = vand.u32 4294901760, %v7897_v5 }
 0x26a   : > { %3280 = vmatpush.msra.mxu3 %v7601_v36  ;;  %3228 = vmatpush.msra.mxu2 %v7641_v29  ;;  %9547 = vst [vmem:[#allocation55_spill] sm:$0xff] %v7943_v57 }
 0x26b   : > { %3000 = vmatmul.f32.gmra.mxu3 %v7586_v0  ;;  %3392 = vmatpush.msrb.mxu1 %v7547_v31  ;;  %v5368_v31 = vld [vmem:[%s9321_s0 + $0x358] sm:$0xff]  ;;  %v3097_v17 = vsub.f32 %v7897_v5, %v9375_v19 }
 0x26c   : > { %2969 = vmatmul.f32.gmra.mxu2 %v7586_v0  ;;  %3085 = vmatpush.msra.mxu0 %v7793_v51  ;;  %v7928_v0 = vpop.f32.mrf.mxu0 }
 0x26d   : > { %3282 = vmatpush.msra.mxu3 %v7634_v21  ;;  %3091 = vmatmul.f32.vlgmr.msra.gmra.mxu0 %v3090_v53  ;;  %9545 = vst [vmem:[#allocation54_spill] sm:$0xff] %v7928_v0  ;;  %v5367_v53 = vld [vmem:[%s9321_s0 + $0x350] sm:$0xff] }
 0x26e   : > { %3204 = vmatmul.f32.gmra.mxu1 %v7881_v49  ;;  %3231 = vmatpush.msra.mxu2 %v7666_v22  ;;  %v7961_v15 = vand.u32 4294901760, %v5367_v53  ;;  %v9558_v22 = vand.u32 4294901760, %v7864_v48 }
 0x26f   : > { %3315 = vmatpush.msrb.mxu0 %v9546_v41  ;;  %3394 = vmatpush.msrb.mxu1 %v7561_v59  ;;  %v7949_v59 = vsub.f32 %v5370_v20, %v7921_v62  ;;  %v7951_v41 = vand.u32 4294901760, %v5368_v31  ;;  %v3098_v20 = vand.u32 4294901760, %v3097_v17  ;;  %v5365_v17 = vld [vmem:[%s9321_s0 + $0x340] sm:$0xff] }
 0x270   : > { %3284 = vmatpush.msra.mxu3 %v7649_v61  ;;  %3234 = vmatpush.msra.mxu2 %v7681_v1  ;;  %v7977_v52 = vpop.f32.mrf.mxu3  ;;  %v8003_v10 = vand.u32 4294901760, %v5365_v17 }
 0x271   : > { %3319 = vmatpush.msrb.mxu0 %v9548_v55  ;;  %3396 = vmatpush.msrb.mxu1 %v7588_v9  ;;  %v5366_v9 = vld [vmem:[%s9321_s0 + $0x348] sm:$0xff] }
 0x272   : > { %3286 = vmatpush.msra.mxu3 %v7675_v24  ;;  %3237 = vmatpush.msra.mxu2 %v7706_v34  ;;  %v7968_v55 = vpop.f32.mrf.mxu2  ;;  %v7980_v19 = vand.u32 4294901760, %v5366_v9  ;;  %v8029_v46 = vsub.f32 %v5365_v17, %v8003_v10 }
 0x273   : > { %3323 = vmatpush.msrb.mxu0 %v9549_v56  ;;  %3398 = vmatpush.msrb.mxu1 %v7601_v36  ;;  %v9377_v36 = vand.u32 4294901760, %v7949_v59  ;;  %v7975_v56 = vsub.f32 %v5368_v31, %v7951_v41  ;;  %v7990_v31 = vsub.f32 %v5367_v53, %v7961_v15  ;;  %v3007_v53 = vld [vmem:[#allocation2 + $0x8] sm:$0xf0] }
 0x274   : > { %3288 = vmatpush.msra.mxu3 %v7692_v27  ;;  %3240 = vmatpush.msra.mxu2 %v7722_v35 }
 0x275   : > { %3327 = vmatpush.msrb.mxu0 %v9550_v18  ;;  %3400 = vmatpush.msrb.mxu1 %v7634_v21  ;;  %v9552_v18 = vand.u32 4294901760, %v7622_v7  ;;  %v3478_v25 = vsub.f32 %v7949_v59, %v9377_v36  ;;  %v8010_v21 = vld [vmem:[#allocation2 + $0x18] sm:$0xff]  ;;  %v9553_v36 = vand.u32 4294901760, %v7641_v29  ;;  %v9556_v29 = vand.u32 4294901760, %v7975_v56 }
 0x276   : > { %3290 = vmatpush.msra.mxu3 %v7717_v37  ;;  %3099 = vmatmul.f32.gmra.mxu0 %v3098_v20  ;;  %v7994_v20 = vpop.f32.mrf.mxu0  ;;  %v3042_v7 = vrot.slane %v8010_v21, 4 }
 0x277   : > { %3243 = vmatpush.msra.mxu2 %v7748_v11  ;;  %3331 = vmatpush.msrb.mxu0 %v9551_v60  ;;  %v9554_v60 = vand.u32 4294901760, %v7959_v45  ;;  %v3479_v13 = vand.u32 4294901760, %v3478_v25 }
 0x278   : > { %3402 = vmatpush.msrb.mxu1 %v7649_v61  ;;  %3292 = vmatpush.msra.mxu3 %v7732_v16  ;;  %v8008_v61 = vsub.f32 %v5366_v9, %v7980_v19  ;;  %v3041_v9 = vrot.slane %v3007_v53, 4 }
 0x279   : > { %3246 = vmatpush.msra.mxu2 %v7760_v28  ;;  %3335 = vmatpush.msrb.mxu0 %v9552_v18  ;;  %v1877_v18 = vpop.f32.mrf.mxu1  ;;  %v3484_v12 = vsub.f32 %v7959_v45, %v9554_v60 }
 0x27a   : > { %3404 = vmatpush.msrb.mxu1 %v7675_v24  ;;  %3294 = vmatpush.msra.mxu3 %v7750_v14  ;;  %v9378_v24 = vand.u32 4294901760, %v7990_v31  ;;  %v3043_v60 = vsel %vm3037_vm5, %v3041_v9, %v3042_v7  ;;  %v3009_v9 = vld [vmem:[#allocation2 + $0x28] sm:$0xf] }
 0x27b   : > { %3249 = vmatpush.msra.mxu2 %v7776_v23  ;;  %3339 = vmatpush.msrb.mxu0 %v9553_v36  ;;  %v3490_v36 = vsub.f32 %v7975_v56, %v9556_v29  ;;  %v8043_v25 = vpop.f32.mrf.mxu3 }
 0x27c   : > { %3406 = vmatpush.msrb.mxu1 %v7692_v27  ;;  %3296 = vmatpush.msra.mxu3 %v7762_v4  ;;  %v3496_v17 = vsub.f32 %v7990_v31, %v9378_v24  ;;  %9559 = vst [vmem:[#allocation57_spill] sm:$0xff] %v8043_v25  ;;  %v9384_v27 = vand.u32 4294901760, %v8029_v46  ;;  %v9562_v24 = vand.u32 4294901760, %v7706_v34 }
 0x27d   : > { %3252 = vmatpush.msra.mxu2 %v7791_v50  ;;  %3343 = vmatpush.msrb.mxu0 %v9555_v43  ;;  %v8035_v53 = vpop.f32.mrf.mxu2  ;;  %v3485_v43 = vand.u32 4294901760, %v3484_v12  ;;  %v3491_v29 = vand.u32 4294901760, %v3490_v36  ;;  %v3050_v12 = vsel %vm143_vm1, %v3043_v60, 0  ;;  %v3046_v36 = vrot.slane %v3009_v9, 4 }
 0x27e   : > { %3408 = vmatpush.msrb.mxu1 %v7717_v37  ;;  %3298 = vmatpush.msra.mxu3 %v7793_v51  ;;  %9557 = vst [vmem:[#allocation56_spill] sm:$0xff] %v8035_v53  ;;  %v9560_v37 = vand.u32 4294901760, %v7681_v1  ;;  %v9563_v1 = vand.u32 4294901760, %v8008_v61  ;;  %v9565_v60 = vand.u32 4294901760, %v7722_v35  ;;  %v3508_v34 = vsub.f32 %v8029_v46, %v9384_v27 }
 0x27f   : > { %3255 = vmatpush.msra.mxu2 %v7816_v8  ;;  %3302 = vmatmul.f32.vlgmr.msra.gmra.mxu3 %v9558_v22  ;;  %v8050_v22 = vpop.f32.mrf.mxu0 }
 0x280   : > { %3347 = vmatpush.msrb.mxu0 %v9560_v37  ;;  %3410 = vmatpush.msrb.mxu1 %v7732_v16  ;;  %9561 = vst [vmem:[#allocation58_spill] sm:$0xff] %v8050_v22  ;;  %v3502_v16 = vsub.f32 %v8008_v61, %v9563_v1  ;;  %v8065_v37 = vand.u32 4294901760, %v3050_v12  ;;  %v5384_v1 = vld [vmem:[%s9321_s0 + $0x3d8] sm:$0xff] }
 0x281   : > { %3480 = vmatpush.msrb.mxu3 %v3479_v13  ;;  %3258 = vmatmul.f32.vlgmr.msra.gmra.mxu2 %v7864_v48  ;;  %v8060_v13 = vpop.f32.mrf.mxu1  ;;  %v3497_v48 = vand.u32 4294901760, %v3496_v17 }
 0x282   : > { %3437 = vmatpush.msrb.mxu2 %v7921_v62  ;;  %3351 = vmatpush.msrb.mxu0 %v9562_v24  ;;  %9564 = vst [vmem:[#allocation59_spill] sm:$0xff] %v8060_v13  ;;  %v9566_v24 = vand.u32 4294901760, %v7748_v11  ;;  %v3503_v35 = vand.u32 4294901760, %v3502_v16  ;;  %v8083_v17 = vsub.f32 %v3050_v12, %v8065_v37  ;;  %v5385_v11 = vld [vmem:[%s9321_s0 + $0x3e0] sm:$0xff] }
 0x283   : > { %3412 = vmatpush.msrb.mxu1 %v7750_v14  ;;  %3486 = vmatpush.msrb.mxu3 %v3485_v43  ;;  %v5386_v14 = vld [vmem:[%s9321_s0 + $0x3e8] sm:$0xff]  ;;  %v1878_v43 = vadd.f32 %v1877_v18, %v7994_v20  ;;  %v3509_v20 = vand.u32 4294901760, %v3508_v34  ;;  %v9568_v18 = vand.u32 4294901760, %v7760_v28  ;;  %v9569_v28 = vand.u32 4294901760, %v7776_v23 }
 0x284   : > { %3439 = vmatpush.msrb.mxu2 %v7933_v2  ;;  %3355 = vmatpush.msrb.mxu0 %v9565_v60  ;;  %v8085_v9 = vand.u32 4294901760, %v5386_v14  ;;  %v9597_v25 = vand.u32 4294901760, %v8083_v17 }
 0x285   : > { %3414 = vmatpush.msrb.mxu1 %v7762_v4  ;;  %3492 = vmatpush.msrb.mxu3 %v3491_v29  ;;  %v3047_v4 = vsel %vm3037_vm5, %v3042_v7, %v3046_v36  ;;  %v1937_v12 = vadd.f32 %v7968_v55, %v1878_v43  ;;  %v9382_v55 = vand.u32 4294901760, %v8083_v17  ;;  %v5382_v43 = vld [vmem:[%s9321_s0 + $0x3c8] sm:$0xff] }
 0x286   : > { %3441 = vmatpush.msrb.mxu2 %v7951_v41  ;;  %3359 = vmatpush.msrb.mxu0 %v9566_v24  ;;  %v8095_v7 = vpop.f32.mrf.mxu3  ;;  %v3052_v16 = vsel %vm143_vm1, %v3047_v4, 0  ;;  %v8113_v60 = vsub.f32 %v5386_v14, %v8085_v9  ;;  %v9570_v14 = vand.u32 4294901760, %v7791_v50 }
 0x287   : > { %3416 = vmatpush.msrb.mxu1 %v7793_v51  ;;  %3498 = vmatpush.msrb.mxu3 %v3497_v48  ;;  %v8090_v29 = vpop.f32.mrf.mxu2  ;;  %v9567_v51 = vand.u32 4294901760, %v7897_v5  ;;  %v8106_v48 = vand.u32 4294901760, %v5385_v11  ;;  %v2054_v36 = vpop.f32.mrf.mxu0  ;;  %v8118_v24 = vand.u32 4294901760, %v3052_v16  ;;  %v1982_v23 = vadd.f32 %v7977_v52, %v1937_v12 }
 0x288   : > { %3418 = vmatmul.f32.vlgmr.msrb.gmra.mxu1 %v7851_v47  ;;  %3443 = vmatpush.msrb.mxu2 %v7961_v15  ;;  %v9380_v50 = vand.u32 4294901760, %v8113_v60 }
 0x289   : > { %3648 = vmatpush.msra.mxu1 %v7921_v62  ;;  %3308 = vmatmul.f32.gmra.mxu3 %v9567_v51  ;;  %v2095_v34 = vpop.f32.mrf.mxu1  ;;  %v8130_v4 = vsub.f32 %v5385_v11, %v8106_v48  ;;  %v2055_v52 = vadd.f32 %v2054_v36, %v1982_v23  ;;  %v9571_v11 = vand.u32 4294901760, %v7816_v8  ;;  %v9573_v8 = vand.u32 4294901760, %v7949_v59 }
 0x28a   : > { %3363 = vmatpush.msrb.mxu0 %v9568_v18  ;;  %3504 = vmatpush.msrb.mxu3 %v3503_v35  ;;  %v5383_v35 = vld [vmem:[%s9321_s0 + $0x3d0] sm:$0xff]  ;;  %v8154_v18 = vand.u32 4294901760, %v5382_v43 }
 0x28b   : > { %3263 = vmatmul.f32.gmra.mxu2 %v7897_v5  ;;  %3650 = vmatpush.msra.mxu1 %v7933_v2  ;;  %v8116_v5 = vand.u32 4294901760, %v5384_v1  ;;  %v8141_v51 = vand.u32 4294901760, %v5383_v35  ;;  %v9379_v36 = vand.u32 4294901760, %v8130_v4 }
 0x28c   : > { %3445 = vmatpush.msrb.mxu2 %v7980_v19  ;;  %3367 = vmatpush.msrb.mxu0 %v9569_v28  ;;  %v2096_v28 = vadd.f32 %v2095_v34, %v2055_v52 }
 0x28d   : > { %3510 = vmatpush.msrb.mxu3 %v3509_v20  ;;  %3652 = vmatpush.msra.mxu1 %v7951_v41  ;;  %v8147_v20 = vsub.f32 %v3052_v16, %v8118_v24 }
 0x28e   : > { %3447 = vmatpush.msrb.mxu2 %v8003_v10  ;;  %3371 = vmatpush.msrb.mxu0 %v9570_v14  ;;  %v2135_v34 = vadd.f32 %v8090_v29, %v2096_v28 }
 0x28f   : > { %3570 = vmatpush.msra.mxu3 %v7921_v62  ;;  %3654 = vmatpush.msra.mxu1 %v7961_v15  ;;  %v3451_v62 = vsub.f32 %v8083_v17, %v9382_v55  ;;  %v9381_v23 = vand.u32 4294901760, %v8147_v20  ;;  %v9580_v55 = vand.u32 4294901760, %v7990_v31 }
 0x290   : > { %3532 = vmatpush.msra.mxu2 %v7949_v59  ;;  %3375 = vmatpush.msrb.mxu0 %v9571_v11  ;;  %v8165_v16 = vpop.f32.mrf.mxu3  ;;  %v8173_v59 = vsub.f32 %v5383_v35, %v8141_v51  ;;  %v8179_v11 = vpop.f32.mrf.mxu0 }
 0x291   : > { %3572 = vmatpush.msra.mxu3 %v7933_v2  ;;  %v8150_v2 = vsub.f32 %v5384_v1, %v8116_v5  ;;  %3377 = vmatmul.f32.vlgmr.msrb.gmra.mxu0 %v7851_v47  ;;  %v5381_v1 = vld [vmem:[%s9321_s0 + $0x3c0] sm:$0xff]  ;;  %9574 = vst [vmem:[#allocation61_spill] sm:$0xff] %v8165_v16  ;;  %v3452_v47 = vand.u32 4294901760, %v3451_v62  ;;  %v5380_v62 = vld [vmem:[%s9321_s0 + $0x3b8] sm:$0xff]  ;;  %v8194_v52 = vpop.f32.mrf.mxu1 }
 0x292   : > { %3535 = vmatpush.msra.mxu2 %v7959_v45  ;;  %3422 = vmatmul.f32.gmra.mxu1 %v7881_v49  ;;  %v8156_v12 = vpop.f32.mrf.mxu2  ;;  %9575 = vst [vmem:[#allocation62_spill] sm:$0xff] %v8179_v11  ;;  %v8186_v35 = vand.u32 4294901760, %v5381_v1  ;;  %v8205_v28 = vand.u32 4294901760, %v5380_v62 }
 0x293   : > { %9572 = vst [vmem:[#allocation60_spill] sm:$0xff] %v8156_v12  ;;  %3574 = vmatpush.msra.mxu3 %v7951_v41  ;;  %3607 = vmatpush.msra.mxu0 %v9573_v8  ;;  %v3769_v41 = vsub.f32 %v8113_v60, %v9380_v50  ;;  %v9383_v14 = vand.u32 4294901760, %v8150_v2  ;;  %v9576_v8 = vand.u32 4294901760, %v7959_v45  ;;  %v5379_v45 = vld [vmem:[%s9321_s0 + $0x3b0] sm:$0xff] }
 0x294   : > { %3656 = vmatpush.msra.mxu1 %v7980_v19  ;;  %3512 = vmatmul.f32.vlgmr.msrb.gmra.mxu3 %v8065_v37  ;;  %9577 = vst [vmem:[#allocation63_spill] sm:$0xff] %v8194_v52 }
 0x295   : > { %3538 = vmatpush.msra.mxu2 %v7975_v56  ;;  %3576 = vmatpush.msra.mxu3 %v7961_v15  ;;  %v8190_v15 = vsub.f32 %v5382_v43, %v8154_v18  ;;  %v3770_v29 = vand.u32 4294901760, %v3769_v41  ;;  %v9385_v43 = vand.u32 4294901760, %v8173_v59  ;;  %v3781_v50 = vsub.f32 %v8150_v2, %v9383_v14 }
 0x296   : > { %3453 = vmatmul.f32.vlgmr.msrb.gmra.mxu2 %v3452_v47  ;;  %3611 = vmatpush.msra.mxu0 %v9576_v8  ;;  %v3775_v47 = vsub.f32 %v8130_v4, %v9379_v36  ;;  %v9578_v8 = vand.u32 4294901760, %v7975_v56  ;;  %v3459_v36 = vsub.f32 %v8147_v20, %v9381_v23  ;;  %v8223_v41 = vsub.f32 %v5381_v1, %v8186_v35 }
 0x297   : > { %3658 = vmatpush.msra.mxu1 %v8003_v10  ;;  %3541 = vmatpush.msra.mxu2 %v7990_v31  ;;  %v2190_v23 = vadd.f32 %v8095_v7, %v2135_v34  ;;  %v8236_v1 = vsub.f32 %v5380_v62, %v8205_v28  ;;  %v5377_v31 = vld [vmem:[%s9321_s0 + $0x3a0] sm:$0xff]  ;;  %v3782_v34 = vand.u32 4294901760, %v3781_v50  ;;  %v9584_v62 = vand.u32 4294901760, %v8190_v15 }
 0x298   : > { %3578 = vmatpush.msra.mxu3 %v7980_v19  ;;  %3615 = vmatpush.msra.mxu0 %v9578_v8  ;;  %v5378_v19 = vld [vmem:[%s9321_s0 + $0x3a8] sm:$0xff]  ;;  %v8225_v8 = vand.u32 4294901760, %v5379_v45  ;;  %v3776_v14 = vand.u32 4294901760, %v3775_v47 }
 0x299   : > { %3931 = vmatpush.msrb.mxu1 %v8085_v9  ;;  %3544 = vmatpush.msra.mxu2 %v8008_v61  ;;  %9581 = vst [vmem:[#allocation65_spill] sm:$0xff] %v8236_v1  ;;  %v8238_v56 = vand.u32 4294901760, %v5378_v19  ;;  %v2263_v47 = vpop.f32.mrf.mxu3 }
 0x29a   : > { %3580 = vmatpush.msra.mxu3 %v8003_v10  ;;  %9579 = vst [vmem:[#allocation64_spill] sm:$0xff] %v8225_v8  ;;  %3619 = vmatpush.msra.mxu0 %v9580_v55  ;;  %v3787_v10 = vsub.f32 %v8173_v59, %v9385_v43  ;;  %v3460_v55 = vand.u32 4294901760, %v3459_v36  ;;  %v3793_v43 = vsub.f32 %v8190_v15, %v9584_v62  ;;  %v9586_v36 = vld [vmem:[#allocation12_spill] sm:$0xff]  ;;  %v2306_v62 = vpop.f32.mrf.mxu0 }
 0x29b   : > { %3933 = vmatpush.msrb.mxu1 %v8106_v48  ;;  %3547 = vmatpush.msra.mxu2 %v8029_v46  ;;  %v2228_v27 = vpop.f32.mrf.mxu2  ;;  %9582 = vst [vmem:[#allocation66_spill] sm:$0xff] %v8238_v56  ;;  %v8266_v11 = vsub.f32 %v5378_v19, %v8238_v56  ;;  %v9592_v19 = vand.u32 4294901760, %v8223_v41 }
 0x29c   : > { %3771 = vmatpush.msrb.mxu3 %v3770_v29  ;;  %v2229_v7 = vadd.f32 %v2228_v27, %v2190_v23  ;;  %3381 = vmatmul.f32.gmra.mxu0 %v7881_v49  ;;  %v9583_v29 = vand.u32 4294901760, %v8008_v61  ;;  %v8253_v27 = vsub.f32 %v5379_v45, %v8225_v8  ;;  %v5376_v49 = vld [vmem:[%s9321_s0 + $0x398] sm:$0xff]  ;;  %v9587_v23 = vld [vmem:[#allocation13_spill] sm:$0xff]  ;;  %v3788_v52 = vand.u32 4294901760, %v3787_v10 }
 0x29d   : > { %3935 = vmatpush.msrb.mxu1 %v8116_v5  ;;  %3718 = vmatpush.msrb.mxu2 %v8085_v9  ;;  %v597_v61 = vadd.f32 %v9587_v23, %v9586_v36  ;;  %v9386_v45 = vand.u32 4294901760, %v8236_v1  ;;  %9589 = vst [vmem:[#allocation13_spill] sm:$0xff] %v8266_v11  ;;  %v9590_v36 = vand.u32 4294901760, %v8029_v46  ;;  %v2337_v23 = vpop.f32.mrf.mxu1  ;;  %v8274_v16 = vand.u32 4294901760, %v5376_v49  ;;  %v5374_v46 = vld [vmem:[%s9321_s0 + $0x388] sm:$0xff] }
 0x29e   : > { %3660 = vmatmul.f32.vlgmr.msra.gmra.mxu1 %v8065_v37  ;;  %3623 = vmatpush.msra.mxu0 %v9583_v29  ;;  %9585 = vst [vmem:[#allocation67_spill] sm:$0xff] %v8253_v27  ;;  %v2264_v50 = vadd.f32 %v2263_v47, %v2229_v7  ;;  %v8262_v29 = vand.u32 4294901760, %v5377_v31  ;;  %v5375_v7 = vld [vmem:[%s9321_s0 + $0x390] sm:$0xff]  ;;  %v3799_v10 = vsub.f32 %v8223_v41, %v9592_v19 }
 0x29f   : > { %3516 = vmatmul.f32.gmra.mxu3 %v8118_v24  ;;  %3937 = vmatpush.msrb.mxu1 %v8141_v51  ;;  %9591 = vst [vmem:[#allocation68_spill] sm:$0xff] %v8274_v16  ;;  %v3805_v19 = vsub.f32 %v8236_v1, %v9386_v45 }
 0x2a0   : > { %9588 = vst [vmem:[#allocation12_spill] sm:$0xff] %v8262_v29  ;;  %3777 = vmatpush.msrb.mxu3 %v3776_v14  ;;  %3461 = vmatmul.f32.gmra.mxu2 %v3460_v55  ;;  %v2307_v47 = vadd.f32 %v2306_v62, %v2264_v50  ;;  %v3794_v14 = vand.u32 4294901760, %v3793_v43  ;;  %v9387_v55 = vand.u32 4294901760, %v8253_v27  ;;  %v8291_v43 = vand.u32 4294901760, %v5375_v7  ;;  %v9594_v62 = vld [vmem:[#allocation11_spill] sm:$0xff] }
 0x2a1   : > { %3627 = vmatpush.msra.mxu0 %v9590_v36  ;;  %3720 = vmatpush.msrb.mxu2 %v8106_v48  ;;  %v656_v36 = vadd.f32 %v9594_v62, %v597_v61  ;;  %v3800_v61 = vand.u32 4294901760, %v3799_v10  ;;  %v5392_v10 = vld [vmem:[%s9321_s0 + $0x418] sm:$0xff] }
 0x2a2   : > { %3783 = vmatpush.msrb.mxu3 %v3782_v34  ;;  %v8284_v50 = vadd.f32 %v2337_v23, %v2307_v47  ;;  %3939 = vmatpush.msrb.mxu1 %v8154_v18  ;;  %v8289_v34 = vsub.f32 %v5377_v31, %v8262_v29  ;;  %v5373_v23 = vld [vmem:[%s9321_s0 + $0x380] sm:$0xff]  ;;  %v8305_v31 = vsub.f32 %v5376_v49, %v8274_v16  ;;  %v8353_v63 = vand.u32 4294901760, %v5392_v10 }
 0x2a3   : > { %3873 = vmatpush.msrb.mxu0 %v8113_v60  ;;  %3722 = vmatpush.msrb.mxu2 %v8116_v5  ;;  %v3811_v62 = vsub.f32 %v8253_v27, %v9387_v55  ;;  %v8317_v47 = vsub.f32 %v5375_v7, %v8291_v43  ;;  %v8319_v49 = vand.u32 4294901760, %v5373_v23  ;;  %v9595_v55 = vld [vmem:[#allocation10_spill] sm:$0xff]  ;;  %v9596_v7 = vand.u32 4294901760, %v8266_v11 }
 0x2a4   : > { %9593 = vst [vmem:[#allocation69_spill] sm:$0xff] %v8284_v50  ;;  %3789 = vmatpush.msrb.mxu3 %v3788_v52  ;;  %3941 = vmatpush.msrb.mxu1 %v8186_v35  ;;  %v8307_v52 = vand.u32 4294901760, %v5374_v46  ;;  %v701_v12 = vadd.f32 %v9595_v55, %v656_v36  ;;  %v5371_v55 = vld [vmem:[%s9321_s0 + $0x370] sm:$0xff]  ;;  %v8384_v39 = vsub.f32 %v5392_v10, %v8353_v63 }
 0x2a5   : > { %3876 = vmatpush.msrb.mxu0 %v8130_v4  ;;  %3724 = vmatpush.msrb.mxu2 %v8141_v51  ;;  %v3817_v45 = vsub.f32 %v8266_v11, %v9596_v7  ;;  %v8343_v36 = vld [vmem:[#allocation2 + $0x10] sm:$0xff]  ;;  %v8368_v0 = vand.u32 4294901760, %v5371_v55  ;;  %v2639_v10 = vpop.f32.mrf.mxu1 }
 0x2a6   : > { %3795 = vmatpush.msrb.mxu3 %v3794_v14  ;;  %3943 = vmatpush.msrb.mxu1 %v8205_v28  ;;  %v5372_v14 = vld [vmem:[%s9321_s0 + $0x378] sm:$0xff]  ;;  %v8338_v13 = vsub.f32 %v5374_v46, %v8307_v52  ;;  %v5391_v7 = vld [vmem:[%s9321_s0 + $0x410] sm:$0xff]  ;;  %v774_v22 = vadd.f32 %v9598_v6, %v701_v12  ;;  %v3812_v46 = vand.u32 4294901760, %v3811_v62  ;;  %v8362_v6 = vsub.f32 %v5373_v23, %v8319_v49 }
 0x2a7   : > { %3879 = vmatpush.msrb.mxu0 %v8150_v2  ;;  %3664 = vmatmul.f32.gmra.mxu1 %v8118_v24  ;;  %v8351_v53 = vand.u32 4294901760, %v5372_v14  ;;  %v3701_v12 = vrot.slane %v3670_v42, 5  ;;  %v8370_v50 = vand.u32 4294901760, %v5391_v7  ;;  %v9600_v23 = vand.u32 4294901760, %v8305_v31 }
 0x2a8   : > { %3629 = vmatmul.f32.vlgmr.msra.gmra.mxu0 %v8065_v37  ;;  %3726 = vmatpush.msrb.mxu2 %v8154_v18  ;;  %v3806_v37 = vand.u32 4294901760, %v3805_v19  ;;  %v9599_v19 = vand.u32 4294901760, %v8289_v34  ;;  %v9601_v57 = vrot.slane %v8343_v36, 5  ;;  %v8407_v58 = vsub.f32 %v5371_v55, %v8368_v0 }
 0x2a9   : > { %3584 = vmatmul.f32.vlgmr.msra.gmra.mxu3 %v9597_v25  ;;  %3882 = vmatpush.msrb.mxu0 %v8173_v59  ;;  %v2537_v25 = vpop.f32.mrf.mxu3  ;;  %v3829_v42 = vsub.f32 %v8305_v31, %v9600_v23  ;;  %v8387_v26 = vsub.f32 %v5372_v14, %v8351_v53  ;;  %v5389_v23 = vld [vmem:[%s9321_s0 + $0x400] sm:$0xff] }
 0x2aa   : > { %3801 = vmatpush.msrb.mxu3 %v3800_v61  ;;  %3945 = vmatpush.msrb.mxu1 %v8225_v8  ;;  %v3823_v32 = vsub.f32 %v8289_v34, %v9599_v19  ;;  %v5390_v61 = vld [vmem:[%s9321_s0 + $0x408] sm:$0xff]  ;;  %v2428_v62 = vpop.f32.mrf.mxu2  ;;  %v3703_v40 = vsel %vm190_vm0, %v3701_v12, %v9601_v57  ;;  %v8404_v19 = vsub.f32 %v5391_v7, %v8370_v50 }
 0x2ab   : > { %3550 = vmatmul.f32.vlgmr.msra.gmra.mxu2 %v8083_v17  ;;  %3885 = vmatpush.msrb.mxu0 %v8190_v15  ;;  %v3818_v17 = vand.u32 4294901760, %v3817_v45  ;;  %v9602_v45 = vld [vmem:[#allocation21_spill] sm:$0xff]  ;;  %v8389_v54 = vand.u32 4294901760, %v5390_v61  ;;  %v2538_v14 = vadd.f32 %v2537_v25, %v2428_v62  ;;  %v8414_v62 = vand.u32 4294901760, %v5389_v23 }
 0x2ac   : > { %3728 = vmatpush.msrb.mxu2 %v8186_v35  ;;  %3807 = vmatpush.msrb.mxu3 %v3806_v37  ;;  %v2595_v37 = vpop.f32.mrf.mxu0  ;;  %v815_v30 = vadd.f32 %v9602_v45, %v774_v22  ;;  %v3824_v57 = vand.u32 4294901760, %v3823_v32  ;;  %v9603_v22 = vand.u32 4294901760, %v8317_v47  ;;  %v8401_v45 = vand.u32 4294901760, %v3703_v40 }
 0x2ad   : > { %3947 = vmatpush.msrb.mxu1 %v8238_v56  ;;  %3888 = vmatpush.msrb.mxu0 %v8223_v41  ;;  %v3830_v32 = vand.u32 4294901760, %v3829_v42  ;;  %v8422_v12 = vsub.f32 %v5390_v61, %v8389_v54  ;;  %v5388_v42 = vld [vmem:[%s9321_s0 + $0x3f8] sm:$0xff]  ;;  %v2596_v44 = vadd.f32 %v2595_v37, %v2538_v14 }
 0x2ae   : > { %3730 = vmatpush.msrb.mxu2 %v8205_v28  ;;  %3813 = vmatpush.msrb.mxu3 %v3812_v46  ;;  %v3835_v46 = vsub.f32 %v8317_v47, %v9603_v22  ;;  %v9604_v22 = vand.u32 4294901760, %v8338_v13  ;;  %v8435_v61 = vsub.f32 %v3703_v40, %v8401_v45 }
 0x2af   : > { %3949 = vmatpush.msrb.mxu1 %v8262_v29  ;;  %3891 = vmatpush.msrb.mxu0 %v8236_v1  ;;  %v8461_v1 = vadd.f32 %v2639_v10, %v2596_v44  ;;  %v2645_v10 = vpop.f32.mrf.mxu1 }
 0x2b0   : > { %3732 = vmatpush.msrb.mxu2 %v8225_v8  ;;  %3819 = vmatpush.msrb.mxu3 %v3818_v17  ;;  %v3841_v25 = vsub.f32 %v8338_v13, %v9604_v22  ;;  %v9605_v17 = vand.u32 4294901760, %v8147_v20  ;;  %v9606_v22 = vld [vmem:[#allocation18_spill] sm:$0xff]  ;;  %v9611_v8 = vld [vmem:[#allocation19_spill] sm:$0xff] }
 0x2b1   : > { %3951 = vmatpush.msrb.mxu1 %v8274_v16  ;;  %3633 = vmatmul.f32.gmra.mxu0 %v8118_v24  ;;  %v3672_v24 = vld [vmem:[#allocation2 + $0x20] sm:$0x1f]  ;;  %v854_v3 = vadd.f32 %v9606_v22, %v815_v30  ;;  %v9609_v22 = vand.u32 4294901760, %v8384_v39  ;;  %v9610_v30 = vand.u32 4294901760, %v8387_v26 }
 0x2b2   : > { %3734 = vmatpush.msrb.mxu2 %v8238_v56  ;;  %3590 = vmatmul.f32.gmra.mxu3 %v9605_v17  ;;  %v3836_v56 = vand.u32 4294901760, %v3835_v46  ;;  %v9607_v17 = vand.u32 4294901760, %v8362_v6  ;;  %v3842_v37 = vand.u32 4294901760, %v3841_v25  ;;  %v8444_v46 = vsub.f32 %v5389_v23, %v8414_v62 }
 0x2b3   : > { %3825 = vmatpush.msrb.mxu3 %v3824_v57  ;;  %3894 = vmatpush.msrb.mxu0 %v8253_v27  ;;  %v2541_v55 = vpop.f32.mrf.mxu3  ;;  %v5387_v57 = vld [vmem:[%s9321_s0 + $0x3f0] sm:$0xff]  ;;  %v3707_v14 = vrot.slane %v3672_v24, 5  ;;  %v909_v24 = vadd.f32 %v9611_v8, %v854_v3  ;;  %v9614_v3 = vand.u32 4294901760, %v8407_v58 }
 0x2b4   : > { %v3847_v7 = vsub.f32 %v8362_v6, %v9607_v17  ;;  %3953 = vmatpush.msrb.mxu1 %v8291_v43  ;;  %3555 = vmatmul.f32.gmra.mxu2 %v8147_v20  ;;  %v8446_v20 = vand.u32 4294901760, %v5388_v42  ;;  %v4141_v17 = vsub.f32 %v8384_v39, %v9609_v22  ;;  %v2600_v27 = vpop.f32.mrf.mxu0  ;;  %v9613_v22 = vand.u32 4294901760, %v8404_v19 }
 0x2b5   : > { %3736 = vmatpush.msrb.mxu2 %v8262_v29  ;;  %3831 = vmatpush.msrb.mxu3 %v3830_v32  ;;  %v2436_v40 = vpop.f32.mrf.mxu2  ;;  %v3853_v32 = vsub.f32 %v8387_v26, %v9610_v30  ;;  %v3751_v30 = vand.u32 4294901760, %v8435_v61  ;;  %v9395_v44 = vand.u32 4294901760, %v8444_v46 }
 0x2b6   : > { %9608 = vst [vmem:[#allocation11_spill] sm:$0xff] %v8446_v20  ;;  %3897 = vmatpush.msrb.mxu0 %v8266_v11  ;;  %3955 = vmatpush.msrb.mxu1 %v8307_v52  ;;  %v2542_v23 = vadd.f32 %v2541_v55, %v2436_v40  ;;  %v3848_v29 = vand.u32 4294901760, %v3847_v7  ;;  %v8459_v11 = vand.u32 4294901760, %v5387_v57  ;;  %v4147_v55 = vsub.f32 %v8404_v19, %v9613_v22 }
 0x2b7   : > { %3738 = vmatpush.msrb.mxu2 %v8274_v16  ;;  %3837 = vmatpush.msrb.mxu3 %v3836_v56  ;;  %v3859_v56 = vsub.f32 %v8407_v58, %v9614_v3  ;;  %v948_v7 = vadd.f32 %v7485_v33, %v909_v24  ;;  %v9615_v40 = vrot.slane %v8343_v36, 5  ;;  %v8479_v16 = vsub.f32 %v5388_v42, %v8446_v20 }
 0x2b8   : > { %9612 = vst [vmem:[#allocation10_spill] sm:$0xff] %v8459_v11  ;;  %3900 = vmatpush.msrb.mxu0 %v8289_v34  ;;  %3957 = vmatpush.msrb.mxu1 %v8319_v49  ;;  %v2601_v8 = vadd.f32 %v2600_v27, %v2542_v23  ;;  %v4142_v27 = vand.u32 4294901760, %v4141_v17  ;;  %v3854_v23 = vand.u32 4294901760, %v3853_v32  ;;  %v9616_v33 = vand.u32 4294901760, %v8422_v12  ;;  %v9617_v32 = vld [vmem:[#allocation26_spill] sm:$0xff] }
 0x2b9   : > { %3740 = vmatpush.msrb.mxu2 %v8291_v43  ;;  %3843 = vmatpush.msrb.mxu3 %v3842_v37  ;;  %v3708_v25 = vsel %vm190_vm0, %v9615_v40, %v3707_v14  ;;  %v8488_v24 = vsub.f32 %v5387_v57, %v8459_v11  ;;  %v4148_v42 = vand.u32 4294901760, %v4147_v55  ;;  %v3860_v14 = vand.u32 4294901760, %v3859_v56  ;;  %v3671_v40 = vld [vmem:[#allocation2 + $0x8] sm:$0xe0] }
 0x2ba   : > { %3903 = vmatpush.msrb.mxu0 %v8305_v31  ;;  %3959 = vmatpush.msrb.mxu1 %v8351_v53  ;;  %v4153_v37 = vsub.f32 %v8422_v12, %v9616_v33  ;;  %v3752_v22 = vsub.f32 %v8435_v61, %v3751_v30  ;;  %v8493_v17 = vand.u32 4294901760, %v3708_v25  ;;  %v983_v3 = vadd.f32 %v9617_v32, %v948_v7 }
 0x2bb   : > { %3742 = vmatpush.msrb.mxu2 %v8307_v52  ;;  %3849 = vmatpush.msrb.mxu3 %v3848_v29  ;;  %v4159_v29 = vsub.f32 %v8444_v46, %v9395_v44  ;;  %v3705_v56 = vrot.slane %v8010_v21, 5  ;;  %v9397_v7 = vand.u32 4294901760, %v8488_v24  ;;  %v3704_v32 = vrot.slane %v3671_v40, 5  ;;  %v9618_v44 = vld [vmem:[#allocation27_spill] sm:$0xff] }
 0x2bc   : > { %3906 = vmatpush.msrb.mxu0 %v8317_v47  ;;  %3961 = vmatpush.msrb.mxu1 %v8368_v0  ;;  %v4154_v55 = vand.u32 4294901760, %v4153_v37  ;;  %v8506_v33 = vsub.f32 %v3708_v25, %v8493_v17  ;;  %v1026_v57 = vadd.f32 %v9618_v44, %v983_v3  ;;  %v8514_v37 = vadd.f32 %v2645_v10, %v2601_v8  ;;  %v5408_v44 = vld [vmem:[%s9321_s0 + $0x498] sm:$0xff]  ;;  %v3673_v8 = vld [vmem:[#allocation2 + $0x28] sm:$0x1f] }
 0x2bd   : > { %3744 = vmatpush.msrb.mxu2 %v8319_v49  ;;  %3965 = vmatmul.f32.vlgmr.msrb.gmra.mxu1 %v3751_v30  ;;  %v3753_v30 = vand.u32 4294901760, %v3752_v22  ;;  %v4160_v21 = vand.u32 4294901760, %v4159_v29  ;;  %v3706_v25 = vsel %vm190_vm0, %v3704_v32, %v3705_v56  ;;  %v9620_v10 = vand.u32 4294901760, %v8113_v60  ;;  %v8531_v3 = vpop.f32.mrf.mxu0  ;;  %v9621_v29 = vld [vmem:[#allocation28_spill] sm:$0xff] }
 0x2be   : > { %4143 = vmatpush.msra.mxu1 %v4142_v27  ;;  %3855 = vmatpush.msrb.mxu3 %v3854_v23  ;;  %v9619_v27 = vand.u32 4294901760, %v8479_v16  ;;  %v3759_v22 = vand.u32 4294901760, %v8506_v33  ;;  %v1057_v40 = vadd.f32 %v9621_v29, %v1026_v57  ;;  %v9622_v32 = vand.u32 4294901760, %v8130_v4  ;;  %v5406_v4 = vld [vmem:[%s9321_s0 + $0x488] sm:$0xff] }
 0x2bf   : > { %3909 = vmatpush.msrb.mxu0 %v8338_v13  ;;  %3746 = vmatpush.msrb.mxu2 %v8351_v53  ;;  %v3709_v60 = vrot.slane %v3673_v8, 5  ;;  %v5405_v8 = vld [vmem:[%s9321_s0 + $0x480] sm:$0xff] }
 0x2c0   : > { %4149 = vmatpush.msra.mxu1 %v4148_v42  ;;  %3861 = vmatpush.msrb.mxu3 %v3860_v14  ;;  %v4165_v23 = vsub.f32 %v8479_v16, %v9619_v27  ;;  %v4171_v42 = vsub.f32 %v8488_v24, %v9397_v7  ;;  %v8525_v14 = vpop.f32.mrf.mxu1  ;;  %v5407_v27 = vld [vmem:[%s9321_s0 + $0x490] sm:$0xff] }
 0x2c1   : > { %3912 = vmatpush.msrb.mxu0 %v8362_v6  ;;  %3748 = vmatpush.msrb.mxu2 %v8368_v0 }
 0x2c2   : > { %3863 = vmatmul.f32.vlgmr.msrb.gmra.mxu3 %v8401_v45  ;;  %4155 = vmatpush.msra.mxu1 %v4154_v55  ;;  %v3713_v55 = vsel %vm143_vm1, %v3706_v25, 0  ;;  %v9625_v25 = vand.u32 4294901760, %v8150_v2  ;;  %v9628_v2 = vand.u32 4294901760, %v8173_v59 }
 0x2c3   : > { %4049 = vmatpush.msra.mxu3 %v8085_v9  ;;  %3754 = vmatmul.f32.vlgmr.msrb.gmra.mxu2 %v3753_v30  ;;  %v4166_v9 = vand.u32 4294901760, %v4165_v23  ;;  %v8536_v30 = vand.u32 4294901760, %v5408_v44  ;;  %v8549_v23 = vand.u32 4294901760, %v3713_v55 }
 0x2c4   : > { %3915 = vmatpush.msrb.mxu0 %v8387_v26  ;;  %3978 = vmatpush.msra.mxu2 %v9620_v10  ;;  %v9623_v10 = vld [vmem:[#allocation33_spill] sm:$0xff] }
 0x2c5   : > { %4051 = vmatpush.msra.mxu3 %v8106_v48  ;;  %4161 = vmatpush.msra.mxu1 %v4160_v21  ;;  %v1111_v57 = vadd.f32 %v9623_v10, %v1057_v40  ;;  %v4172_v48 = vand.u32 4294901760, %v4171_v42  ;;  %v3760_v21 = vsub.f32 %v8506_v33, %v3759_v22  ;;  %9624 = vst [vmem:[#allocation20_spill] sm:$0xff] %v8549_v23  ;;  %v8559_v42 = vand.u32 4294901760, %v5407_v27 }
 0x2c6   : > { %3918 = vmatpush.msrb.mxu0 %v8407_v58  ;;  %3982 = vmatpush.msra.mxu2 %v9622_v32  ;;  %v8575_v40 = vsub.f32 %v3713_v55, %v8549_v23  ;;  %v8589_v10 = vand.u32 4294901760, %v5405_v8  ;;  %v8592_v55 = vpop.f32.mrf.mxu0 }
 0x2c7   : > { %3921 = vmatmul.f32.vlgmr.msrb.gmra.mxu0 %v8435_v61  ;;  %3971 = vmatmul.f32.gmra.mxu1 %v3759_v22  ;;  %v8557_v61 = vsub.f32 %v5408_v44, %v8536_v30  ;;  %v9627_v22 = vld [vmem:[#allocation34_spill] sm:$0xff]  ;;  %v8570_v44 = vand.u32 4294901760, %v5406_v4 }
 0x2c8   : > { %4053 = vmatpush.msra.mxu3 %v8116_v5  ;;  %4100 = vmatpush.msra.mxu0 %v8353_v63  ;;  %v3710_v5 = vsel %vm190_vm0, %v3705_v56, %v3709_v60  ;;  %v1216_v29 = vadd.f32 %v9627_v22, %v1111_v57  ;;  %v5404_v56 = vld [vmem:[%s9321_s0 + $0x478] sm:$0xff]  ;;  %v8587_v60 = vsub.f32 %v5407_v27, %v8559_v42  ;;  %v9630_v57 = vand.u32 4294901760, %v8190_v15  ;;  %v5403_v27 = vld [vmem:[%s9321_s0 + $0x470] sm:$0xff] }
 0x2c9   : > { %4167 = vmatpush.msra.mxu1 %v4166_v9  ;;  %3986 = vmatpush.msra.mxu2 %v9625_v25  ;;  %9626 = vst [vmem:[#allocation21_spill] sm:$0xff] %v8557_v61  ;;  %v9396_v59 = vand.u32 4294901760, %v8557_v61  ;;  %v8583_v9 = vpop.f32.mrf.mxu1  ;;  %v3715_v32 = vsel %vm143_vm1, %v3710_v5, 0  ;;  %v9633_v15 = vand.u32 4294901760, %v8223_v41  ;;  %v8622_v22 = vsub.f32 %v5405_v8, %v8589_v10  ;;  %v9639_v5 = vld [vmem:[#allocation64_spill] sm:$0xff] }
 0x2ca   : > { %4055 = vmatpush.msra.mxu3 %v8141_v51  ;;  %4102 = vmatpush.msra.mxu0 %v8370_v50  ;;  %v3761_v51 = vand.u32 4294901760, %v3760_v21  ;;  %9629 = vst [vmem:[#allocation18_spill] sm:$0xff] %v8587_v60  ;;  %v8601_v21 = vand.u32 4294901760, %v5404_v56  ;;  %v8609_v25 = vand.u32 4294901760, %v3715_v32  ;;  %vm4364_vm0 = vcmask 1041408  }
 0x2cb   : > { %4173 = vmatpush.msra.mxu1 %v4172_v48  ;;  %3990 = vmatpush.msra.mxu2 %v9628_v2  ;;  %v8599_v48 = vsub.f32 %v5406_v4, %v8570_v44  ;;  %v4433_v4 = vsub.f32 %v8557_v61, %v9396_v59  ;;  %9634 = vst [vmem:[#allocation27_spill] sm:$0xff] %v8622_v22  ;;  %v8626_v2 = vand.u32 4294901760, %v5403_v27 }
 0x2cc   : > { %3867 = vmatmul.f32.gmra.mxu3 %v8493_v17  ;;  %4104 = vmatpush.msra.mxu0 %v8389_v54  ;;  %9632 = vst [vmem:[#allocation26_spill] sm:$0xff] %v8609_v25  ;;  %v8635_v8 = vsub.f32 %v5404_v56, %v8601_v21 }
 0x2cd   : > { %4233 = vmatpush.msrb.mxu1 %v8353_v63  ;;  %4057 = vmatpush.msra.mxu3 %v8154_v18  ;;  %v1275_v18 = vadd.f32 %v7659_v38, %v1216_v29  ;;  %9631 = vst [vmem:[#allocation19_spill] sm:$0xff] %v8599_v48  ;;  %v9400_v38 = vand.u32 4294901760, %v8575_v40 }
 0x2ce   : > { %3762 = vmatmul.f32.gmra.mxu2 %v3761_v51  ;;  %4106 = vmatpush.msra.mxu0 %v8414_v62  ;;  %v9635_v51 = vld [vmem:[#allocation35_spill] sm:$0xff]  ;;  %9638 = vst [vmem:[#allocation28_spill] sm:$0xff] %v8635_v8 }
 0x2cf   : > { %4235 = vmatpush.msrb.mxu1 %v8370_v50  ;;  %3994 = vmatpush.msra.mxu2 %v9630_v57  ;;  %v9636_v57 = vld [vmem:[#allocation65_spill] sm:$0xff] }
 0x2d0   : > { %4059 = vmatpush.msra.mxu3 %v8186_v35  ;;  %v5402_v35 = vld [vmem:[%s9321_s0 + $0x468] sm:$0xff]  ;;  %3926 = vmatmul.f32.gmra.mxu0 %v8506_v33  ;;  %v2714_v29 = vpop.f32.mrf.mxu2  ;;  %v1320_v33 = vadd.f32 %v9635_v51, %v1275_v18  ;;  %v8645_v18 = vsub.f32 %v3715_v32, %v8609_v25  ;;  %v9640_v51 = vld [vmem:[#allocation40_spill] sm:$0xff]  ;;  %v9650_v32 = vand.u32 4294901760, %v8622_v22 }
 0x2d1   : > { %4237 = vmatpush.msrb.mxu1 %v8389_v54  ;;  %3998 = vmatpush.msra.mxu2 %v9633_v15  ;;  %v2715_v41 = vadd.f32 %v2714_v29, %v8461_v1  ;;  %v9637_v15 = vand.u32 4294901760, %v9636_v57  ;;  %v8637_v7 = vand.u32 4294901760, %v5402_v35  ;;  %v4114_v1 = vsub.f32 %v8575_v40, %v9400_v38  ;;  %v5401_v29 = vld [vmem:[%s9321_s0 + $0x460] sm:$0xff] }
 0x2d2   : > { %4061 = vmatpush.msra.mxu3 %v8205_v28  ;;  %4108 = vmatpush.msra.mxu0 %v8446_v20  ;;  %v2755_v28 = vpop.f32.mrf.mxu3  ;;  %v1393_v57 = vadd.f32 %v9640_v51, %v1320_v33  ;;  %v5400_v33 = vld [vmem:[%s9321_s0 + $0x458] sm:$0xff]  ;;  %v8677_v61 = vand.u32 4294901760, %v5401_v29 }
 0x2d3   : > { %4175 = vmatmul.f32.vlgmr.msra.gmra.mxu1 %v8549_v23  ;;  %4002 = vmatpush.msra.mxu2 %v9637_v15  ;;  %v2756_v56 = vadd.f32 %v2755_v28, %v2715_v41  ;;  %v9641_v15 = vld [vmem:[#allocation67_spill] sm:$0xff]  ;;  %v9643_v23 = vand.u32 4294901760, %v8587_v60  ;;  %v8661_v41 = vsub.f32 %v5403_v27, %v8626_v2  ;;  %v9645_v28 = vld [vmem:[#allocation13_spill] sm:$0xff]  ;;  %v8675_v27 = vsub.f32 %v5402_v35, %v8637_v7 }
 0x2d4   : > { %4239 = vmatpush.msrb.mxu1 %v8414_v62  ;;  %4063 = vmatpush.msra.mxu3 %v9639_v5  ;;  %v9642_v59 = vand.u32 4294901760, %v9641_v15  ;;  %v4434_v5 = vand.u32 4294901760, %v4433_v4  ;;  %v9644_v4 = vld [vmem:[#allocation66_spill] sm:$0xff]  ;;  %v9646_v51 = vand.u32 4294901760, %v9645_v28  ;;  %v9648_v28 = vld [vmem:[#allocation41_spill] sm:$0xff]  ;;  %v4451_v35 = vsub.f32 %v8622_v22, %v9650_v32 }
 0x2d5   : > { %4110 = vmatpush.msra.mxu0 %v8459_v11  ;;  %v4439_v38 = vsub.f32 %v8587_v60, %v9643_v23  ;;  %v9647_v23 = vand.u32 4294901760, %v8599_v48  ;;  %v2921_v60 = vpop.f32.mrf.mxu1 }
 0x2d6   : > { %4006 = vmatpush.msra.mxu2 %v9642_v59  ;;  %4241 = vmatpush.msrb.mxu1 %v8446_v20  ;;  %v2791_v59 = vadd.f32 %v8531_v3, %v2756_v56  ;;  %v4115_v3 = vand.u32 4294901760, %v4114_v1  ;;  %v9649_v20 = vld [vmem:[#allocation12_spill] sm:$0xff]  ;;  %v9651_v1 = vand.u32 4294901760, %v8289_v34  ;;  %v8702_v56 = vsub.f32 %v5401_v29, %v8677_v61  ;;  %v5398_v34 = vld [vmem:[%s9321_s0 + $0x448] sm:$0xff] }
 0x2d7   : > { %4195 = vmatpush.msrb.mxu0 %v8384_v39  ;;  %4065 = vmatpush.msra.mxu3 %v9644_v4  ;;  %v4445_v15 = vsub.f32 %v8599_v48, %v9647_v23  ;;  %v2887_v4 = vpop.f32.mrf.mxu0  ;;  %v4440_v23 = vand.u32 4294901760, %v4439_v38  ;;  %v8687_v48 = vand.u32 4294901760, %v5400_v33  ;;  %v4452_v29 = vand.u32 4294901760, %v4451_v35 }
 0x2d8   : > { %4010 = vmatpush.msra.mxu2 %v9646_v51  ;;  %4243 = vmatpush.msrb.mxu1 %v8459_v11  ;;  %v1434_v51 = vadd.f32 %v9648_v28, %v1393_v57  ;;  %v5399_v11 = vld [vmem:[%s9321_s0 + $0x450] sm:$0xff] }
 0x2d9   : > { %4198 = vmatpush.msrb.mxu0 %v8404_v19  ;;  %4067 = vmatpush.msra.mxu3 %v9649_v20  ;;  %v9652_v20 = vld [vmem:[#allocation68_spill] sm:$0xff]  ;;  %v4446_v38 = vand.u32 4294901760, %v4445_v15  ;;  %v8710_v15 = vand.u32 4294901760, %v5399_v11  ;;  %v9655_v28 = vld [vmem:[#allocation42_spill] sm:$0xff] }
 0x2da   : > { %4435 = vmatpush.msra.mxu1 %v4434_v5  ;;  %4014 = vmatpush.msra.mxu2 %v9651_v1  ;;  %v9653_v5 = vand.u32 4294901760, %v8635_v8  ;;  %v2718_v1 = vpop.f32.mrf.mxu2  ;;  %v1473_v57 = vadd.f32 %v9655_v28, %v1434_v51  ;;  %v8728_v51 = vand.u32 4294901760, %v5398_v34  ;;  %v9416_v28 = vand.u32 4294901760, %v8702_v56 }
 0x2db   : > { %4201 = vmatpush.msrb.mxu0 %v8422_v12  ;;  %4069 = vmatpush.msra.mxu3 %v9652_v20  ;;  %v9654_v20 = vand.u32 4294901760, %v8305_v31  ;;  %v2759_v31 = vpop.f32.mrf.mxu3 }
 0x2dc   : > { %4116 = vmatmul.f32.vlgmr.msra.gmra.mxu0 %v4115_v3  ;;  %v4457_v32 = vsub.f32 %v8635_v8, %v9653_v5  ;;  %4179 = vmatmul.f32.gmra.mxu1 %v8609_v25  ;;  %v2719_v3 = vadd.f32 %v2718_v1, %v8514_v37  ;;  %v2850_v5 = vadd.f32 %v8525_v14, %v2791_v59  ;;  %v9656_v8 = vand.u32 4294901760, %v8645_v18 }
 0x2dd   : > { %4018 = vmatpush.msra.mxu2 %v9654_v20  ;;  %4441 = vmatpush.msra.mxu1 %v4440_v23  ;;  %v8720_v25 = vsub.f32 %v5400_v33, %v8687_v48  ;;  %v9657_v37 = vand.u32 4294901760, %v8317_v47  ;;  %v9658_v14 = vand.u32 4294901760, %v8661_v41  ;;  %v5397_v23 = vld [vmem:[%s9321_s0 + $0x440] sm:$0xff]  ;;  %v9660_v1 = vand.u32 4294901760, %v8338_v13  ;;  %v2927_v13 = vpop.f32.mrf.mxu1 }
 0x2de   : > { %4204 = vmatpush.msrb.mxu0 %v8444_v46  ;;  %v4122_v22 = vsub.f32 %v8645_v18, %v9656_v8  ;;  %4071 = vmatpush.msra.mxu3 %v8291_v43  ;;  %v2760_v8 = vadd.f32 %v2759_v31, %v2719_v3  ;;  %v2888_v35 = vadd.f32 %v2887_v4, %v2850_v5  ;;  %v4458_v33 = vand.u32 4294901760, %v4457_v32  ;;  %v5396_v4 = vld [vmem:[%s9321_s0 + $0x438] sm:$0xff]  ;;  %v9661_v3 = vld [vmem:[#allocation8_spill] sm:$0xff]  ;;  %v9662_v5 = vld [vmem:[#allocation9_spill] sm:$0xff] }
 0x2df   : > { %4022 = vmatpush.msra.mxu2 %v9657_v37  ;;  %v4463_v59 = vsub.f32 %v8661_v41, %v9658_v14  ;;  %4447 = vmatpush.msra.mxu1 %v4446_v38  ;;  %v9659_v43 = vand.u32 4294901760, %v8675_v27  ;;  %v8742_v20 = vsub.f32 %v5399_v11, %v8710_v15  ;;  %v593_v31 = vadd.f32 %v9662_v5, %v9661_v3  ;;  %v9663_v11 = vld [vmem:[#allocation43_spill] sm:$0xff] }
 0x2e0   : > { %4207 = vmatpush.msrb.mxu0 %v8479_v16  ;;  %4073 = vmatpush.msra.mxu3 %v8307_v52  ;;  %v2799_v38 = vadd.f32 %v8592_v55, %v2760_v8  ;;  %v2922_v32 = vadd.f32 %v2921_v60, %v2888_v35  ;;  %v9415_v52 = vand.u32 4294901760, %v8720_v25  ;;  %v8752_v37 = vand.u32 4294901760, %v5397_v23  ;;  %v2892_v8 = vpop.f32.mrf.mxu0 }
 0x2e1   : > { %v4469_v47 = vsub.f32 %v8675_v27, %v9659_v43  ;;  %4026 = vmatpush.msra.mxu2 %v9660_v1  ;;  %4453 = vmatpush.msra.mxu1 %v4452_v29  ;;  %v1528_v14 = vadd.f32 %v9663_v11, %v1473_v57  ;;  %v4123_v43 = vand.u32 4294901760, %v4122_v22  ;;  %v4464_v55 = vand.u32 4294901760, %v4463_v59  ;;  %v5395_v29 = vld [vmem:[%s9321_s0 + $0x430] sm:$0xff]  ;;  %v5394_v59 = vld [vmem:[%s9321_s0 + $0x428] sm:$0xff] }
 0x2e2   : > { %4210 = vmatpush.msrb.mxu0 %v8488_v24  ;;  %4075 = vmatpush.msra.mxu3 %v8319_v49  ;;  %v8758_v60 = vsub.f32 %v5398_v34, %v8728_v51  ;;  %v9664_v35 = vand.u32 4294901760, %v8362_v6  ;;  %v4475_v49 = vsub.f32 %v8702_v56, %v9416_v28  ;;  %v8768_v57 = vand.u32 4294901760, %v5396_v4  ;;  %v9667_v11 = vld [vmem:[#allocation50_spill] sm:$0xff] }
 0x2e3   : > { %4459 = vmatpush.msra.mxu1 %v4458_v33  ;;  %v4470_v22 = vand.u32 4294901760, %v4469_v47  ;;  %v4486_v34 = vand.u32 4294901760, %v8742_v20  ;;  %v9665_v33 = vld [vmem:[#allocation7_spill] sm:$0xff]  ;;  %v9666_v6 = vand.u32 4294901760, %v8575_v40  ;;  %v4481_v3 = vsub.f32 %v8720_v25, %v9415_v52 }
 0x2e4   : > { %4382 = vmatpush.msra.mxu0 %v8536_v30  ;;  %4030 = vmatpush.msra.mxu2 %v9664_v35  ;;  %v651_v1 = vadd.f32 %v9665_v33, %v593_v31  ;;  %v8785_v47 = vand.u32 4294901760, %v5395_v29  ;;  %v9668_v31 = vand.u32 4294901760, %v8387_v26  ;;  %v4492_v35 = vand.u32 4294901760, %v8758_v60 }
 0x2e5   : > { %4077 = vmatpush.msra.mxu3 %v8351_v53  ;;  %4124 = vmatmul.f32.gmra.mxu0 %v4123_v43  ;;  %v8783_v53 = vsub.f32 %v5397_v23, %v8752_v37  ;;  %v2966_v5 = vpop.f32.mrf.mxu2  ;;  %v1567_v43 = vadd.f32 %v9667_v11, %v1528_v14  ;;  %v4476_v23 = vand.u32 4294901760, %v4475_v49  ;;  %v8795_v52 = vsub.f32 %v5396_v4, %v8768_v57  ;;  %v2997_v14 = vpop.f32.mrf.mxu3  ;;  %v9670_v4 = vld [vmem:[#allocation6_spill] sm:$0xff]  ;;  %v9671_v11 = vld [vmem:[#allocation51_spill] sm:$0xff] }
 0x2e6   : > { %4247 = vmatmul.f32.vlgmr.msrb.gmra.mxu1 %v9666_v6  ;;  %4384 = vmatpush.msra.mxu0 %v8559_v42  ;;  %v2967_v33 = vadd.f32 %v2966_v5, %v2922_v32  ;;  %v2854_v6 = vadd.f32 %v8583_v9, %v2799_v38  ;;  %v8797_v28 = vand.u32 4294901760, %v5394_v59  ;;  %v9669_v26 = vand.u32 4294901760, %v8407_v58  ;;  %v3201_v5 = vpop.f32.mrf.mxu1 }
 0x2e7   : > { %4465 = vmatpush.msra.mxu1 %v4464_v55  ;;  %4034 = vmatpush.msra.mxu2 %v9668_v31  ;;  %v4487_v32 = vsub.f32 %v8742_v20, %v4486_v34  ;;  %v695_v55 = vadd.f32 %v9670_v4, %v651_v1  ;;  %v4482_v49 = vand.u32 4294901760, %v4481_v3  ;;  %v4498_v58 = vand.u32 4294901760, %v8783_v53 }
 0x2e8   : > { %4079 = vmatpush.msra.mxu3 %v8368_v0  ;;  %4386 = vmatpush.msra.mxu0 %v8570_v44  ;;  %v5393_v0 = vld [vmem:[%s9321_s0 + $0x420] sm:$0xff]  ;;  %v8807_v9 = vadd.f32 %v2997_v14, %v2967_v33  ;;  %v2893_v38 = vadd.f32 %v2892_v8, %v2854_v6  ;;  %v1602_v31 = vadd.f32 %v9671_v11, %v1567_v43  ;;  %v9672_v33 = vand.u32 4294901760, %v8384_v39  ;;  %v9678_v11 = vld [vmem:[#allocation17_spill] sm:$0xff] }
 0x2e9   : > { %4471 = vmatpush.msra.mxu1 %v4470_v22  ;;  %4038 = vmatpush.msra.mxu2 %v9669_v26  ;;  %v8814_v22 = vsub.f32 %v5395_v29, %v8785_v47  ;;  %v4493_v8 = vsub.f32 %v8758_v60, %v4492_v35  ;;  %v4504_v29 = vand.u32 4294901760, %v8795_v52  ;;  %v8826_v3 = vsub.f32 %v5394_v59, %v8797_v28  ;;  %v9673_v39 = vld [vmem:[#allocation16_spill] sm:$0xff] }
 0x2ea   : > { %4081 = vmatmul.f32.vlgmr.msra.gmra.mxu3 %v8401_v45  ;;  %4040 = vmatmul.f32.vlgmr.msra.gmra.mxu2 %v8401_v45  ;;  %v3092_v1 = vpop.f32.mrf.mxu0  ;;  %v2928_v45 = vadd.f32 %v2927_v13, %v2893_v38  ;;  %v8828_v43 = vand.u32 4294901760, %v5393_v0  ;;  %v770_v6 = vadd.f32 %v9673_v39, %v695_v55  ;;  %v9674_v14 = vld [vmem:[#allocation48_spill] sm:$0xff]  ;;  %v9675_v13 = vand.u32 4294901760, %v8404_v19 }
 0x2eb   : > { %4311 = vmatpush.msrb.mxu3 %v8353_v63  ;;  %4270 = vmatpush.msrb.mxu2 %v9672_v33  ;;  %v8830_v63 = vadd.f32 %v3201_v5, %v3092_v1  ;;  %v1645_v26 = vadd.f32 %v9674_v14, %v1602_v31  ;;  %v4488_v38 = vand.u32 4294901760, %v4487_v32  ;;  %v4499_v59 = vsub.f32 %v8783_v53, %v4498_v58  ;;  %v4333_v55 = vld [vmem:[#allocation2] sm:$0xc0]  ;;  %v9679_v33 = vld [vmem:[#allocation49_spill] sm:$0xff] }
 0x2ec   : > { %4388 = vmatpush.msra.mxu0 %v8589_v10  ;;  %4477 = vmatpush.msra.mxu1 %v4476_v23  ;;  %v9419_v23 = vand.u32 4294901760, %v8814_v22  ;;  %v4494_v4 = vand.u32 4294901760, %v4493_v8  ;;  %v9677_v19 = vand.u32 4294901760, %v8422_v12  ;;  %v4505_v32 = vsub.f32 %v8795_v52, %v4504_v29 }
 0x2ed   : > { %4313 = vmatpush.msrb.mxu3 %v8370_v50  ;;  %4274 = vmatpush.msrb.mxu2 %v9675_v13  ;;  %v9676_v50 = vand.u32 4294901760, %v8645_v18  ;;  %v8853_v5 = vsub.f32 %v5393_v0, %v8828_v43  ;;  %v811_v31 = vadd.f32 %v9678_v11, %v770_v6  ;;  %v1676_v8 = vadd.f32 %v9679_v33, %v1645_v26  ;;  %v9681_v6 = vld [vmem:[#allocation69_spill] sm:$0xff]  ;;  %v9685_v33 = vld [vmem:[#allocation10_spill] sm:$0xff] }
 0x2ee   : > { %4390 = vmatpush.msra.mxu0 %v8601_v21  ;;  %4483 = vmatpush.msra.mxu1 %v4482_v49  ;;  %v9418_v49 = vand.u32 4294901760, %v8826_v3  ;;  %v9680_v1 = vand.u32 4294901760, %v8444_v46  ;;  %v4500_v39 = vand.u32 4294901760, %v4499_v59  ;;  %v4365_v0 = vrot.slane %v4333_v55, 6  ;;  %v3001_v14 = vpop.f32.mrf.mxu3  ;;  %v3205_v59 = vpop.f32.mrf.mxu1 }
 0x2ef   : > { %4315 = vmatpush.msrb.mxu3 %v8389_v54  ;;  %4213 = vmatmul.f32.vlgmr.msrb.gmra.mxu0 %v8575_v40  ;;  %v4366_v54 = vrot.slane %v8343_v36, 6  ;;  %v2970_v40 = vpop.f32.mrf.mxu2  ;;  %v4511_v36 = vsub.f32 %v8814_v22, %v9419_v23  ;;  %v2341_v26 = vadd.f32 %v9681_v6, %v1676_v8  ;;  %v9686_v8 = vand.u32 4294901760, %v8488_v24 }
 0x2f0   : > { %4253 = vmatmul.f32.gmra.mxu1 %v9676_v50  ;;  %4278 = vmatpush.msrb.mxu2 %v9677_v19  ;;  %v2971_v12 = vadd.f32 %v2970_v40, %v2928_v45  ;;  %v4517_v46 = vsub.f32 %v8826_v3, %v9418_v49  ;;  %v9417_v45 = vand.u32 4294901760, %v8853_v5  ;;  %v9682_v50 = vld [vmem:[#allocation14_spill] sm:$0xff]  ;;  %v9683_v19 = vld [vmem:[#allocation11_spill] sm:$0xff]  ;;  %v9684_v40 = vand.u32 4294901760, %v8479_v16 }
 0x2f1   : > { %4392 = vmatpush.msra.mxu0 %v8626_v2  ;;  %4489 = vmatpush.msra.mxu1 %v4488_v38  ;;  %v4367_v38 = vsel %vm4364_vm0, %v4365_v0, %v4366_v54  ;;  %v9687_v0 = vld [vmem:[#allocation15_spill] sm:$0xff]  ;;  %v9720_v23 = vand.u32 4294901760, %v8720_v25 }
 0x2f2   : > { %4317 = vmatpush.msrb.mxu3 %v8414_v62  ;;  %4282 = vmatpush.msrb.mxu2 %v9680_v1  ;;  %v3002_v13 = vadd.f32 %v3001_v14, %v2971_v12  ;;  %v4506_v62 = vand.u32 4294901760, %v4505_v32  ;;  %v4512_v32 = vand.u32 4294901760, %v4511_v36  ;;  %v4335_v12 = vld [vmem:[#allocation2 + $0x20] sm:$0x3f]  ;;  %v4523_v16 = vsub.f32 %v8853_v5, %v9417_v45  ;;  %v9689_v36 = vld [vmem:[#allocation22_spill] sm:$0xff] }
 0x2f3   : > { %4394 = vmatpush.msra.mxu0 %v8637_v7  ;;  %4495 = vmatpush.msra.mxu1 %v4494_v4  ;;  %v3100_v55 = vpop.f32.mrf.mxu0  ;;  %v846_v4 = vadd.f32 %v9682_v50, %v811_v31  ;;  %v4518_v31 = vand.u32 4294901760, %v4517_v46  ;;  %v8890_v1 = vand.u32 4294901760, %v4367_v38  ;;  %v4371_v24 = vrot.slane %v4335_v12, 6  ;;  %v9692_v46 = vld [vmem:[#allocation19_spill] sm:$0xff]  ;;  %v9697_v12 = vld [vmem:[#allocation25_spill] sm:$0xff] }
 0x2f4   : > { %4085 = vmatmul.f32.gmra.mxu3 %v8493_v17  ;;  %4044 = vmatmul.f32.gmra.mxu2 %v8493_v17  ;;  %v8878_v11 = vadd.f32 %v3002_v13, %v2341_v26  ;;  %v8880_v17 = vadd.f32 %v3205_v59, %v3100_v55  ;;  %v9690_v26 = vld [vmem:[#allocation18_spill] sm:$0xff]  ;;  %v4524_v13 = vand.u32 4294901760, %v4523_v16  ;;  %v9693_v55 = vld [vmem:[#allocation23_spill] sm:$0xff]  ;;  %v5414_v16 = vld [vmem:[%s9321_s0 + $0x4c8] sm:$0xff] }
 0x2f5   : > { %4319 = vmatpush.msrb.mxu3 %v9683_v19  ;;  %4286 = vmatpush.msrb.mxu2 %v9684_v40  ;;  %v905_v14 = vadd.f32 %v9687_v0, %v846_v4  ;;  %v4372_v59 = vsel %vm4364_vm0, %v4366_v54, %v4371_v24  ;;  %v9694_v4 = vld [vmem:[#allocation27_spill] sm:$0xff]  ;;  %v9695_v54 = vld [vmem:[#allocation24_spill] sm:$0xff] }
 0x2f6   : > { %4396 = vmatpush.msra.mxu0 %v8677_v61  ;;  %4501 = vmatpush.msra.mxu1 %v4500_v39  ;;  %v9688_v39 = vld [vmem:[#allocation21_spill] sm:$0xff]  ;;  %v8915_v19 = vand.u32 4294901760, %v4372_v59 }
 0x2f7   : > { %4321 = vmatpush.msrb.mxu3 %v9685_v33  ;;  %4290 = vmatpush.msrb.mxu2 %v9686_v8  ;;  %v943_v6 = vadd.f32 %v9689_v36, %v905_v14  ;;  %v9698_v14 = vld [vmem:[#allocation26_spill] sm:$0xff]  ;;  %v9699_v36 = vld [vmem:[#allocation29_spill] sm:$0xff] }
 0x2f8   : > { %4398 = vmatpush.msra.mxu0 %v8687_v48  ;;  %4507 = vmatpush.msra.mxu1 %v4506_v62  ;;  %v8901_v62 = vsub.f32 %v4367_v38, %v8890_v1 }
 0x2f9   : > { %4595 = vmatpush.msra.mxu3 %v8536_v30  ;;  %4537 = vmatpush.msra.mxu2 %v9688_v39  ;;  %v977_v50 = vadd.f32 %v9693_v55, %v943_v6 }
 0x2fa   : > { %4218 = vmatmul.f32.gmra.mxu0 %v8645_v18  ;;  %4513 = vmatpush.msra.mxu1 %v4512_v32  ;;  %v9691_v18 = vld [vmem:[#allocation20_spill] sm:$0xff]  ;;  %v4415_v38 = vand.u32 4294901760, %v8901_v62 }
 0x2fb   : > { %4400 = vmatpush.msra.mxu0 %v8710_v15  ;;  %4597 = vmatpush.msra.mxu3 %v8559_v42  ;;  %v1022_v40 = vadd.f32 %v9695_v54, %v977_v50  ;;  %v9696_v32 = vld [vmem:[#allocation28_spill] sm:$0xff]  ;;  %v9701_v50 = vld [vmem:[#allocation30_spill] sm:$0xff] }
 0x2fc   : > { %4540 = vmatpush.msra.mxu2 %v9690_v26  ;;  %4519 = vmatpush.msra.mxu1 %v4518_v31  ;;  %v4416_v33 = vsub.f32 %v8901_v62, %v4415_v38 }
 0x2fd   : > { %4402 = vmatpush.msra.mxu0 %v8728_v51  ;;  %4599 = vmatpush.msra.mxu3 %v8570_v44  ;;  %v1053_v31 = vadd.f32 %v9697_v12, %v1022_v40 }
 0x2fe   : > { %4323 = vmatmul.f32.vlgmr.msrb.gmra.mxu3 %v9691_v18  ;;  %4543 = vmatpush.msra.mxu2 %v9692_v46 }
 0x2ff   : > { %4292 = vmatmul.f32.vlgmr.msrb.gmra.mxu2 %v9691_v18  ;;  %4404 = vmatpush.msra.mxu0 %v8752_v37  ;;  %v1103_v6 = vadd.f32 %v9699_v36, %v1053_v31  ;;  %v8951_v18 = vand.u32 4294901760, %v5414_v16  ;;  %v5411_v31 = vld [vmem:[%s9321_s0 + $0x4b0] sm:$0xff]  ;;  %v8991_v36 = vld [vmem:[#allocation2 + $0x18] sm:$0xff] }
 0x300   : > { %4525 = vmatpush.msra.mxu1 %v4524_v13  ;;  %4601 = vmatpush.msra.mxu3 %v8589_v10  ;;  %v5413_v13 = vld [vmem:[%s9321_s0 + $0x4c0] sm:$0xff] }
 0x301   : > { %4527 = vmatmul.f32.vlgmr.msra.gmra.mxu1 %v8890_v1  ;;  %4546 = vmatpush.msra.mxu2 %v9694_v4  ;;  %v8961_v55 = vand.u32 4294901760, %v5413_v13  ;;  %v1212_v54 = vadd.f32 %v9701_v50, %v1103_v6  ;;  %v4369_v6 = vrot.slane %v8991_v36, 6 }
 0x302   : > { %4713 = vmatpush.msrb.mxu1 %v8536_v30  ;;  %4406 = vmatpush.msra.mxu0 %v8768_v57  ;;  %v8930_v30 = vsub.f32 %v4372_v59, %v8915_v19  ;;  %v3303_v0 = vpop.f32.mrf.mxu3  ;;  %v9700_v59 = vand.u32 4294901760, %v9688_v39  ;;  %v8973_v39 = vsub.f32 %v5414_v16, %v8951_v18 }
 0x303   : > { %4603 = vmatpush.msra.mxu3 %v8601_v21  ;;  %4549 = vmatpush.msra.mxu2 %v9696_v32 }
 0x304   : > { %4715 = vmatpush.msrb.mxu1 %v8559_v42  ;;  %4408 = vmatpush.msra.mxu0 %v8785_v47  ;;  %v3259_v8 = vpop.f32.mrf.mxu2 }
 0x305   : > { %4605 = vmatpush.msra.mxu3 %v8626_v2  ;;  %4552 = vmatpush.msra.mxu2 %v8661_v41  ;;  %v3260_v42 = vadd.f32 %v3259_v8, %v8830_v63  ;;  %v4423_v63 = vand.u32 4294901760, %v8930_v30  ;;  %v9703_v8 = vld [vmem:[#allocation54_spill] sm:$0xff] }
 0x306   : > { %4717 = vmatpush.msrb.mxu1 %v8570_v44  ;;  %4410 = vmatpush.msra.mxu0 %v8797_v28  ;;  %v4417_v44 = vand.u32 4294901760, %v4416_v33  ;;  %v9702_v33 = vand.u32 4294901760, %v9690_v26 }
 0x307   : > { %4607 = vmatpush.msra.mxu3 %v8637_v7  ;;  %4555 = vmatpush.msra.mxu2 %v8675_v27  ;;  %v3304_v24 = vadd.f32 %v3303_v0, %v3260_v42  ;;  %v4424_v40 = vsub.f32 %v8930_v30, %v4423_v63  ;;  %v9704_v42 = vld [vmem:[#allocation55_spill] sm:$0xff]  ;;  %v9705_v0 = vand.u32 4294901760, %v9692_v46  ;;  %v5410_v46 = vld [vmem:[%s9321_s0 + $0x4a8] sm:$0xff] }
 0x308   : > { %4327 = vmatmul.f32.gmra.mxu3 %v9698_v14  ;;  %4719 = vmatpush.msrb.mxu1 %v8589_v10  ;;  %v5412_v10 = vld [vmem:[%s9321_s0 + $0x4b8] sm:$0xff]  ;;  %v1874_v12 = vadd.f32 %v9704_v42, %v9703_v8  ;;  %v9708_v42 = vand.u32 4294901760, %v9694_v4  ;;  %v5409_v4 = vld [vmem:[%s9321_s0 + $0x4a0] sm:$0xff] }
 0x309   : > { %4296 = vmatmul.f32.gmra.mxu2 %v9698_v14  ;;  %4412 = vmatpush.msra.mxu0 %v8828_v43 }
 0x30a   : > { %4609 = vmatpush.msra.mxu3 %v8677_v61  ;;  %4418 = vmatmul.f32.vlgmr.msra.gmra.mxu0 %v4417_v44  ;;  %v4334_v44 = vld [vmem:[#allocation2 + $0x8] sm:$0xc0] }
 0x30b   : > { %4531 = vmatmul.f32.gmra.mxu1 %v8915_v19  ;;  %4558 = vmatpush.msra.mxu2 %v8702_v56 }
 0x30c   : > { %4642 = vmatpush.msrb.mxu0 %v9700_v59  ;;  %4721 = vmatpush.msrb.mxu1 %v8601_v21  ;;  %v8975_v21 = vand.u32 4294901760, %v5412_v10  ;;  %v9706_v59 = vld [vmem:[#allocation31_spill] sm:$0xff] }
 0x30d   : > { %4611 = vmatpush.msra.mxu3 %v8687_v48  ;;  %4561 = vmatpush.msra.mxu2 %v8720_v25  ;;  %v1270_v50 = vadd.f32 %v9706_v59, %v1212_v54  ;;  %v9005_v54 = vand.u32 4294901760, %v8973_v39 }
 0x30e   : > { %4646 = vmatpush.msrb.mxu0 %v9702_v33  ;;  %4723 = vmatpush.msrb.mxu1 %v8626_v2  ;;  %v3264_v26 = vpop.f32.mrf.mxu2  ;;  %v8988_v2 = vsub.f32 %v5413_v13, %v8961_v55  ;;  %v3378_v14 = vpop.f32.mrf.mxu0  ;;  %v9707_v33 = vld [vmem:[#allocation52_spill] sm:$0xff] }
 0x30f   : > { %4613 = vmatpush.msra.mxu3 %v8710_v15  ;;  %4564 = vmatpush.msra.mxu2 %v8742_v20  ;;  %v3265_v16 = vadd.f32 %v3264_v26, %v8880_v17  ;;  %v1932_v8 = vadd.f32 %v9707_v33, %v1874_v12  ;;  %v3309_v17 = vpop.f32.mrf.mxu3  ;;  %v3379_v13 = vadd.f32 %v3378_v14, %v3304_v24  ;;  %v3419_v12 = vpop.f32.mrf.mxu1  ;;  %v9007_v26 = vand.u32 4294901760, %v5411_v31  ;;  %v9722_v20 = vld [vmem:[#allocation57_spill] sm:$0xff] }
 0x310   : > { %4650 = vmatpush.msrb.mxu0 %v9705_v0  ;;  %4725 = vmatpush.msrb.mxu1 %v8637_v7  ;;  %v4425_v7 = vand.u32 4294901760, %v4424_v40  ;;  %v9010_v0 = vsub.f32 %v5412_v10, %v8975_v21  ;;  %v4368_v24 = vrot.slane %v4334_v44, 6  ;;  %v9020_v59 = vand.u32 4294901760, %v8988_v2 }
 0x311   : > { %4615 = vmatpush.msra.mxu3 %v8728_v51  ;;  %4567 = vmatpush.msra.mxu2 %v8758_v60  ;;  %v3310_v40 = vadd.f32 %v3309_v17, %v3265_v16  ;;  %v3420_v14 = vadd.f32 %v3419_v12, %v3379_v13  ;;  %v9022_v10 = vand.u32 4294901760, %v5410_v46  ;;  %v9710_v16 = vld [vmem:[#allocation32_spill] sm:$0xff]  ;;  %v9711_v17 = vld [vmem:[#allocation53_spill] sm:$0xff]  ;;  %v4805_v13 = vsub.f32 %v8973_v39, %v9005_v54  ;;  %v9713_v12 = vld [vmem:[#allocation58_spill] sm:$0xff] }
 0x312   : > { %4654 = vmatpush.msrb.mxu0 %v9708_v42  ;;  %4727 = vmatpush.msrb.mxu1 %v8677_v61  ;;  %v9709_v61 = vand.u32 4294901760, %v9696_v32  ;;  %v1314_v33 = vadd.f32 %v9710_v16, %v1270_v50  ;;  %v4370_v44 = vsel %vm4364_vm0, %v4368_v24, %v4369_v6  ;;  %v9712_v32 = vand.u32 4294901760, %v8661_v41  ;;  %v4336_v42 = vld [vmem:[#allocation2 + $0x28] sm:$0x3f]  ;;  %v9714_v41 = vld [vmem:[#allocation36_spill] sm:$0xff]  ;;  %v9723_v60 = vld [vmem:[#allocation39_spill] sm:$0xff] }
 0x313   : > { %4617 = vmatpush.msra.mxu3 %v8752_v37  ;;  %4426 = vmatmul.f32.gmra.mxu0 %v4425_v7  ;;  %v1976_v7 = vadd.f32 %v9711_v17, %v1932_v8  ;;  %v9037_v50 = vand.u32 4294901760, %v9010_v0  ;;  %v9040_v8 = vsub.f32 %v5411_v31, %v9007_v26  ;;  %v9715_v16 = vand.u32 4294901760, %v8675_v27 }
 0x314   : > { %4570 = vmatpush.msra.mxu2 %v8783_v53  ;;  %4658 = vmatpush.msrb.mxu0 %v9709_v61  ;;  %v1389_v24 = vadd.f32 %v9714_v41, %v1314_v33  ;;  %v4811_v31 = vsub.f32 %v8988_v2, %v9020_v59  ;;  %v9054_v17 = vsub.f32 %v5410_v46, %v9022_v10  ;;  %v9716_v33 = vand.u32 4294901760, %v8702_v56 }
 0x315   : > { %4729 = vmatpush.msrb.mxu1 %v8687_v48  ;;  %4619 = vmatpush.msra.mxu3 %v8768_v57  ;;  %v9042_v48 = vand.u32 4294901760, %v5409_v4  ;;  %v2051_v61 = vadd.f32 %v9713_v12, %v1976_v7  ;;  %v4806_v27 = vand.u32 4294901760, %v4805_v13  ;;  %v4817_v7 = vsub.f32 %v9010_v0, %v9037_v50 }
 0x316   : > { %4573 = vmatpush.msra.mxu2 %v8795_v52  ;;  %4662 = vmatpush.msrb.mxu0 %v9712_v32  ;;  %v4377_v32 = vsel %vm143_vm1, %v4370_v44, 0  ;;  %v9065_v12 = vand.u32 4294901760, %v9040_v8  ;;  %v9080_v45 = vand.u32 4294901760, %v9054_v17 }
 0x317   : > { %4731 = vmatpush.msrb.mxu1 %v8710_v15  ;;  %4621 = vmatpush.msra.mxu3 %v8785_v47  ;;  %v4373_v15 = vrot.slane %v4336_v42, 6  ;;  %v9068_v46 = vsub.f32 %v5409_v4, %v9042_v48  ;;  %v9073_v42 = vand.u32 4294901760, %v4377_v32  ;;  %v4812_v4 = vand.u32 4294901760, %v4811_v31 }
 0x318   : > { %4576 = vmatpush.msra.mxu2 %v8814_v22  ;;  %4666 = vmatpush.msrb.mxu0 %v9715_v16  ;;  %v9718_v16 = vld [vmem:[#allocation37_spill] sm:$0xff] }
 0x319   : > { %4733 = vmatpush.msrb.mxu1 %v8728_v51  ;;  %4623 = vmatpush.msra.mxu3 %v8797_v28  ;;  %v3454_v44 = vpop.f32.mrf.mxu2  ;;  %v9717_v51 = vld [vmem:[#allocation59_spill] sm:$0xff]  ;;  %v3382_v56 = vpop.f32.mrf.mxu0  ;;  %v9095_v31 = vand.u32 4294901760, %v9068_v46  ;;  %v9105_v36 = vsub.f32 %v4377_v32, %v9073_v42 }
 0x31a   : > { %4579 = vmatpush.msra.mxu2 %v8826_v3  ;;  %4670 = vmatpush.msrb.mxu0 %v9716_v33  ;;  %v2092_v41 = vadd.f32 %v9717_v51, %v2051_v61  ;;  %v3455_v13 = vadd.f32 %v3454_v44, %v3420_v14  ;;  %v1430_v33 = vadd.f32 %v9718_v16, %v1389_v24  ;;  %v3513_v61 = vpop.f32.mrf.mxu3  ;;  %v3423_v14 = vpop.f32.mrf.mxu1  ;;  %v9726_v16 = vld [vmem:[#allocation46_spill] sm:$0xff] }
 0x31b   : > { %4735 = vmatpush.msrb.mxu1 %v8752_v37  ;;  %4625 = vmatpush.msra.mxu3 %v8828_v43  ;;  %v3383_v51 = vadd.f32 %v3382_v56, %v3310_v40  ;;  %v9719_v37 = vld [vmem:[#allocation56_spill] sm:$0xff]  ;;  %v4374_v24 = vsel %vm4364_vm0, %v4369_v6, %v4373_v15  ;;  %v4823_v40 = vsub.f32 %v9040_v8, %v9065_v12 }
 0x31c   : > { %4582 = vmatpush.msra.mxu2 %v8853_v5  ;;  %4629 = vmatmul.f32.vlgmr.msra.gmra.mxu3 %v4415_v38  ;;  %v2127_v49 = vadd.f32 %v9719_v37, %v2092_v41  ;;  %v9089_v44 = vadd.f32 %v3513_v61, %v3455_v13  ;;  %v4818_v38 = vand.u32 4294901760, %v4817_v7  ;;  %v4379_v6 = vsel %vm143_vm1, %v4374_v24, 0  ;;  %v9730_v61 = vld [vmem:[#allocation47_spill] sm:$0xff]  ;;  %v9731_v37 = vld [vmem:[#allocation62_spill] sm:$0xff] }
 0x31d   : > { %4674 = vmatpush.msrb.mxu0 %v9720_v23  ;;  %4737 = vmatpush.msrb.mxu1 %v8768_v57  ;;  %v3424_v25 = vadd.f32 %v3423_v14, %v3383_v51  ;;  %v9721_v57 = vld [vmem:[#allocation38_spill] sm:$0xff]  ;;  %v4835_v15 = vsub.f32 %v9068_v46, %v9095_v31  ;;  %v9118_v32 = vand.u32 4294901760, %v4379_v6 }
 0x31e   : > { %4585 = vmatmul.f32.vlgmr.msra.gmra.mxu2 %v8901_v62  ;;  %4807 = vmatpush.msrb.mxu3 %v4806_v27  ;;  %v1465_v23 = vadd.f32 %v9721_v57, %v1430_v33  ;;  %v4829_v62 = vsub.f32 %v9054_v17, %v9080_v45  ;;  %v9724_v27 = vld [vmem:[#allocation60_spill] sm:$0xff] }
 0x31f   : > { %4764 = vmatpush.msrb.mxu2 %v8951_v18  ;;  %4678 = vmatpush.msrb.mxu0 %v4486_v34  ;;  %v2186_v34 = vadd.f32 %v9722_v20, %v2127_v49  ;;  %v4777_v49 = vand.u32 4294901760, %v9105_v36 }
 0x320   : > { %4739 = vmatpush.msrb.mxu1 %v8785_v47  ;;  %4813 = vmatpush.msrb.mxu3 %v4812_v4  ;;  %v4824_v47 = vand.u32 4294901760, %v4823_v40  ;;  %v9727_v4 = vld [vmem:[#allocation61_spill] sm:$0xff] }
 0x321   : > { %4682 = vmatpush.msrb.mxu0 %v4492_v35  ;;  %4766 = vmatpush.msrb.mxu2 %v8961_v55  ;;  %v1524_v35 = vadd.f32 %v9723_v60, %v1465_v23  ;;  %v2224_v7 = vadd.f32 %v9724_v27, %v2186_v34 }
 0x322   : > { %4741 = vmatpush.msrb.mxu1 %v8797_v28  ;;  %4819 = vmatpush.msrb.mxu3 %v4818_v38  ;;  %v4830_v28 = vand.u32 4294901760, %v4829_v62  ;;  %v3517_v56 = vpop.f32.mrf.mxu3  ;;  %v9732_v38 = vld [vmem:[#allocation44_spill] sm:$0xff]  ;;  %v9734_v62 = vld [vmem:[#allocation45_spill] sm:$0xff] }
 0x323   : > { %4686 = vmatpush.msrb.mxu0 %v4498_v58  ;;  %4768 = vmatpush.msrb.mxu2 %v8975_v21  ;;  %v3462_v41 = vpop.f32.mrf.mxu2  ;;  %v4836_v58 = vand.u32 4294901760, %v4835_v15  ;;  %v1562_v33 = vadd.f32 %v9726_v16, %v1524_v35  ;;  %v2258_v52 = vadd.f32 %v9727_v4, %v2224_v7 }
 0x324   : > { %4743 = vmatpush.msrb.mxu1 %v8828_v43  ;;  %4635 = vmatmul.f32.gmra.mxu3 %v4423_v63  ;;  %v3463_v53 = vadd.f32 %v3462_v41, %v3424_v25  ;;  %v9725_v43 = vand.u32 4294901760, %v8814_v22  ;;  %v9134_v63 = vsub.f32 %v4379_v6, %v9118_v32  ;;  %v9729_v22 = vand.u32 4294901760, %v8853_v5 }
 0x325   : > { %4745 = vmatmul.f32.vlgmr.msrb.gmra.mxu1 %v8890_v1  ;;  %4690 = vmatpush.msrb.mxu0 %v4504_v29  ;;  %v4778_v29 = vsub.f32 %v9105_v36, %v4777_v49  ;;  %v1596_v51 = vadd.f32 %v9730_v61, %v1562_v33  ;;  %v2303_v14 = vadd.f32 %v9731_v37, %v2258_v52  ;;  %v3630_v6 = vpop.f32.mrf.mxu0 }
 0x326   : > { %4590 = vmatmul.f32.gmra.mxu2 %v8930_v30  ;;  %4825 = vmatpush.msrb.mxu3 %v4824_v47  ;;  %v3518_v13 = vadd.f32 %v3517_v56, %v3463_v53  ;;  %v9728_v30 = vand.u32 4294901760, %v8826_v3  ;;  %v4785_v24 = vand.u32 4294901760, %v9134_v63  ;;  %v3661_v47 = vpop.f32.mrf.mxu1 }
 0x327   : > { %4770 = vmatpush.msrb.mxu2 %v9007_v26  ;;  %4694 = vmatpush.msrb.mxu0 %v9725_v43  ;;  %v4779_v3 = vand.u32 4294901760, %v4778_v29  ;;  %v1641_v5 = vadd.f32 %v9732_v38, %v1596_v51 }
 0x328   : > { %4975 = vmatpush.msra.mxu1 %v8951_v18  ;;  %4831 = vmatpush.msrb.mxu3 %v4830_v28 }
 0x329   : > { %4698 = vmatpush.msrb.mxu0 %v9728_v30  ;;  %4772 = vmatpush.msrb.mxu2 %v9022_v10 }
 0x32a   : > { %4977 = vmatpush.msra.mxu1 %v8961_v55  ;;  %4837 = vmatpush.msrb.mxu3 %v4836_v58 }
 0x32b   : > { %4702 = vmatpush.msrb.mxu0 %v9729_v22  ;;  %4774 = vmatpush.msrb.mxu2 %v9042_v48 }
 0x32c   : > { %4704 = vmatmul.f32.vlgmr.msrb.gmra.mxu0 %v8890_v1  ;;  %4839 = vmatmul.f32.vlgmr.msrb.gmra.mxu3 %v9073_v42  ;;  %v9733_v1 = vld [vmem:[#allocation63_spill] sm:$0xff]  ;;  %v3585_v57 = vpop.f32.mrf.mxu3 }
 0x32d   : > { %4749 = vmatmul.f32.gmra.mxu1 %v8915_v19  ;;  %4859 = vmatpush.msra.mxu2 %v8973_v39  ;;  %v2334_v25 = vadd.f32 %v9733_v1, %v2303_v14  ;;  %v4786_v39 = vsub.f32 %v9134_v63, %v4785_v24 }
 0x32e   : > { %4979 = vmatpush.msra.mxu1 %v8975_v21  ;;  %4780 = vmatmul.f32.vlgmr.msrb.gmra.mxu2 %v4779_v3  ;;  %v3551_v40 = vpop.f32.mrf.mxu2  ;;  %v3665_v7 = vpop.f32.mrf.mxu1 }
 0x32f   : > { %4897 = vmatpush.msra.mxu3 %v8951_v18  ;;  %4862 = vmatpush.msra.mxu2 %v8988_v2  ;;  %v3552_v23 = vadd.f32 %v3551_v40, %v9089_v44  ;;  %v1672_v2 = vadd.f32 %v9734_v62, %v1641_v5  ;;  %v4787_v44 = vand.u32 4294901760, %v4786_v39 }
 0x330   : > { %4981 = vmatpush.msra.mxu1 %v9007_v26  ;;  %4934 = vmatpush.msra.mxu0 %v9005_v54 }
 0x331   : > { %4899 = vmatpush.msra.mxu3 %v8961_v55  ;;  %4865 = vmatpush.msra.mxu2 %v9010_v0  ;;  %v3586_v20 = vadd.f32 %v3585_v57, %v3552_v23  ;;  %v2340_v34 = vadd.f32 %v2334_v25, %v1672_v2 }
 0x332   : > { %4983 = vmatpush.msra.mxu1 %v9022_v10  ;;  %4938 = vmatpush.msra.mxu0 %v9020_v59 }
 0x333   : > { %4868 = vmatpush.msra.mxu2 %v9040_v8  ;;  %4901 = vmatpush.msra.mxu3 %v8975_v21  ;;  %v3631_v0 = vadd.f32 %v3630_v6, %v3586_v20  ;;  %v3004_v15 = vadd.f32 %v8807_v9, %v2340_v34 }
 0x334   : > { %4985 = vmatpush.msra.mxu1 %v9042_v48  ;;  %4708 = vmatmul.f32.gmra.mxu0 %v8915_v19 }
 0x335   : > { %4987 = vmatmul.f32.vlgmr.msra.gmra.mxu1 %v9073_v42  ;;  %4843 = vmatmul.f32.gmra.mxu3 %v9118_v32  ;;  %v3662_v8 = vadd.f32 %v3661_v47, %v3631_v0  ;;  %v3591_v9 = vpop.f32.mrf.mxu3 }
 0x336   : > { %4942 = vmatpush.msra.mxu0 %v9037_v50  ;;  %4788 = vmatmul.f32.gmra.mxu2 %v4787_v44 }
 0x337   : > { %4903 = vmatpush.msra.mxu3 %v9007_v26  ;;  %4871 = vmatpush.msra.mxu2 %v9054_v17  ;;  %v3556_v60 = vpop.f32.mrf.mxu2  ;;  %v9183_v19 = vadd.f32 %v3662_v8, %v3004_v15  ;;  %v3634_v17 = vpop.f32.mrf.mxu0 }
 0x338   : > { %4946 = vmatpush.msra.mxu0 %v9065_v12  ;;  %v3557_v35 = vadd.f32 %v3556_v60, %v3518_v13 }
 0x339   : > { %4905 = vmatpush.msra.mxu3 %v9022_v10  ;;  %4874 = vmatpush.msra.mxu2 %v9068_v46 }
 0x33a   : > { %4950 = vmatpush.msra.mxu0 %v9080_v45  ;;  %v3592_v27 = vadd.f32 %v3591_v9, %v3557_v35 }
 0x33b   : > { %5424 = vmatpush.msrb.mxu2 %v9005_v54  ;;  %4907 = vmatpush.msra.mxu3 %v9042_v48 }
 0x33c   : > { %4954 = vmatpush.msra.mxu0 %v9095_v31  ;;  %v3635_v46 = vadd.f32 %v3634_v17, %v3592_v27 }
 0x33d   : > { %5430 = vmatpush.msrb.mxu3 %v8951_v18  ;;  %4956 = vmatmul.f32.vlgmr.msra.gmra.mxu0 %v9073_v42 }
 0x33e   : > { %4911 = vmatmul.f32.vlgmr.msra.gmra.mxu3 %v4777_v49  ;;  %4877 = vmatmul.f32.vlgmr.msra.gmra.mxu2 %v9105_v36  ;;  %v3666_v54 = vadd.f32 %v3665_v7, %v3635_v46 }
 0x33f   : > { %5431 = vmatpush.msrb.mxu3 %v8961_v55  ;;  %5425 = vmatpush.msrb.mxu2 %v9020_v59  ;;  %v3966_v59 = vpop.f32.mrf.mxu1 }
 0x340   : > { %v3669_v18 = vadd.f32 %v3666_v54, %v8878_v11 }
 0x341   : > { %5432 = vmatpush.msrb.mxu3 %v8975_v21  ;;  %5426 = vmatpush.msrb.mxu2 %v9037_v50 }
 0x343   : > { %5433 = vmatpush.msrb.mxu3 %v9007_v26  ;;  %5427 = vmatpush.msrb.mxu2 %v9065_v12 }
 0x344   : > { %v3922_v11 = vpop.f32.mrf.mxu0 }
 0x345   : > { %5434 = vmatpush.msrb.mxu3 %v9022_v10  ;;  %5428 = vmatpush.msrb.mxu2 %v9080_v45  ;;  %v3864_v55 = vpop.f32.mrf.mxu3 }
 0x346   : > { %4917 = vmatmul.f32.gmra.mxu3 %v4785_v24  ;;  %4882 = vmatmul.f32.gmra.mxu2 %v9134_v63  ;;  %v3755_v21 = vpop.f32.mrf.mxu2 }
 0x347   : > { %5435 = vmatpush.msrb.mxu3 %v9042_v48  ;;  %5429 = vmatpush.msrb.mxu2 %v9095_v31  ;;  %v3972_v45 = vpop.f32.mrf.mxu1  ;;  %v3865_v28 = vadd.f32 %v3864_v55, %v3755_v21 }
 0x349   : > { %v3923_v48 = vadd.f32 %v3922_v11, %v3865_v28 }
 0x34b   : > { %v3967_v53 = vadd.f32 %v3966_v59, %v3923_v48 }
 0x34d   : > { %v3927_v12 = vpop.f32.mrf.mxu0 }
 0x34e   : > { %4991 = vmatmul.f32.vlgmr.msrb.gmra.mxu3 %v9118_v32  ;;  %4960 = vmatmul.f32.vlgmr.msrb.gmra.mxu2 %v9118_v32 }
 0x34f   : > { %v3868_v26 = vpop.f32.mrf.mxu3 }
 0x350   : > { %v4176_v41 = vpop.f32.mrf.mxu1 }
 0x351   : > { %v3763_v10 = vpop.f32.mrf.mxu2 }
 0x352   : > { %v3869_v50 = vadd.f32 %v3868_v26, %v3763_v10 }
 0x354   : > { %v3928_v42 = vadd.f32 %v3927_v12, %v3869_v50 }
 0x356   : > { %v3973_v36 = vadd.f32 %v3972_v45, %v3928_v42 }
 0x359   : > { %v4117_v49 = vpop.f32.mrf.mxu0  ;;  %v4180_v16 = vpop.f32.mrf.mxu1 }
 0x362   : > { %v4125_v63 = vpop.f32.mrf.mxu0 }
 0x363   : > { %v4248_v51 = vpop.f32.mrf.mxu1 }
 0x36c   : > { %v4214_v30 = vpop.f32.mrf.mxu0 }
 0x36d   : > { %v4041_v31 = vpop.f32.mrf.mxu2  ;;  %v4082_v56 = vpop.f32.mrf.mxu3 }
 0x36e   : > { %v4042_v58 = vadd.f32 %v4041_v31, %v3967_v53  ;;  %v4254_v39 = vpop.f32.mrf.mxu1 }
 0x370   : > { %v4083_v43 = vadd.f32 %v4082_v56, %v4042_v58 }
 0x372   : > { %v4118_v13 = vadd.f32 %v4117_v49, %v4083_v43 }
 0x374   : > { %v4177_v4 = vadd.f32 %v4176_v41, %v4118_v13 }
 0x376   : > { %v4215_v22 = vadd.f32 %v4214_v30, %v4177_v4 }
 0x377   : > { %v4045_v32 = vpop.f32.mrf.mxu2  ;;  %v4086_v52 = vpop.f32.mrf.mxu3 }
 0x378   : > { %v4046_v33 = vadd.f32 %v4045_v32, %v3973_v36  ;;  %v4249_v37 = vadd.f32 %v4248_v51, %v4215_v22  ;;  %v4219_v40 = vpop.f32.mrf.mxu0 }
 0x37a   : > { %v4087_v29 = vadd.f32 %v4086_v52, %v4046_v33 }
 0x37c   : > { %v4126_v61 = vadd.f32 %v4125_v63, %v4087_v29 }
 0x37e   : > { %v4181_v24 = vadd.f32 %v4180_v16, %v4126_v61  ;;  %v4528_v44 = vpop.f32.mrf.mxu1 }
 0x380   : > { %v4220_v25 = vadd.f32 %v4219_v40, %v4181_v24 }
 0x381   : > { %v4324_v38 = vpop.f32.mrf.mxu3 }
 0x382   : > { %v4293_v14 = vpop.f32.mrf.mxu2  ;;  %v4255_v57 = vadd.f32 %v4254_v39, %v4220_v25 }
 0x383   : > { %v4294_v3 = vadd.f32 %v4293_v14, %v4249_v37 }
 0x385   : > { %v4325_v5 = vadd.f32 %v4324_v38, %v4294_v3 }
 0x387   : > { %v4331_v1 = vadd.f32 %v4325_v5, %v9183_v19  ;;  %v4419_v34 = vpop.f32.mrf.mxu0 }
 0x388   : > { %v4532_v35 = vpop.f32.mrf.mxu1  ;;  %v4529_v9 = vadd.f32 %v4528_v44, %v4419_v34 }
 0x38b   : > { %v4328_v2 = vpop.f32.mrf.mxu3 }
 0x38c   : > { %v4297_v23 = vpop.f32.mrf.mxu2 }
 0x38d   : > { %v4298_v62 = vadd.f32 %v4297_v23, %v4255_v57 }
 0x38f   : > { %v4329_v6 = vadd.f32 %v4328_v2, %v4298_v62 }
 0x390   : > { %v4427_v8 = vpop.f32.mrf.mxu0 }
 0x391   : > { %v4332_v20 = vadd.f32 %v4329_v6, %v3669_v18  ;;  %v4533_v21 = vadd.f32 %v4532_v35, %v4427_v8 }
 0x39f   : > { %v4630_v47 = vpop.f32.mrf.mxu3 }
 0x3a1   : > { %v4586_v0 = vpop.f32.mrf.mxu2 }
 0x3a2   : > { %v4587_v17 = vadd.f32 %v4586_v0, %v4529_v9  ;;  %v4746_v7 = vpop.f32.mrf.mxu1 }
 0x3a4   : > { %v4631_v54 = vadd.f32 %v4630_v47, %v4587_v17 }
 0x3a7   : > { %v4636_v15 = vpop.f32.mrf.mxu3 }
 0x3a9   : > { %v4591_v60 = vpop.f32.mrf.mxu2  ;;  %v4705_v19 = vpop.f32.mrf.mxu0 }
 0x3aa   : > { %v4706_v55 = vadd.f32 %v4705_v19, %v4631_v54  ;;  %v4592_v18 = vadd.f32 %v4591_v60, %v4533_v21  ;;  %v4750_v12 = vpop.f32.mrf.mxu1 }
 0x3ac   : > { %v4747_v26 = vadd.f32 %v4746_v7, %v4706_v55  ;;  %v4637_v42 = vadd.f32 %v4636_v15, %v4592_v18 }
 0x3af   : > { %v4840_v27 = vpop.f32.mrf.mxu3 }
 0x3b1   : > { %v4781_v46 = vpop.f32.mrf.mxu2  ;;  %v4709_v10 = vpop.f32.mrf.mxu0 }
 0x3b2   : > { %v4782_v50 = vadd.f32 %v4781_v46, %v4747_v26  ;;  %v4710_v45 = vadd.f32 %v4709_v10, %v4637_v42  ;;  %v4988_v43 = vpop.f32.mrf.mxu1 }
 0x3b4   : > { %v4841_v28 = vadd.f32 %v4840_v27, %v4782_v50  ;;  %v4751_v41 = vadd.f32 %v4750_v12, %v4710_v45  ;;  %v5506_v45 = vld [vmem:[%s5660_s25 + $0x18] sm:$0xff] }
 0x3b8   : > { %v4844_v11 = vpop.f32.mrf.mxu3 }
 0x3b9   : > { %v4789_v59 = vpop.f32.mrf.mxu2 }
 0x3ba   : > { %v4957_v31 = vpop.f32.mrf.mxu0  ;;  %v4790_v58 = vadd.f32 %v4789_v59, %v4751_v41 }
 0x3bc   : > { %v4845_v33 = vadd.f32 %v4844_v11, %v4790_v58 }
 0x3c1   : > { %v4912_v36 = vpop.f32.mrf.mxu3  ;;  %v4878_v49 = vpop.f32.mrf.mxu2 }
 0x3c2   : > { %v4879_v48 = vadd.f32 %v4878_v49, %v4841_v28 }
 0x3c4   : > { %v4913_v53 = vadd.f32 %v4912_v36, %v4879_v48 }
 0x3c6   : > { %v4958_v56 = vadd.f32 %v4957_v31, %v4913_v53  ;;  %v5507_v31 = vld [vmem:[%s5660_s25 + $0x8] sm:$0xff] }
 0x3c8   : > { %v4989_v63 = vadd.f32 %v4988_v43, %v4958_v56 }
 0x3c9   : > { %v4918_v13 = vpop.f32.mrf.mxu3  ;;  %v4883_v16 = vpop.f32.mrf.mxu2 }
 0x3ca   : > { %v4995_v32 = vadd.f32 %v4989_v63, %v4331_v1  ;;  %v4884_v52 = vadd.f32 %v4883_v16, %v4845_v33 }
 0x3cc   : > { %v5415_v4 = vmul.f32 -1.442695, %v4995_v32  ;;  %v4919_v29 = vadd.f32 %v4918_v13, %v4884_v52 }
 0x3ce   : > { %5493 = vpow2.f32 %v5415_v4 }
 0x3d1   : > { %v4961_v30 = vpop.f32.mrf.mxu2  ;;  %v4992_v61 = vpop.f32.mrf.mxu3 }
 0x3d2   : > { %v4962_v22 = vadd.f32 %v4961_v30, %v4919_v29 }
 0x3d4   : > { %v5494_v51 = vpop.eup %5493  ;;  %v4993_v37 = vadd.f32 %v4992_v61, %v4962_v22 }
 0x3d5   : > { %v5003_v14 = vadd.f32 1.0, %v5494_v51 }
 0x3d6   : > { %v4996_v3 = vadd.f32 %v4993_v37, %v4332_v20 }
 0x3d7   : > { %5495 = vrcp.f32 %v5003_v14  ;;  %v5016_v1 = vand.u32 2147483648, %v5003_v14  ;;  %v5014_v23 = vand.u32 2147483647, %v5003_v14  ;;  %vm5010_vm7 = vweird.f32 %v5003_v14 }
 0x3d8   : > { %v5416_v24 = vmul.f32 -1.442695, %v4996_v3 }
 0x3d9   : > { %v5017_v2 = vor.u32 1.1754944e-38, %v5016_v1  ;;  %vm5015_vm9 = vcmp.eq.f32.partialorder %v5014_v23, 8.507059e+37 }
 0x3da   : > { %5497 = vpow2.f32 %v5416_v24  ;;  %v5508_v24 = vld [vmem:[%s5660_s25] sm:$0xff] }
 0x3dd   : > { %v5496_v38 = vpop.eup %5495 }
 0x3de   : > { %v5006_v5 = vmul.f32 %v5496_v38, %v5003_v14  ;;  %vm5011_vm6 = vweird.f32 %v5496_v38 }
 0x3df   : > { %vm5012_vm8 = vmor %vm5010_vm7, %vm5011_vm6 }
 0x3e0   : > { %v5498_v40 = vpop.eup %5497  ;;  %v5007_v25 = vsub.f32 1.0, %v5006_v5 }
 0x3e1   : > { %v5004_v39 = vadd.f32 1.0, %v5498_v40  ;;  %v5509_v40 = vld [vmem:[%s5660_s25 + $0x10] sm:$0xff]  ;;  %s134_s25 = sand.u32 1, %s5564_s10  }
 0x3e2   : > { %v5008_v57 = vmul.f32 %v5496_v38, %v5007_v25  ;;  %s5199_s17 = scalar_lea.sflag [#allocation4], %s134_s25 }
 0x3e3   : > { %5499 = vrcp.f32 %v5004_v39  ;;  %v5031_v0 = vand.u32 2147483648, %v5004_v39  ;;  %v5029_v8 = vand.u32 2147483647, %v5004_v39  ;;  %vm5025_vm11 = vweird.f32 %v5004_v39 }
 0x3e4   : > { %v5009_v62 = vadd.f32 %v5496_v38, %v5008_v57 }
 0x3e5   : > { %v5032_v35 = vor.u32 1.1754944e-38, %v5031_v0  ;;  %vm5030_vm13 = vcmp.eq.f32.partialorder %v5029_v8, 8.507059e+37 }
 0x3e6   : > { %v5013_v6 = vsel %vm5012_vm8, %v5496_v38, %v5009_v62 }
 0x3e7   : > { %v9213_v20 = vsel %vm5015_vm9, %v5017_v2, %v5013_v6 }
 0x3e8   : > { %5101 = vrot.lane.b32.xlu2 %v9213_v20, %s5576_s28  ;;  %5087 = vrot.lane.b32.xlu0 %v9213_v20, %s5574_s26 }
 0x3e9   : > { %v5500_v34 = vpop.eup %5499 }
 0x3ea   : > { %v5021_v47 = vmul.f32 %v5500_v34, %v5004_v39  ;;  %vm5026_vm10 = vweird.f32 %v5500_v34 }
 0x3eb   : > { %vm5027_vm12 = vmor %vm5025_vm11, %vm5026_vm10 }
 0x3ec   : > { %v5022_v44 = vsub.f32 1.0, %v5021_v47 }
 0x3ee   : > { %v5023_v15 = vmul.f32 %v5500_v34, %v5022_v44 }
 0x3f0   : > { %v5024_v60 = vadd.f32 %v5500_v34, %v5023_v15 }
 0x3f2   : > { %v5028_v9 = vsel %vm5027_vm12, %v5500_v34, %v5024_v60 }
 0x3f3   : > { %v9219_v27 = vsel %vm5030_vm13, %v5032_v35, %v5028_v9 }
 0x3f4   : > { %5089 = vrot.lane.b32.xlu1 %v9219_v27, %s5574_s26  ;;  %5067 = vrot.lane.b32.xlu2 %v9219_v27, %s5575_s27  ;;  %s5588_s26 = smov 64  }
 0x3f5   : > { %5103 = vrot.lane.b32.xlu0 %v9219_v27, %s5576_s28  ;;  %s5280_s28 = sshll.u32 %s134_s25, 4 }
 0x3f6   : > { %s136_s4 = scalar_lea.vmem [#allocation3], %s5280_s28 }
 0x3f7   : > { %s5211_s14 = sshll.u32 %s136_s4, 4  ;;  %s5212_s14 = int_to_ptr.vmem [resolvable:$true] %s5211_s14 }
 0x3fc   : > { %5065 = vrot.lane.b32.xlu1 %v9213_v20, %s5575_s27  ;;  %5037 = vrot.lane.b32.xlu2 %v9213_v20, %s5586_s30  ;;  %s5589_s27 = smov 48  }
 0x404   : > { %5045 = vrot.lane.b32.xlu2 %v9219_v27, %s5587_s3 }
 0x442   : > { %v5102_v17 = vpop.permute.xlu2 %5101 }
 0x44e   : > { %v5068_v46 = vpop.permute.xlu2 %5067 }
 0x44f   : > { %v5072_v16 = vsel %vm5055_vm14, %v5068_v46, %v9219_v27 }
 0x456   : > { %v5038_v49 = vpop.permute.xlu2 %5037 }
 0x457   : > { %v5056_v35 = vsel %vm5055_vm14, %v9213_v20, %v5038_v49 }
 0x45a   : > { %v5088_v19 = vpop.permute.xlu0 %5087 }
 0x45b   : > { %v5107_v18 = vsel %vm5055_vm14, %v5102_v17, %v5088_v19 }
 0x45e   : > { %v5046_v4 = vpop.permute.xlu2 %5045 }
 0x466   : > { %v5090_v7 = vpop.permute.xlu1 %5089 }
 0x467   : > { %v5094_v54 = vsel %vm5055_vm14, %v5090_v7, %v5068_v46  ;;  %v5104_v55 = vpop.permute.xlu0 %5103 }
 0x468   : > { %v5108_v21 = vsel %vm5055_vm14, %v5104_v55, %v5090_v7  ;;  %v5096_v32 = vsel %vm5058_vm15, %v5094_v54, %v9219_v27 }
 0x469   : > { %v5110_v11 = vsel %vm5058_vm15, %v5108_v21, %v5068_v46 }
 0x46a   : > { %v5112_v59 = vsel %vm143_vm1, %v5110_v11, %v9219_v27 }
 0x46b   : > { %5117 = vrot.lane.b32.xlu1 %v5112_v59, %s5588_s26 }
 0x46e   : > { %v5066_v26 = vpop.permute.xlu1 %5065 }
 0x46f   : > { %v5109_v10 = vsel %vm5058_vm15, %v5107_v18, %v5066_v26  ;;  %v5093_v12 = vsel %vm5055_vm14, %v5088_v19, %v5066_v26  ;;  %v5071_v48 = vsel %vm5055_vm14, %v5066_v26, %v9213_v20 }
 0x470   : > { %v5111_v50 = vsel %vm143_vm1, %v5109_v10, %v9213_v20  ;;  %v5095_v28 = vsel %vm5058_vm15, %v5093_v12, %v9213_v20  ;;  %v5073_v43 = vsel %vm5058_vm15, %v5071_v48, %v5038_v49 }
 0x471   : > { %5115 = vrot.lane.b32.xlu0 %v5111_v50, %s5588_s26  ;;  %v5097_v53 = vsel %vm143_vm1, %v5095_v28, %v5038_v49 }
 0x472   : > { %v5099_v13 = vmul.f32 %v5507_v31, %v5097_v53 }
 0x473   : > { %5043 = vrot.lane.b32.xlu1 %v9213_v20, %s5587_s3 }
 0x479   : > { %5039 = vrot.lane.b32.xlu0 %v9219_v27, %s5586_s30 }
 0x4dd   : > { %v5118_v42 = vpop.permute.xlu1 %5117 }
 0x4de   : > { %v5122_v36 = vmul.f32 %v5506_v45, %v5118_v42 }
 0x4e0   : > { %5147 = vrot.lane.b32.xlu1 %v5122_v36, %s5588_s26 }
 0x4e3   : > { %v5116_v41 = vpop.permute.xlu0 %5115 }
 0x4e4   : > { %v5121_v58 = vmul.f32 %v5507_v31, %v5116_v41 }
 0x4e5   : > { %v5044_v56 = vpop.permute.xlu1 %5043 }
 0x4e6   : > { %v5075_v63 = vsel %vm143_vm1, %v5073_v43, %v5044_v56  ;;  %5145 = vrot.lane.b32.xlu0 %v5121_v58, %s5588_s26  ;;  %v5059_v9 = vsel %vm5058_vm15, %v5056_v35, %v5044_v56 }
 0x4e7   : > { %5079 = vrot.lane.b32.xlu2 %v5075_v63, %s5588_s26 }
 0x4e8   : > { %5135 = vrot.lane.b32.xlu1 %v5099_v13, %s5588_s26 }
 0x4eb   : > { %v5040_v33 = vpop.permute.xlu0 %5039 }
 0x4ec   : > { %v5074_v52 = vsel %vm5058_vm15, %v5072_v16, %v5040_v33  ;;  %v5098_v29 = vsel %vm143_vm1, %v5096_v32, %v5040_v33  ;;  %v5057_v11 = vsel %vm5055_vm14, %v9219_v27, %v5040_v33 }
 0x4ed   : > { %v5076_v30 = vsel %vm143_vm1, %v5074_v52, %v5046_v4  ;;  %v5100_v22 = vmul.f32 %v5506_v45, %v5098_v29  ;;  %v5060_v18 = vsel %vm5058_vm15, %v5057_v11, %v5046_v4 }
 0x4ee   : > { %5081 = vrot.lane.b32.xlu0 %v5076_v30, %s5588_s26 }
 0x4ef   : > { %5137 = vrot.lane.b32.xlu2 %v5100_v22, %s5588_s26 }
 0x4f7   : > { %5049 = vrot.lane.b32.xlu2 %v9213_v20, %s5589_s27 }
 0x541   : > { %v5080_v37 = vpop.permute.xlu2 %5079 }
 0x542   : > { %v5085_v38 = vmul.f32 %v5508_v24, %v5080_v37 }
 0x549   : > { %v5138_v1 = vpop.permute.xlu2 %5137 }
 0x551   : > { %v5050_v60 = vpop.permute.xlu2 %5049 }
 0x552   : > { %v5148_v61 = vpop.permute.xlu1 %5147  ;;  %v5061_v17 = vsel %vm143_vm1, %v5059_v9, %v5050_v60 }
 0x553   : > { %v5152_v51 = vadd.f32 %v5148_v61, %v5100_v22  ;;  %v5063_v46 = vmul.f32 %v5508_v24, %v5061_v17 }
 0x555   : > { %5171 = vrot.lane.b32.xlu1 %v5152_v51, %s5588_s26 }
 0x558   : > { %v5146_v14 = vpop.permute.xlu0 %5145 }
 0x559   : > { %v5151_v3 = vadd.f32 %v5146_v14, %v5099_v13 }
 0x55a   : > { %v5136_v57 = vpop.permute.xlu1 %5135 }
 0x55b   : > { %5169 = vrot.lane.b32.xlu0 %v5151_v3, %s5588_s26  ;;  %v5141_v23 = vadd.f32 %v5136_v57, %v5085_v38 }
 0x55d   : > { %5125 = vrot.lane.b32.xlu1 %v5085_v38, %s5588_s26 }
 0x560   : > { %v5082_v5 = vpop.permute.xlu0 %5081 }
 0x561   : > { %v5086_v25 = vmul.f32 %v5509_v40, %v5082_v5 }
 0x563   : > { %v5142_v39 = vadd.f32 %v5138_v1, %v5086_v25  ;;  %5051 = vrot.lane.b32.xlu0 %v9219_v27, %s5589_s27  ;;  %5127 = vrot.lane.b32.xlu2 %v5086_v25, %s5588_s26 }
 0x565   : > { %5157 = vrot.lane.b32.xlu1 %v5142_v39, %s5588_s26 }
 0x56b   : > { %5155 = vrot.lane.b32.xlu0 %v5141_v23, %s5588_s26 }
 0x5bd   : > { %v5128_v21 = vpop.permute.xlu2 %5127 }
 0x5c7   : > { %v5172_v62 = vpop.permute.xlu1 %5171 }
 0x5c8   : > { %v5176_v2 = vmul.f32 %v5172_v62, %v5142_v39 }
 0x5ca   : > { %v5178_v6 = vadd.f32 %v5176_v2, %v5142_v39 }
 0x5cc   : > { %v5180_v34 = vadd.f32 %v5178_v6, %v5172_v62 }
 0x5cd   : > { %v5170_v47 = vpop.permute.xlu0 %5169 }
 0x5ce   : > { %5185 = vrot.lane.b32.xlu0 %v5180_v34, %s5588_s26  ;;  %v5175_v44 = vmul.f32 %v5170_v47, %v5141_v23 }
 0x5cf   : > { %v5126_v19 = vpop.permute.xlu1 %5125 }
 0x5d0   : > { %v5177_v0 = vadd.f32 %v5175_v44, %v5141_v23  ;;  %v5131_v54 = vadd.f32 %v5126_v19, %v5063_v46 }
 0x5d2   : > { %v5179_v15 = vadd.f32 %v5177_v0, %v5170_v47 }
 0x5d4   : > { %5183 = vrot.lane.b32.xlu2 %v5179_v15, %s5588_s26 }
 0x5d5   : > { %v5052_v8 = vpop.permute.xlu0 %5051 }
 0x5d6   : > { %v5062_v26 = vsel %vm143_vm1, %v5060_v18, %v5052_v8 }
 0x5d7   : > { %v5064_v50 = vmul.f32 %v5509_v40, %v5062_v26  ;;  %v5158_v27 = vpop.permute.xlu1 %5157 }
 0x5d9   : > { %v5132_v45 = vadd.f32 %v5128_v21, %v5064_v50 }
 0x5db   : > { %v5162_v28 = vmul.f32 %v5158_v27, %v5132_v45 }
 0x5dd   : > { %v5156_v7 = vpop.permute.xlu0 %5155  ;;  %v5164_v49 = vadd.f32 %v5162_v28, %v5132_v45 }
 0x5de   : > { %v5161_v55 = vmul.f32 %v5156_v7, %v5131_v54 }
 0x5df   : > { %v5166_v48 = vadd.f32 %v5164_v49, %v5158_v27 }
 0x5e0   : > { %v5163_v59 = vadd.f32 %v5161_v55, %v5131_v54 }
 0x5e2   : > { %v5165_v20 = vadd.f32 %v5163_v59, %v5156_v7 }
 0x62e   : > { %v5184_v10 = vpop.permute.xlu2 %5183 }
 0x62f   : > { %v5189_v12 = vmul.f32 %v5184_v10, %v5165_v20 }
 0x631   : > { %v5191_v42 = vadd.f32 %v5189_v12, %v5165_v20 }
 0x633   : > { %v5193_v36 = vadd.f32 %v5191_v42, %v5184_v10 }
 0x635   : > { %5196 = vst.msk [vmem:[%s136_s4] sm:$0xff] %vm5195_vm2, %v5193_v36 }
 0x640   : > { %v5186_v41 = vpop.permute.xlu0 %5185 }
 0x641   : > { %v5190_v53 = vmul.f32 %v5186_v41, %v5166_v48 }
 0x643   : > { %v5192_v31 = vadd.f32 %v5190_v53, %v5166_v48 }
 0x645   : > { %v5194_v58 = vadd.f32 %v5192_v31, %v5186_v41 }
 0x647   : > { %5197 = vst.msk [vmem:[%s136_s4 + $0x8] sm:$0xff] %vm5195_vm2, %v5194_v58 }
 0x648   : > { %5537 = shalt.err (!%p5534_p3)
}
 0x649   : > { %s5590_s3 = smov 128   ;;  %s5591_s26 = smov 8  }
 0x64a   : > { %5436 = dma.vmem_to_hbm [thread:$0]  (%p5645_p5), %s5212_s14, 256, %s5214_s16, %s5199_s17, %s5590_s3, %s5590_s3, %s5591_s26  }
 0x64b PF: > { %p5442_p4 = scmp.ge.s32.totalorder %s5572_s12, 2  ;;  %s5228_s27 = sand.u32 1, %s5560_s9  }
 0x64c   : > { %s5229_s25 = scalar_lea.sflag [#allocation4], %s5228_s27 }
 0x64d   : > { %p5439_p7 = pnand %p5442_p4, %p5649_p6 }
 0x64f   : > { %p5440_p8 = pneg %p5439_p7 }
 0x651   : > { %5555 = dma.done.wait (%p5440_p8), %s5229_s25, 256  }
 0x652   : > { %5557 = vsyncadd (%p5440_p8), %s5229_s25, 4294967040  ;;  %p12_p9 = scmp.ge.s32.totalorder %s5632_s15, 4   ;;  %s9735_s9 = smov %s5564_s10 }
 0x653   : > { %s9736_s10 = smov %s5568_s11  ;;  %s9737_s11 = smov %s5643_s18 }
 0x654   : > { %s9738_s12 = smov %s5632_s15  ;;  %14 = sbr.rel (!%p12_p9) target bundleno = 3 (0x3), region = 69 }
 0x659   :  { %5235 = vsyncpa [#allocation4], 1 }
 0x65a   :  { %5237 = vsyncpa [#allocation4 + $0x1], 1 }

</bundles_post_ra>
